<compile_context>
chip_gen: v7x
topology: tpu7x:2x2x1
jax: 0.10.0
libtpu: 0.0.40
codegen_flags: <defaults>
</compile_context>

<pallas_src>
import functools

import jax
import jax.numpy as jnp
from jax import lax
from jax.experimental import pallas as pl
from jax.experimental.pallas import tpu as pltpu

_LH = 16  # left-halo / alignment pad (= bf16 sublane tile) -> aligned interior stores


def _round_up(x, m):
    return ((x + m - 1) // m) * m


def _fused_kernel(H, W, He, Hp, Wp1, Wp4,
                  x_ref,                         # (H, W, 192)     bf16  (HWC interior)
                  w1_ref, b1_ref,                # (192, 90) bf16, (1, 10) f32   conv1 tap-concat
                  w2_ref, b2_ref,                # (10, 60)  bf16, (1, 60) f32
                  w3_ref, b3_ref,                # (60, 44)  bf16, (1, 44) f32
                  w4_ref, b4_ref,                # (44, 117) bf16, (1, 13) f32   conv4 tap-concat
                  out_ref,                       # (1, 1) f32
                  xpad_ref,                      # (Hp, Wp1, 192)  bf16  halo-padded conv1 input
                  y1_ref,                        # (Hp, Wp1, 90)   f32   conv1 tap matmul
                  v3_ref,                        # (He, W, 60)     f32   pre-pool features
                  v8pad_ref,                     # (Ho+2, Wp4, 44) bf16  halo-padded conv4 input
                  y4_ref):                       # (Ho+2, Wp4, 117) f32  conv4 tap matmul
    f32, bf16 = jnp.float32, jnp.bfloat16
    We = W
    Ho, Wo = He // 2, We // 2

    # ---- build halo-padded conv1 input in VMEM (no wrapper jnp.pad round trip) --
    # interior store lands at sublane offset _LH (a full bf16 tile) -> aligned vst.
    xpad_ref[pl.ds(1, H), pl.ds(_LH, W), :] = x_ref[...]
    xpad_ref[pl.ds(0, 1), :, :] = jnp.zeros((1, Wp1, 192), bf16)           # top halo row
    if H == He:                                                            # bottom halo row
        xpad_ref[pl.ds(He + 1, 1), :, :] = jnp.zeros((1, Wp1, 192), bf16)
    # (odd H: the "bottom halo" row is the real last input row, which is exactly
    #  what the conv rows surviving the floor of the 2x2 pool need.)
    xpad_ref[pl.ds(1, H), pl.ds(0, _LH), :] = jnp.zeros((H, _LH, 192), bf16)
    xpad_ref[pl.ds(1, H), pl.ds(_LH + W, Wp1 - _LH - W), :] = (
        jnp.zeros((H, Wp1 - _LH - W, 192), bf16))

    # ---- conv1 (3x3, 192->10): ONE tap-concatenated bf16 MXU matmul -------------
    # y1[p, 10*t + o] = <x_pad[p, :], w1[o, :, kh, kw]>,  t = 3*kh + kw
    y1_ref[...] = jnp.dot(xpad_ref[...].reshape(Hp * Wp1, 192), w1_ref[...],
                          preferred_element_type=f32).reshape(Hp, Wp1, 90)

    # combine the 9 taps with shifted adds, then bias + sigmoid  -> (He, We, 10)
    acc = None
    for kh in range(3):
        for kw in range(3):
            t = 3 * kh + kw
            tap = y1_ref[pl.ds(kh, He), pl.ds(_LH - 1 + kw, We), pl.ds(10 * t, 10)]
            acc = tap if acc is None else acc + tap
    v2 = jax.nn.sigmoid(acc + b1_ref[...])

    # ---- conv2 (1x1, 10->60): row-batched bf16 matmul, M = He*We -----------------
    v3 = jnp.dot(v2.reshape(He * We, 10).astype(bf16), w2_ref[...],
                 preferred_element_type=f32) + b2_ref[...]
    v3_ref[...] = v3.reshape(He, We, 60)

    # ---- 2x2/2 max pool: row-pair max via free leading-axis strides, then only ---
    # 2 sublane-strided gathers (on half-height data) for the column-pair max.
    r0 = v3_ref[pl.ds(0, Ho, stride=2), :, :]
    r1 = v3_ref[pl.ds(1, Ho, stride=2), :, :]
    v3_ref[pl.ds(0, Ho), :, :] = jnp.maximum(r0, r1)
    c0 = v3_ref[pl.ds(0, Ho), pl.ds(0, Wo, stride=2), :]
    c1 = v3_ref[pl.ds(0, Ho), pl.ds(1, Wo, stride=2), :]
    v4 = jnp.maximum(c0, c1)                                               # (Ho, Wo, 60)

    # ---- x + x^2, conv3 (1x1, 60->44), sigmoid -----------------------------------
    v6 = v4 + v4 * v4
    v8 = jax.nn.sigmoid(
        jnp.dot(v6.reshape(Ho * Wo, 60).astype(bf16), w3_ref[...],
                preferred_element_type=f32) + b3_ref[...])                 # (Ho*Wo, 44)

    # ---- conv4 (3x3, 44->13): tap-concat matmul over halo-padded pooled grid -----
    # zero ONLY the halo; interior store is sublane-aligned (offset _LH).
    z44 = jnp.zeros((1, Wp4, 44), bf16)
    v8pad_ref[pl.ds(0, 1), :, :] = z44
    v8pad_ref[pl.ds(Ho + 1, 1), :, :] = z44
    v8pad_ref[pl.ds(1, Ho), pl.ds(0, _LH), :] = jnp.zeros((Ho, _LH, 44), bf16)
    v8pad_ref[pl.ds(1, Ho), pl.ds(_LH + Wo, Wp4 - _LH - Wo), :] = (
        jnp.zeros((Ho, Wp4 - _LH - Wo, 44), bf16))
    v8pad_ref[pl.ds(1, Ho), pl.ds(_LH, Wo), :] = v8.reshape(Ho, Wo, 44).astype(bf16)

    y4_ref[...] = jnp.dot(v8pad_ref[...].reshape((Ho + 2) * Wp4, 44), w4_ref[...],
                          preferred_element_type=f32).reshape(Ho + 2, Wp4, 117)

    acc4 = None
    for kh in range(3):
        for kw in range(3):
            t = 3 * kh + kw
            tap = y4_ref[pl.ds(kh, Ho), pl.ds(_LH - 1 + kw, Wo), pl.ds(13 * t, 13)]
            acc4 = tap if acc4 is None else acc4 + tap
    v9 = acc4 + b4_ref[...]                                                # (Ho, Wo, 13)

    # ---- monotone tail collapsed: global max first, transcendentals on a scalar --
    # sigmoid, +1, relu, tanh are all monotone non-decreasing -> max commutes.
    s = jnp.max(jnp.max(v9, axis=0), axis=(0, 1), keepdims=True)           # (1, 1)
    out_ref[...] = jnp.tanh(jnp.maximum(jax.nn.sigmoid(s) + 1.0, 0.0))


def model_forward(x_nchw, params):
    """x_nchw: (1, 192, H, W) f32.  Returns scalar f32 (= torch.max of the net)."""
    w1, b1, w2, b2, w3, b3, w4, b4 = params
    N, C, H, W = x_nchw.shape
    assert N == 1 and C == 192 and H >= 2 and W >= 2

    He = (H // 2) * 2                        # rows feeding the 2x2 pool (handles odd H)
    Ho, Wo = He // 2, W // 2
    Hp = He + 2                              # conv1 halo-padded height
    Wp1 = _round_up(_LH + W + 1, 16)         # conv1 halo+alignment padded width
    Wp4 = _round_up(_LH + Wo + 1, 16)        # conv4 halo+alignment padded width

    bf16 = jnp.bfloat16
    # ---- layout glue (plain JAX): NCHW -> HWC + bf16 cast of MXU operands ----
    x_hwc = jnp.transpose(x_nchw[0], (1, 2, 0)).astype(bf16)               # (H, W, 192)

    # tap-concatenated 3x3 weights: w_cat[cin, Cout*t + o] = w[o, cin, kh, kw]
    w1cat = jnp.transpose(w1, (2, 3, 1, 0)).reshape(9, 192, 10)
    w1cat = jnp.transpose(w1cat, (1, 0, 2)).reshape(192, 90).astype(bf16)
    w4cat = jnp.transpose(w4, (2, 3, 1, 0)).reshape(9, 44, 13)
    w4cat = jnp.transpose(w4cat, (1, 0, 2)).reshape(44, 117).astype(bf16)
    w2m = jnp.transpose(w2[:, :, 0, 0], (1, 0)).astype(bf16)               # (10, 60)
    w3m = jnp.transpose(w3[:, :, 0, 0], (1, 0)).astype(bf16)               # (60, 44)

    scratch_shapes = [
        pltpu.VMEM((Hp, Wp1, 192), bf16),              # xpad: halo-padded conv1 input
        pltpu.VMEM((Hp, Wp1, 90), jnp.float32),        # y1:   conv1 tap matmul
        pltpu.VMEM((He, W, 60), jnp.float32),          # v3:   pre-pool (reused for row-max)
        pltpu.VMEM((Ho + 2, Wp4, 44), bf16),           # v8:   halo-padded conv4 input
        pltpu.VMEM((Ho + 2, Wp4, 117), jnp.float32),   # y4:   conv4 tap matmul
    ]
    # scoped-VMEM limit sized from the actual allocations (+ inputs + margin)
    est = (Hp * Wp1 * 192 * 2 + Hp * Wp1 * 90 * 4 + He * W * 60 * 4
           + (Ho + 2) * Wp4 * (44 * 2 + 117 * 4)
           + H * W * 192 * 2 + (192 * 90 + 44 * 117 + 10 * 60 + 60 * 44) * 2)
    vmem_limit = int(min(max(2 * est + (8 << 20), 32 << 20), 64 << 20))

    kernel = functools.partial(_fused_kernel, H, W, He, Hp, Wp1, Wp4)
    out = pl.pallas_call(
        kernel,
        out_shape=jax.ShapeDtypeStruct((1, 1), jnp.float32),
        in_specs=[pl.BlockSpec(memory_space=pltpu.MemorySpace.VMEM)] * 9,
        out_specs=pl.BlockSpec(memory_space=pltpu.MemorySpace.VMEM),
        scratch_shapes=scratch_shapes,
        compiler_params=pltpu.CompilerParams(vmem_limit_bytes=vmem_limit),
    )(x_hwc,
      w1cat, b1.reshape(1, 10),
      w2m, b2.reshape(1, 60),
      w3m, b3.reshape(1, 44),
      w4cat, b4.reshape(1, 13))
    return out[0, 0]


def reference(x_nchw, params):
    """Pure-JAX reference mirroring the PyTorch forward (NCHW, f32)."""
    w1, b1, w2, b2, w3, b3, w4, b4 = params

    def conv(x, w, b, pad):
        y = lax.conv_general_dilated(
            x, w, window_strides=(1, 1), padding=[(pad, pad), (pad, pad)],
            dimension_numbers=('NCHW', 'OIHW', 'NCHW'),
            precision=lax.Precision.HIGHEST)
        return y + b[None, :, None, None]

    v1 = conv(x_nchw, w1, b1, 1)
    v2 = jax.nn.sigmoid(v1)
    v3 = conv(v2, w2, b2, 0)
    v4 = lax.reduce_window(v3, -jnp.inf, lax.max,
                           (1, 1, 2, 2), (1, 1, 2, 2), 'VALID')
    v6 = v4 + v4 * v4
    v7 = conv(v6, w3, b3, 0)
    v8 = jax.nn.sigmoid(v7)
    v9 = conv(v8, w4, b4, 1)
    v13 = jnp.tanh(jnp.maximum(jax.nn.sigmoid(v9) + 1.0, 0.0))
    return jnp.max(v13)


if __name__ == "__main__":
    key = jax.random.PRNGKey(0)
    ks = jax.random.split(key, 9)

    # Small spatial size consistent with the module (channels fixed by it).
    x = jax.random.normal(ks[0], (1, 192, 16, 16), jnp.float32)

    def winit(k, shape, fan_in):
        return jax.random.normal(k, shape, jnp.float32) / jnp.sqrt(float(fan_in))

    w1 = winit(ks[1], (10, 192, 3, 3), 192 * 9)
    b1 = 0.1 * jax.random.normal(ks[2], (10,), jnp.float32)
    w2 = winit(ks[3], (60, 10, 1, 1), 10)
    b2 = 0.1 * jax.random.normal(ks[4], (60,), jnp.float32)
    w3 = winit(ks[5], (44, 60, 1, 1), 60)
    b3 = 0.1 * jax.random.normal(ks[6], (44,), jnp.float32)
    w4 = winit(ks[7], (13, 44, 3, 3), 44 * 9)
    b4 = 0.1 * jax.random.normal(ks[8], (13,), jnp.float32)
    params = (w1, b1, w2, b2, w3, b3, w4, b4)

    out = jax.block_until_ready(model_forward(x, params))
    ref = jax.block_until_ready(reference(x, params))
    if abs(float(out) - float(ref)) > 1e-2:
        raise AssertionError(f"mismatch: pallas={float(out)} ref={float(ref)}")
    print("KERNEL_OK")
</pallas_src>

<mosaic_0001>
module attributes {stable_mosaic.version = 11 : i64} {
  func.func @_fused_kernel(%arg0: memref<16x16x192xbf16, #tpu.memory_space<vmem>>, %arg1: memref<192x90xbf16, #tpu.memory_space<vmem>>, %arg2: memref<1x10xf32, #tpu.memory_space<vmem>>, %arg3: memref<10x60xbf16, #tpu.memory_space<vmem>>, %arg4: memref<1x60xf32, #tpu.memory_space<vmem>>, %arg5: memref<60x44xbf16, #tpu.memory_space<vmem>>, %arg6: memref<1x44xf32, #tpu.memory_space<vmem>>, %arg7: memref<44x117xbf16, #tpu.memory_space<vmem>>, %arg8: memref<1x13xf32, #tpu.memory_space<vmem>>, %arg9: memref<1x1xf32, #tpu.memory_space<vmem>>, %arg10: memref<18x48x192xbf16, #tpu.memory_space<vmem>>, %arg11: memref<18x48x90xf32, #tpu.memory_space<vmem>>, %arg12: memref<16x16x60xf32, #tpu.memory_space<vmem>>, %arg13: memref<10x32x44xbf16, #tpu.memory_space<vmem>>, %arg14: memref<10x32x117xf32, #tpu.memory_space<vmem>>) attributes {dimension_semantics = [], scalar_prefetch = 0 : i64, scratch_operands = 5 : i64, tpu.core_type = #tpu.core_type<tc>} {
    %c0 = arith.constant 0 : index
    %c0_0 = arith.constant 0 : index
    %c0_1 = arith.constant 0 : index
    %0 = vector.load %arg0[%c0, %c0_0, %c0_1] : memref<16x16x192xbf16, #tpu.memory_space<vmem>>, vector<16x16x192xbf16>
    %c1 = arith.constant 1 : index
    %c16 = arith.constant 16 : index
    %c0_2 = arith.constant 0 : index
    %1 = vector.load %arg10[%c1, %c16, %c0_2] : memref<18x48x192xbf16, #tpu.memory_space<vmem>>, vector<16x16x192xbf16>
    tpu.vector_store %arg10[%c1, %c16, %c0_2], %0 {strides = array<i32>} : memref<18x48x192xbf16, #tpu.memory_space<vmem>>, vector<16x16x192xbf16>,
    %cst = arith.constant 0.000000e+00 : bf16
    %2 = vector.broadcast %cst : bf16 to vector<1x48x192xbf16>
    %c0_3 = arith.constant 0 : index
    %c0_4 = arith.constant 0 : index
    %c0_5 = arith.constant 0 : index
    %3 = vector.load %arg10[%c0_3, %c0_4, %c0_5] : memref<18x48x192xbf16, #tpu.memory_space<vmem>>, vector<1x48x192xbf16>
    tpu.vector_store %arg10[%c0_3, %c0_4, %c0_5], %2 {strides = array<i32>} : memref<18x48x192xbf16, #tpu.memory_space<vmem>>, vector<1x48x192xbf16>,
    %cst_6 = arith.constant 0.000000e+00 : bf16
    %4 = vector.broadcast %cst_6 : bf16 to vector<1x48x192xbf16>
    %c17 = arith.constant 17 : index
    %c0_7 = arith.constant 0 : index
    %c0_8 = arith.constant 0 : index
    %5 = vector.load %arg10[%c17, %c0_7, %c0_8] : memref<18x48x192xbf16, #tpu.memory_space<vmem>>, vector<1x48x192xbf16>
    tpu.vector_store %arg10[%c17, %c0_7, %c0_8], %4 {strides = array<i32>} : memref<18x48x192xbf16, #tpu.memory_space<vmem>>, vector<1x48x192xbf16>,
    %cst_9 = arith.constant 0.000000e+00 : bf16
    %6 = vector.broadcast %cst_9 : bf16 to vector<16x16x192xbf16>
    %c1_10 = arith.constant 1 : index
    %c0_11 = arith.constant 0 : index
    %c0_12 = arith.constant 0 : index
    %7 = vector.load %arg10[%c1_10, %c0_11, %c0_12] : memref<18x48x192xbf16, #tpu.memory_space<vmem>>, vector<16x16x192xbf16>
    tpu.vector_store %arg10[%c1_10, %c0_11, %c0_12], %6 {strides = array<i32>} : memref<18x48x192xbf16, #tpu.memory_space<vmem>>, vector<16x16x192xbf16>,
    %cst_13 = arith.constant 0.000000e+00 : bf16
    %8 = vector.broadcast %cst_13 : bf16 to vector<16x16x192xbf16>
    %c1_14 = arith.constant 1 : index
    %c32 = arith.constant 32 : index
    %c0_15 = arith.constant 0 : index
    %9 = vector.load %arg10[%c1_14, %c32, %c0_15] : memref<18x48x192xbf16, #tpu.memory_space<vmem>>, vector<16x16x192xbf16>
    tpu.vector_store %arg10[%c1_14, %c32, %c0_15], %8 {strides = array<i32>} : memref<18x48x192xbf16, #tpu.memory_space<vmem>>, vector<16x16x192xbf16>,
    %c0_16 = arith.constant 0 : index
    %c0_17 = arith.constant 0 : index
    %c0_18 = arith.constant 0 : index
    %10 = vector.load %arg10[%c0_16, %c0_17, %c0_18] : memref<18x48x192xbf16, #tpu.memory_space<vmem>>, vector<18x48x192xbf16>
    %11 = vector.shape_cast %10 : vector<18x48x192xbf16> to vector<864x192xbf16>
    %c0_19 = arith.constant 0 : index
    %c0_20 = arith.constant 0 : index
    %12 = vector.load %arg1[%c0_19, %c0_20] : memref<192x90xbf16, #tpu.memory_space<vmem>>, vector<192x90xbf16>
    %cst_21 = arith.constant dense<0.000000e+00> : vector<864x90xf32>
    %13 = tpu.matmul %11, %12, %cst_21 {dimension_numbers = #tpu.dot_dimension_numbers<[1], [0], [0], [1], [0, 0, 1, 1], [], []>} : vector<864x192xbf16>, vector<192x90xbf16>, vector<864x90xf32> -> vector<864x90xf32>
    %14 = vector.shape_cast %13 : vector<864x90xf32> to vector<18x48x90xf32>
    %c0_22 = arith.constant 0 : index
    %c0_23 = arith.constant 0 : index
    %c0_24 = arith.constant 0 : index
    %15 = vector.load %arg11[%c0_22, %c0_23, %c0_24] : memref<18x48x90xf32, #tpu.memory_space<vmem>>, vector<18x48x90xf32>
    tpu.vector_store %arg11[%c0_22, %c0_23, %c0_24], %14 {strides = array<i32>} : memref<18x48x90xf32, #tpu.memory_space<vmem>>, vector<18x48x90xf32>,
    %c0_25 = arith.constant 0 : index
    %c15 = arith.constant 15 : index
    %c0_26 = arith.constant 0 : index
    %16 = vector.load %arg11[%c0_25, %c15, %c0_26] : memref<18x48x90xf32, #tpu.memory_space<vmem>>, vector<16x16x10xf32>
    %c0_27 = arith.constant 0 : index
    %c16_28 = arith.constant 16 : index
    %c10 = arith.constant 10 : index
    %17 = vector.load %arg11[%c0_27, %c16_28, %c10] : memref<18x48x90xf32, #tpu.memory_space<vmem>>, vector<16x16x10xf32>
    %18 = arith.addf %16, %17 : vector<16x16x10xf32>
    %c0_29 = arith.constant 0 : index
    %c17_30 = arith.constant 17 : index
    %c20 = arith.constant 20 : index
    %19 = vector.load %arg11[%c0_29, %c17_30, %c20] : memref<18x48x90xf32, #tpu.memory_space<vmem>>, vector<16x16x10xf32>
    %20 = arith.addf %18, %19 : vector<16x16x10xf32>
    %c1_31 = arith.constant 1 : index
    %c15_32 = arith.constant 15 : index
    %c30 = arith.constant 30 : index
    %21 = vector.load %arg11[%c1_31, %c15_32, %c30] : memref<18x48x90xf32, #tpu.memory_space<vmem>>, vector<16x16x10xf32>
    %22 = arith.addf %20, %21 : vector<16x16x10xf32>
    %c1_33 = arith.constant 1 : index
    %c16_34 = arith.constant 16 : index
    %c40 = arith.constant 40 : index
    %23 = vector.load %arg11[%c1_33, %c16_34, %c40] : memref<18x48x90xf32, #tpu.memory_space<vmem>>, vector<16x16x10xf32>
    %24 = arith.addf %22, %23 : vector<16x16x10xf32>
    %c1_35 = arith.constant 1 : index
    %c17_36 = arith.constant 17 : index
    %c50 = arith.constant 50 : index
    %25 = vector.load %arg11[%c1_35, %c17_36, %c50] : memref<18x48x90xf32, #tpu.memory_space<vmem>>, vector<16x16x10xf32>
    %26 = arith.addf %24, %25 : vector<16x16x10xf32>
    %c2 = arith.constant 2 : index
    %c15_37 = arith.constant 15 : index
    %c60 = arith.constant 60 : index
    %27 = vector.load %arg11[%c2, %c15_37, %c60] : memref<18x48x90xf32, #tpu.memory_space<vmem>>, vector<16x16x10xf32>
    %28 = arith.addf %26, %27 : vector<16x16x10xf32>
    %c2_38 = arith.constant 2 : index
    %c16_39 = arith.constant 16 : index
    %c70 = arith.constant 70 : index
    %29 = vector.load %arg11[%c2_38, %c16_39, %c70] : memref<18x48x90xf32, #tpu.memory_space<vmem>>, vector<16x16x10xf32>
    %30 = arith.addf %28, %29 : vector<16x16x10xf32>
    %c2_40 = arith.constant 2 : index
    %c17_41 = arith.constant 17 : index
    %c80 = arith.constant 80 : index
    %31 = vector.load %arg11[%c2_40, %c17_41, %c80] : memref<18x48x90xf32, #tpu.memory_space<vmem>>, vector<16x16x10xf32>
    %32 = arith.addf %30, %31 : vector<16x16x10xf32>
    %c0_42 = arith.constant 0 : index
    %c0_43 = arith.constant 0 : index
    %33 = vector.load %arg2[%c0_42, %c0_43] : memref<1x10xf32, #tpu.memory_space<vmem>>, vector<1x10xf32>
    %34 = vector.shape_cast %33 : vector<1x10xf32> to vector<1x1x10xf32>
    %35 = vector.broadcast %34 : vector<1x1x10xf32> to vector<16x16x10xf32>
    %36 = arith.addf %32, %35 : vector<16x16x10xf32>
    %37 = arith.negf %36 : vector<16x16x10xf32>
    %38 = math.exp %37 : vector<16x16x10xf32>
    %cst_44 = arith.constant 1.000000e+00 : f32
    %39 = vector.broadcast %cst_44 : f32 to vector<16x16x10xf32>
    %40 = arith.addf %39, %38 : vector<16x16x10xf32>
    %41 = arith.divf %39, %40 : vector<16x16x10xf32>
    %42 = vector.shape_cast %41 : vector<16x16x10xf32> to vector<256x10xf32>
    %43 = arith.truncf %42 : vector<256x10xf32> to vector<256x10xbf16>
    %c0_45 = arith.constant 0 : index
    %c0_46 = arith.constant 0 : index
    %44 = vector.load %arg3[%c0_45, %c0_46] : memref<10x60xbf16, #tpu.memory_space<vmem>>, vector<10x60xbf16>
    %cst_47 = arith.constant dense<0.000000e+00> : vector<256x60xf32>
    %45 = tpu.matmul %43, %44, %cst_47 {dimension_numbers = #tpu.dot_dimension_numbers<[1], [0], [0], [1], [0, 0, 1, 1], [], []>} : vector<256x10xbf16>, vector<10x60xbf16>, vector<256x60xf32> -> vector<256x60xf32>
    %c0_48 = arith.constant 0 : index
    %c0_49 = arith.constant 0 : index
    %46 = vector.load %arg4[%c0_48, %c0_49] : memref<1x60xf32, #tpu.memory_space<vmem>>, vector<1x60xf32>
    %47 = vector.broadcast %46 : vector<1x60xf32> to vector<256x60xf32>
    %48 = arith.addf %45, %47 : vector<256x60xf32>
    %49 = vector.shape_cast %48 : vector<256x60xf32> to vector<16x16x60xf32>
    %c0_50 = arith.constant 0 : index
    %c0_51 = arith.constant 0 : index
    %c0_52 = arith.constant 0 : index
    %50 = vector.load %arg12[%c0_50, %c0_51, %c0_52] : memref<16x16x60xf32, #tpu.memory_space<vmem>>, vector<16x16x60xf32>
    tpu.vector_store %arg12[%c0_50, %c0_51, %c0_52], %49 {strides = array<i32>} : memref<16x16x60xf32, #tpu.memory_space<vmem>>, vector<16x16x60xf32>,
    %c0_53 = arith.constant 0 : index
    %c0_54 = arith.constant 0 : index
    %c0_55 = arith.constant 0 : index
    %51 = tpu.strided_load %arg12[%c0_53, %c0_54, %c0_55] {strides = array<i32: 2, 1, 1>} : memref<16x16x60xf32, #tpu.memory_space<vmem>>, vector<8x16x60xf32>
    %c1_56 = arith.constant 1 : index
    %c0_57 = arith.constant 0 : index
    %c0_58 = arith.constant 0 : index
    %52 = tpu.strided_load %arg12[%c1_56, %c0_57, %c0_58] {strides = array<i32: 2, 1, 1>} : memref<16x16x60xf32, #tpu.memory_space<vmem>>, vector<8x16x60xf32>
    %53 = arith.maximumf %51, %52 : vector<8x16x60xf32>
    %c0_59 = arith.constant 0 : index
    %c0_60 = arith.constant 0 : index
    %c0_61 = arith.constant 0 : index
    %54 = vector.load %arg12[%c0_59, %c0_60, %c0_61] : memref<16x16x60xf32, #tpu.memory_space<vmem>>, vector<8x16x60xf32>
    tpu.vector_store %arg12[%c0_59, %c0_60, %c0_61], %53 {strides = array<i32>} : memref<16x16x60xf32, #tpu.memory_space<vmem>>, vector<8x16x60xf32>,
    %c0_62 = arith.constant 0 : index
    %c0_63 = arith.constant 0 : index
    %c0_64 = arith.constant 0 : index
    %55 = tpu.strided_load %arg12[%c0_62, %c0_63, %c0_64] {strides = array<i32: 1, 2, 1>} : memref<16x16x60xf32, #tpu.memory_space<vmem>>, vector<8x8x60xf32>
    %c0_65 = arith.constant 0 : index
    %c1_66 = arith.constant 1 : index
    %c0_67 = arith.constant 0 : index
    %56 = tpu.strided_load %arg12[%c0_65, %c1_66, %c0_67] {strides = array<i32: 1, 2, 1>} : memref<16x16x60xf32, #tpu.memory_space<vmem>>, vector<8x8x60xf32>
    %57 = arith.maximumf %55, %56 : vector<8x8x60xf32>
    %58 = arith.mulf %57, %57 : vector<8x8x60xf32>
    %59 = arith.addf %57, %58 : vector<8x8x60xf32>
    %60 = vector.shape_cast %59 : vector<8x8x60xf32> to vector<64x60xf32>
    %61 = arith.truncf %60 : vector<64x60xf32> to vector<64x60xbf16>
    %c0_68 = arith.constant 0 : index
    %c0_69 = arith.constant 0 : index
    %62 = vector.load %arg5[%c0_68, %c0_69] : memref<60x44xbf16, #tpu.memory_space<vmem>>, vector<60x44xbf16>
    %cst_70 = arith.constant dense<0.000000e+00> : vector<64x44xf32>
    %63 = tpu.matmul %61, %62, %cst_70 {dimension_numbers = #tpu.dot_dimension_numbers<[1], [0], [0], [1], [0, 0, 1, 1], [], []>} : vector<64x60xbf16>, vector<60x44xbf16>, vector<64x44xf32> -> vector<64x44xf32>
    %c0_71 = arith.constant 0 : index
    %c0_72 = arith.constant 0 : index
    %64 = vector.load %arg6[%c0_71, %c0_72] : memref<1x44xf32, #tpu.memory_space<vmem>>, vector<1x44xf32>
    %65 = vector.broadcast %64 : vector<1x44xf32> to vector<64x44xf32>
    %66 = arith.addf %63, %65 : vector<64x44xf32>
    %67 = arith.negf %66 : vector<64x44xf32>
    %68 = math.exp %67 : vector<64x44xf32>
    %cst_73 = arith.constant 1.000000e+00 : f32
    %69 = vector.broadcast %cst_73 : f32 to vector<64x44xf32>
    %70 = arith.addf %69, %68 : vector<64x44xf32>
    %71 = arith.divf %69, %70 : vector<64x44xf32>
    %cst_74 = arith.constant 0.000000e+00 : bf16
    %72 = vector.broadcast %cst_74 : bf16 to vector<1x32x44xbf16>
    %c0_75 = arith.constant 0 : index
    %c0_76 = arith.constant 0 : index
    %c0_77 = arith.constant 0 : index
    %73 = vector.load %arg13[%c0_75, %c0_76, %c0_77] : memref<10x32x44xbf16, #tpu.memory_space<vmem>>, vector<1x32x44xbf16>
    tpu.vector_store %arg13[%c0_75, %c0_76, %c0_77], %72 {strides = array<i32>} : memref<10x32x44xbf16, #tpu.memory_space<vmem>>, vector<1x32x44xbf16>,
    %c9 = arith.constant 9 : index
    %c0_78 = arith.constant 0 : index
    %c0_79 = arith.constant 0 : index
    %74 = vector.load %arg13[%c9, %c0_78, %c0_79] : memref<10x32x44xbf16, #tpu.memory_space<vmem>>, vector<1x32x44xbf16>
    tpu.vector_store %arg13[%c9, %c0_78, %c0_79], %72 {strides = array<i32>} : memref<10x32x44xbf16, #tpu.memory_space<vmem>>, vector<1x32x44xbf16>,
    %cst_80 = arith.constant 0.000000e+00 : bf16
    %75 = vector.broadcast %cst_80 : bf16 to vector<8x16x44xbf16>
    %c1_81 = arith.constant 1 : index
    %c0_82 = arith.constant 0 : index
    %c0_83 = arith.constant 0 : index
    %76 = vector.load %arg13[%c1_81, %c0_82, %c0_83] : memref<10x32x44xbf16, #tpu.memory_space<vmem>>, vector<8x16x44xbf16>
    tpu.vector_store %arg13[%c1_81, %c0_82, %c0_83], %75 {strides = array<i32>} : memref<10x32x44xbf16, #tpu.memory_space<vmem>>, vector<8x16x44xbf16>,
    %cst_84 = arith.constant 0.000000e+00 : bf16
    %77 = vector.broadcast %cst_84 : bf16 to vector<8x8x44xbf16>
    %c1_85 = arith.constant 1 : index
    %c24 = arith.constant 24 : index
    %c0_86 = arith.constant 0 : index
    %78 = vector.load %arg13[%c1_85, %c24, %c0_86] : memref<10x32x44xbf16, #tpu.memory_space<vmem>>, vector<8x8x44xbf16>
    tpu.vector_store %arg13[%c1_85, %c24, %c0_86], %77 {strides = array<i32>} : memref<10x32x44xbf16, #tpu.memory_space<vmem>>, vector<8x8x44xbf16>,
    %79 = vector.shape_cast %71 : vector<64x44xf32> to vector<8x8x44xf32>
    %80 = arith.truncf %79 : vector<8x8x44xf32> to vector<8x8x44xbf16>
    %c1_87 = arith.constant 1 : index
    %c16_88 = arith.constant 16 : index
    %c0_89 = arith.constant 0 : index
    %81 = vector.load %arg13[%c1_87, %c16_88, %c0_89] : memref<10x32x44xbf16, #tpu.memory_space<vmem>>, vector<8x8x44xbf16>
    tpu.vector_store %arg13[%c1_87, %c16_88, %c0_89], %80 {strides = array<i32>} : memref<10x32x44xbf16, #tpu.memory_space<vmem>>, vector<8x8x44xbf16>,
    %c0_90 = arith.constant 0 : index
    %c0_91 = arith.constant 0 : index
    %c0_92 = arith.constant 0 : index
    %82 = vector.load %arg13[%c0_90, %c0_91, %c0_92] : memref<10x32x44xbf16, #tpu.memory_space<vmem>>, vector<10x32x44xbf16>
    %83 = vector.shape_cast %82 : vector<10x32x44xbf16> to vector<320x44xbf16>
    %c0_93 = arith.constant 0 : index
    %c0_94 = arith.constant 0 : index
    %84 = vector.load %arg7[%c0_93, %c0_94] : memref<44x117xbf16, #tpu.memory_space<vmem>>, vector<44x117xbf16>
    %cst_95 = arith.constant dense<0.000000e+00> : vector<320x117xf32>
    %85 = tpu.matmul %83, %84, %cst_95 {dimension_numbers = #tpu.dot_dimension_numbers<[1], [0], [0], [1], [0, 0, 1, 1], [], []>} : vector<320x44xbf16>, vector<44x117xbf16>, vector<320x117xf32> -> vector<320x117xf32>
    %86 = vector.shape_cast %85 : vector<320x117xf32> to vector<10x32x117xf32>
    %c0_96 = arith.constant 0 : index
    %c0_97 = arith.constant 0 : index
    %c0_98 = arith.constant 0 : index
    %87 = vector.load %arg14[%c0_96, %c0_97, %c0_98] : memref<10x32x117xf32, #tpu.memory_space<vmem>>, vector<10x32x117xf32>
    tpu.vector_store %arg14[%c0_96, %c0_97, %c0_98], %86 {strides = array<i32>} : memref<10x32x117xf32, #tpu.memory_space<vmem>>, vector<10x32x117xf32>,
    %c0_99 = arith.constant 0 : index
    %c15_100 = arith.constant 15 : index
    %c0_101 = arith.constant 0 : index
    %88 = vector.load %arg14[%c0_99, %c15_100, %c0_101] : memref<10x32x117xf32, #tpu.memory_space<vmem>>, vector<8x8x13xf32>
    %c0_102 = arith.constant 0 : index
    %c16_103 = arith.constant 16 : index
    %c13 = arith.constant 13 : index
    %89 = vector.load %arg14[%c0_102, %c16_103, %c13] : memref<10x32x117xf32, #tpu.memory_space<vmem>>, vector<8x8x13xf32>
    %90 = arith.addf %88, %89 : vector<8x8x13xf32>
    %c0_104 = arith.constant 0 : index
    %c17_105 = arith.constant 17 : index
    %c26 = arith.constant 26 : index
    %91 = vector.load %arg14[%c0_104, %c17_105, %c26] : memref<10x32x117xf32, #tpu.memory_space<vmem>>, vector<8x8x13xf32>
    %92 = arith.addf %90, %91 : vector<8x8x13xf32>
    %c1_106 = arith.constant 1 : index
    %c15_107 = arith.constant 15 : index
    %c39 = arith.constant 39 : index
    %93 = vector.load %arg14[%c1_106, %c15_107, %c39] : memref<10x32x117xf32, #tpu.memory_space<vmem>>, vector<8x8x13xf32>
    %94 = arith.addf %92, %93 : vector<8x8x13xf32>
    %c1_108 = arith.constant 1 : index
    %c16_109 = arith.constant 16 : index
    %c52 = arith.constant 52 : index
    %95 = vector.load %arg14[%c1_108, %c16_109, %c52] : memref<10x32x117xf32, #tpu.memory_space<vmem>>, vector<8x8x13xf32>
    %96 = arith.addf %94, %95 : vector<8x8x13xf32>
    %c1_110 = arith.constant 1 : index
    %c17_111 = arith.constant 17 : index
    %c65 = arith.constant 65 : index
    %97 = vector.load %arg14[%c1_110, %c17_111, %c65] : memref<10x32x117xf32, #tpu.memory_space<vmem>>, vector<8x8x13xf32>
    %98 = arith.addf %96, %97 : vector<8x8x13xf32>
    %c2_112 = arith.constant 2 : index
    %c15_113 = arith.constant 15 : index
    %c78 = arith.constant 78 : index
    %99 = vector.load %arg14[%c2_112, %c15_113, %c78] : memref<10x32x117xf32, #tpu.memory_space<vmem>>, vector<8x8x13xf32>
    %100 = arith.addf %98, %99 : vector<8x8x13xf32>
    %c2_114 = arith.constant 2 : index
    %c16_115 = arith.constant 16 : index
    %c91 = arith.constant 91 : index
    %101 = vector.load %arg14[%c2_114, %c16_115, %c91] : memref<10x32x117xf32, #tpu.memory_space<vmem>>, vector<8x8x13xf32>
    %102 = arith.addf %100, %101 : vector<8x8x13xf32>
    %c2_116 = arith.constant 2 : index
    %c17_117 = arith.constant 17 : index
    %c104 = arith.constant 104 : index
    %103 = vector.load %arg14[%c2_116, %c17_117, %c104] : memref<10x32x117xf32, #tpu.memory_space<vmem>>, vector<8x8x13xf32>
    %104 = arith.addf %102, %103 : vector<8x8x13xf32>
    %c0_118 = arith.constant 0 : index
    %c0_119 = arith.constant 0 : index
    %105 = vector.load %arg8[%c0_118, %c0_119] : memref<1x13xf32, #tpu.memory_space<vmem>>, vector<1x13xf32>
    %106 = vector.shape_cast %105 : vector<1x13xf32> to vector<1x1x13xf32>
    %107 = vector.broadcast %106 : vector<1x1x13xf32> to vector<8x8x13xf32>
    %108 = arith.addf %104, %107 : vector<8x8x13xf32>
    %cst_120 = arith.constant dense<0xFF800000> : vector<8x13xf32>
    %109 = vector.multi_reduction <maximumf>, %108, %cst_120 [0] : vector<8x8x13xf32> to vector<8x13xf32>
    %110 = vector.shape_cast %109 : vector<8x13xf32> to vector<1x8x13xf32>
    %cst_121 = arith.constant dense<0xFF800000> : vector<1xf32>
    %111 = vector.multi_reduction <maximumf>, %110, %cst_121 [1, 2] : vector<1x8x13xf32> to vector<1xf32>
    %112 = vector.shape_cast %111 : vector<1xf32> to vector<1x1x1xf32>
    %113 = vector.extract %112[0, 0, 0] : f32 from vector<1x1x1xf32>
    %114 = vector.broadcast %113 : f32 to vector<1x1xf32>
    %115 = arith.negf %114 : vector<1x1xf32>
    %116 = math.exp %115 : vector<1x1xf32>
    %cst_122 = arith.constant 1.000000e+00 : f32
    %117 = vector.broadcast %cst_122 : f32 to vector<1x1xf32>
    %118 = arith.addf %117, %116 : vector<1x1xf32>
    %119 = arith.divf %117, %118 : vector<1x1xf32>
    %cst_123 = arith.constant 1.000000e+00 : f32
    %120 = vector.broadcast %cst_123 : f32 to vector<1x1xf32>
    %121 = arith.addf %119, %120 : vector<1x1xf32>
    %cst_124 = arith.constant 0.000000e+00 : f32
    %122 = vector.broadcast %cst_124 : f32 to vector<1x1xf32>
    %123 = arith.maximumf %121, %122 : vector<1x1xf32>
    %124 = math.tanh %123 : vector<1x1xf32>
    %c0_125 = arith.constant 0 : index
    %c0_126 = arith.constant 0 : index
    %125 = vector.load %arg9[%c0_125, %c0_126] : memref<1x1xf32, #tpu.memory_space<vmem>>, vector<1x1xf32>
    tpu.vector_store %arg9[%c0_125, %c0_126], %124 {strides = array<i32>} : memref<1x1xf32, #tpu.memory_space<vmem>>, vector<1x1xf32>,
    return
  }
}

</mosaic_0001>

<bundles_post_ra>
// kernel: tpu_custom_call.1
= control target key start
LH: loop header
LB: loop body
LE: loop exit
PB: predicated region body
PF: predicated region fallthrough
CT: control target
= control target key end

     0   :  { %14 = vsyncpa [#allocation8], 0  ;;  %s7020_s0 = inlined_call_operand.hbm [shape: bf16[16,16,192], index: 0, kind: input, shape index: {}]   ;;  %s7021_s1 = inlined_call_operand.hbm [shape: bf16[192,90], index: 1, kind: input, shape index: {}]   ;;  %s7022_s2 = inlined_call_operand.vmem [shape: f32[1,10], index: 2, kind: input, shape index: {}]   ;;  %s7023_s3 = inlined_call_operand.vmem [shape: bf16[10,60], index: 3, kind: input, shape index: {}]   ;;  %s7024_s4 = inlined_call_operand.vmem [shape: f32[1,60], index: 4, kind: input, shape index: {}]   ;;  %s7025_s5 = inlined_call_operand.vmem [shape: bf16[60,44], index: 5, kind: input, shape index: {}]   ;;  %s7026_s6 = inlined_call_operand.vmem [shape: f32[1,44], index: 6, kind: input, shape index: {}]   ;;  %s7027_s7 = inlined_call_operand.vmem [shape: bf16[44,117], index: 7, kind: input, shape index: {}]   ;;  %s7028_s8 = inlined_call_operand.vmem [shape: f32[1,13], index: 8, kind: input, shape index: {}]   ;;  %s7029_s9 = inlined_call_operand.hbm [shape: f32[1,1], index: 9, kind: output, shape index: {}]  }
   0x1   :  { %15 = vsyncpa [#allocation11], 0 }
   0x2   :  { %16 = vsyncpa [#allocation9], 0  ;;  %s5206_s30 = smov [#allocation7]   ;;  %s5134_s13 = scalar_lea.hbm %s7020_s0, 4096 }
   0x3   :  { %s22_s10 = sshll.u32 %s5206_s30, 4  ;;  %p5135_p0 = scmp.ne.s32.totalorder %s7020_s0, %s5134_s13  ;;  %s23_s10 = int_to_ptr.vmem [resolvable:$true] %s22_s10 }
   0x4   :  { %p5138_p1 = scmp.lt.u32.totalorder %s5134_s13, %s7020_s0 }
   0x6   :  { %p5140_p2 = pnand %p5138_p1, %p5135_p0 }
   0x8   :  { %5143 = shalt.err (!%p5140_p2)
}
   0x9   :  { %s5144_s18 = scalar_lea.vmem %s23_s10, 4096  ;;  %p5149_p4 = scmp.lt.s32.totalorder %s23_s10, %s23_s10 }
   0xa   :  { %p5145_p3 = scmp.ne.s32.totalorder %s23_s10, %s5144_s18  ;;  %p5150_p5 = scmp.lt.s32.totalorder %s5144_s18, %s5144_s18 }
   0xc   :  { %p5151_p6 = por %p5150_p5, %p5149_p4 }
   0xe   :  { %p5152_p7 = pnand %p5151_p6, %p5145_p3 }
  0x10   :  { %5155 = shalt.err (!%p5152_p7)
}
  0x11   :  { %s5207_s19 = smov 128   ;;  %s5208_s20 = smov 8  }
  0x12   :  { %28 = dma.hbm_to_vmem [thread:$0]  %s7020_s0, 4096, %s23_s10, [#allocation8], %s5207_s19, %s5207_s19, %s5208_s20  }
  0x13   :  { %s5209_s23 = smov [#allocation10]   ;;  %s5156_s27 = scalar_lea.hbm %s7021_s1, 1536 }
  0x14   :  { %s34_s24 = sshll.u32 %s5209_s23, 4  ;;  %p5157_p8 = scmp.ne.s32.totalorder %s7021_s1, %s5156_s27  ;;  %s35_s24 = int_to_ptr.vmem [resolvable:$true] %s34_s24 }
  0x15   :  { %p5160_p9 = scmp.lt.u32.totalorder %s5156_s27, %s7021_s1 }
  0x17   :  { %p5162_p10 = pnand %p5160_p9, %p5157_p8 }
  0x19   :  { %5165 = shalt.err (!%p5162_p10)
}
  0x1a   :  { %s5166_s12 = scalar_lea.vmem %s35_s24, 1536  ;;  %p5171_p12 = scmp.lt.s32.totalorder %s35_s24, %s35_s24 }
  0x1b   :  { %p5167_p11 = scmp.ne.s32.totalorder %s35_s24, %s5166_s12  ;;  %p5172_p13 = scmp.lt.s32.totalorder %s5166_s12, %s5166_s12 }
  0x1d   :  { %p5173_p0 = por %p5172_p13, %p5171_p12 }
  0x1f   :  { %p5174_p1 = pnand %p5173_p0, %p5167_p11 }
  0x21   :  { %5177 = shalt.err (!%p5174_p1)
}
  0x22   :  { %s5210_s0 = smov 64   ;;  %s5211_s10 = smov 4  }
  0x23   :  { %40 = dma.hbm_to_vmem [thread:$0]  %s7021_s1, 1536, %s35_s24, [#allocation11], %s5210_s0, %s5210_s0, %s5211_s10  }
  0x24   :  { %5200 = dma.done.wait [#allocation8], 4096  }
  0x25   :  { %5201 = vsyncadd [#allocation8], 4294963200 }
  0x26   :  { %5202 = dma.done.wait [#allocation11], 1536  }
  0x27   :  { %5203 = vsyncadd [#allocation11], 4294965760  ;;  %vm256_vm0 = vcmask 523264   ;;  %v5212_v0 = vmov 0   ;;  %v4906_v1 = vld [vmem:[#allocation10] sm:$0xff]   ;;  %v4907_v2 = vld [vmem:[#allocation10 + $0x8] sm:$0xff]  }
  0x28   :  { %731 = vmatprep.subr.bf16.mxu0 %v5212_v0  ;;  %288 = vst [vmem:[#allocation2] sm:$0xff] %v5212_v0  ;;  %4853 = vmatprep.subr.bf16.mxu1 %v5212_v0  ;;  %289 = vst.msk [vmem:[#allocation2 + $0x8] sm:$0xff] %vm256_vm0, %v5212_v0  ;;  %v4908_v3 = vld [vmem:[#allocation10 + $0x10] sm:$0xff]   ;;  %v4909_v4 = vld [vmem:[#allocation10 + $0x18] sm:$0xff]   ;;  %vm1196_vm1 = vcmask 736256   ;;  %s5213_s1 = smov 88  }
  0x29   :  { %291 = vst.msk [vmem:[#allocation2 + $0x18] sm:$0xff] %vm256_vm0, %v5212_v0  ;;  %293 = vst.msk [vmem:[#allocation2 + $0x28] sm:$0xff] %vm256_vm0, %v5212_v0  ;;  %732 = vmatpush1.bf16.msra.mxu0 %v4906_v1  ;;  %4865 = vmatpush1.bf16.msra.mxu1 %v4906_v1  ;;  %v5389_v6 = vld [vmem:[#allocation7 + $0xb0] sm:$0xff]  ;;  %v5391_v7 = vld [vmem:[#allocation7 + $0xb8] sm:$0xff]  ;;  %s5214_s15 = smov 98   ;;  %s5215_s16 = smov 118  }
  0x2a   :  { %296 = vst.msk [vmem:[#allocation2 + $0x338] sm:$0xff] %vm256_vm0, %v5212_v0  ;;  %298 = vst.msk [vmem:[#allocation2 + $0x348] sm:$0xff] %vm256_vm0, %v5212_v0  ;;  %733 = vmatprep.subr.bf16.mxu0 %v5212_v0  ;;  %4854 = vmatprep.subr.bf16.mxu1 %v5212_v0  ;;  %v4918_v8 = vld [vmem:[#allocation7 + $0xb4] ss:$8 sps:$4 sm:$0xff]   ;;  %v4540_v9 = vcombine.low %v5389_v6, %v5391_v7  ;;  %v4910_v10 = vld [vmem:[#allocation10 + $0x20] sm:$0xff]   ;;  %s5216_s17 = smov 58  }
  0x2b   :  { %300 = vst.msk [vmem:[#allocation2 + $0x358] sm:$0xff] %vm256_vm0, %v5212_v0  ;;  %302 = vst.msk [vmem:[#allocation2 + $0x38] sm:$0xff] %vm256_vm0, %v5212_v0  ;;  %v5399_v11 = vld [vmem:[#allocation7 + $0xc0] sm:$0xff]  ;;  %v5401_v12 = vld [vmem:[#allocation7 + $0xc8] sm:$0xff]  ;;  %s5217_s18 = smov 78   ;;  %s5218_s19 = smov 68  }
  0x2c   :  { %304 = vst.msk [vmem:[#allocation2 + $0x68] sm:$0xff] %vm256_vm0, %v5212_v0  ;;  %306 = vst.msk [vmem:[#allocation2 + $0x98] sm:$0xff] %vm256_vm0, %v5212_v0  ;;  %v4920_v13 = vld [vmem:[#allocation7 + $0xc4] ss:$8 sps:$4 sm:$0xff]   ;;  %v4542_v14 = vcombine.low %v5399_v11, %v5401_v12  ;;  %v5413_v20 = vld [vmem:[#allocation7 + $0x10] sm:$0xff]  ;;  %s5219_s20 = smov 108  }
  0x2d   :  { %308 = vst.msk [vmem:[#allocation2 + $0xc8] sm:$0xff] %vm256_vm0, %v5212_v0  ;;  %310 = vst.msk [vmem:[#allocation2 + $0xf8] sm:$0xff] %vm256_vm0, %v5212_v0  ;;  %734 = vmatpush1.bf16.msra.mxu0 %v4907_v2  ;;  %4866 = vmatpush1.bf16.msra.mxu1 %v4907_v2  ;;  %v5405_v15 = vld [vmem:[#allocation7] sm:$0xff]  ;;  %v5407_v16 = vld [vmem:[#allocation7 + $0x8] sm:$0xff]  ;;  %s5220_s21 = smov 48   ;;  %vm3185_vm2 = vcmask 1044480  }
  0x2e   :  { %312 = vst.msk [vmem:[#allocation2 + $0x128] sm:$0xff] %vm256_vm0, %v5212_v0  ;;  %314 = vst.msk [vmem:[#allocation2 + $0x158] sm:$0xff] %vm256_vm0, %v5212_v0  ;;  %735 = vmatprep.subr.bf16.mxu0 %v5212_v0  ;;  %4855 = vmatprep.subr.bf16.mxu1 %v5212_v0  ;;  %v4922_v17 = vld [vmem:[#allocation7 + $0x4] ss:$8 sps:$4 sm:$0xff]   ;;  %v4518_v19 = vcombine.low %v5405_v15, %v5407_v16  ;;  %v5415_v21 = vld [vmem:[#allocation7 + $0x18] sm:$0xff]  ;;  %vm3136_vm3 = vcmask 80896  }
  0x2f   :  { %316 = vst.msk [vmem:[#allocation2 + $0x188] sm:$0xff] %vm256_vm0, %v5212_v0  ;;  %318 = vst.msk [vmem:[#allocation2 + $0x1b8] sm:$0xff] %vm256_vm0, %v5212_v0  ;;  %v366_v5 = vld [vmem:[#allocation2 + $0x8] sm:$0xff]  ;;  %v4924_v22 = vld [vmem:[#allocation7 + $0x14] ss:$8 sps:$4 sm:$0xff]   ;;  %v4520_v23 = vcombine.low %v5413_v20, %v5415_v21  ;;  %vm3350_vm4 = vcmask 490496  }
  0x30   :  { %320 = vst.msk [vmem:[#allocation2 + $0x1e8] sm:$0xff] %vm256_vm0, %v5212_v0  ;;  %322 = vst.msk [vmem:[#allocation2 + $0x218] sm:$0xff] %vm256_vm0, %v5212_v0  ;;  %4562 = vmatprep.mubr.msk.bf16.mxu0 %vm256_vm0, %v366_v5  ;;  %v4911_v18 = vld [vmem:[#allocation10 + $0x28] sm:$0xff]   ;;  %v5422_v24 = vld [vmem:[#allocation7 + $0xd0] sm:$0xff]  ;;  %vm3557_vm5 = vcmask 1045504   ;;  %vm3674_vm6 = vcmask 359424  }
  0x31   :  { %324 = vst.msk [vmem:[#allocation2 + $0x248] sm:$0xff] %vm256_vm0, %v5212_v0  ;;  %326 = vst.msk [vmem:[#allocation2 + $0x278] sm:$0xff] %vm256_vm0, %v5212_v0  ;;  %736 = vmatpush1.bf16.msra.mxu0 %v4908_v3  ;;  %4867 = vmatpush1.bf16.msra.mxu1 %v4908_v3  ;;  %v5424_v25 = vld [vmem:[#allocation7 + $0xd8] sm:$0xff]  ;;  %v5428_v28 = vld [vmem:[#allocation7 + $0x20] sm:$0xff]  ;;  %vm3689_vm7 = vcmask 359428   ;;  %vm3706_vm8 = vcmask 355328  }
  0x32   :  { %328 = vst.msk [vmem:[#allocation2 + $0x2a8] sm:$0xff] %vm256_vm0, %v5212_v0  ;;  %330 = vst.msk [vmem:[#allocation2 + $0x2d8] sm:$0xff] %vm256_vm0, %v5212_v0  ;;  %737 = vmatprep.subr.bf16.mxu0 %v5212_v0  ;;  %4856 = vmatprep.subr.bf16.mxu1 %v5212_v0  ;;  %v4926_v26 = vld [vmem:[#allocation7 + $0xd4] ss:$8 sps:$4 sm:$0xff]   ;;  %v4544_v27 = vcombine.low %v5422_v24, %v5424_v25  ;;  %v5430_v29 = vld [vmem:[#allocation7 + $0x28] sm:$0xff]  ;;  %vm4014_vm9 = vcmask 957440  }
  0x33   :  { %332 = vst.msk [vmem:[#allocation2 + $0x308] sm:$0xff] %vm256_vm0, %v5212_v0  ;;  %334 = vst.msk [vmem:[#allocation2 + $0x58] sm:$0xff] %vm256_vm0, %v5212_v0  ;;  %v4928_v30 = vld [vmem:[#allocation7 + $0x24] ss:$8 sps:$4 sm:$0xff]   ;;  %v4912_v31 = vld [vmem:[#allocation10 + $0x30] sm:$0xff]   ;;  %v4522_v33 = vcombine.low %v5428_v28, %v5430_v29  ;;  %s5226_s22 = smov 37  }
  0x34   :  { %336 = vst.msk [vmem:[#allocation2 + $0x88] sm:$0xff] %vm256_vm0, %v5212_v0  ;;  %338 = vst.msk [vmem:[#allocation2 + $0xb8] sm:$0xff] %vm256_vm0, %v5212_v0  ;;  %v5438_v34 = vld [vmem:[#allocation7 + $0x30] sm:$0xff]  ;;  %v5440_v35 = vld [vmem:[#allocation7 + $0x38] sm:$0xff]  ;;  %s5227_s23 = smov 24   ;;  %vm4464_vm10 = vcmask 105472  }
  0x35   :  { %340 = vst.msk [vmem:[#allocation2 + $0xe8] sm:$0xff] %vm256_vm0, %v5212_v0  ;;  %342 = vst.msk [vmem:[#allocation2 + $0x118] sm:$0xff] %vm256_vm0, %v5212_v0  ;;  %738 = vmatpush1.bf16.msra.mxu0 %v4909_v4  ;;  %4868 = vmatpush1.bf16.msra.mxu1 %v4909_v4  ;;  %v4930_v36 = vld [vmem:[#allocation7 + $0x34] ss:$8 sps:$4 sm:$0xff]   ;;  %v4524_v37 = vcombine.low %v5438_v34, %v5440_v35  ;;  %v4914_v39 = vld [vmem:[#allocation10 + $0x40] sm:$0xff]   ;;  %s5229_s26 = smov [#allocation12]  }
  0x36   :  { %344 = vst.msk [vmem:[#allocation2 + $0x148] sm:$0xff] %vm256_vm0, %v5212_v0  ;;  %346 = vst.msk [vmem:[#allocation2 + $0x178] sm:$0xff] %vm256_vm0, %v5212_v0  ;;  %739 = vmatprep.subr.bf16.mxu0 %v5212_v0  ;;  %4857 = vmatprep.subr.bf16.mxu1 %v5212_v0  ;;  %v4913_v38 = vld [vmem:[#allocation10 + $0x38] sm:$0xff]   ;;  %v4915_v40 = vld [vmem:[#allocation10 + $0x48] sm:$0xff]   ;;  %vm4500_vm11 = vcmask 0  }
  0x37   :  { %348 = vst.msk [vmem:[#allocation2 + $0x1a8] sm:$0xff] %vm256_vm0, %v5212_v0  ;;  %350 = vst.msk [vmem:[#allocation2 + $0x1d8] sm:$0xff] %vm256_vm0, %v5212_v0  ;;  %v4916_v41 = vld [vmem:[#allocation10 + $0x50] sm:$0xff]   ;;  %v4932_v42 = vld [vmem:[#allocation7 + $0x44] ss:$8 sps:$4 sm:$0xff]  }
  0x38   :  { %352 = vst.msk [vmem:[#allocation2 + $0x208] sm:$0xff] %vm256_vm0, %v5212_v0  ;;  %354 = vst.msk [vmem:[#allocation2 + $0x238] sm:$0xff] %vm256_vm0, %v5212_v0  ;;  %v5455_v43 = vld [vmem:[#allocation7 + $0x40] sm:$0xff]  ;;  %v5457_v44 = vld [vmem:[#allocation7 + $0x48] sm:$0xff] }
  0x39   :  { %356 = vst.msk [vmem:[#allocation2 + $0x268] sm:$0xff] %vm256_vm0, %v5212_v0  ;;  %358 = vst.msk [vmem:[#allocation2 + $0x298] sm:$0xff] %vm256_vm0, %v5212_v0  ;;  %740 = vmatpush1.bf16.msra.mxu0 %v4910_v10  ;;  %4869 = vmatpush1.bf16.msra.mxu1 %v4910_v10  ;;  %v4917_v45 = vld [vmem:[#allocation10 + $0x58] sm:$0xff]   ;;  %v4526_v46 = vcombine.low %v5455_v43, %v5457_v44  ;;  %v4934_v49 = vld [vmem:[#allocation7 + $0xe4] ss:$8 sps:$4 sm:$0xff]  }
  0x3a   :  { %360 = vst.msk [vmem:[#allocation2 + $0x2c8] sm:$0xff] %vm256_vm0, %v5212_v0  ;;  %362 = vst.msk [vmem:[#allocation2 + $0x2f8] sm:$0xff] %vm256_vm0, %v5212_v0  ;;  %741 = vmatprep.subr.bf16.mxu0 %v5212_v0  ;;  %4858 = vmatprep.subr.bf16.mxu1 %v5212_v0  ;;  %v368_v47 = vld [vmem:[#allocation2 + $0x18] sm:$0xff]  ;;  %v370_v50 = vld [vmem:[#allocation2 + $0x28] sm:$0xff] }
  0x3b   :  { %364 = vst.msk [vmem:[#allocation2 + $0x328] sm:$0xff] %vm256_vm0, %v5212_v0  ;;  %279 = vst.msk [vmem:[#allocation2 + $0x258] sm:$0xff] %vm256_vm0, %v4918_v8  ;;  %v444_v51 = vld [vmem:[#allocation2 + $0x278] sm:$0xff]  ;;  %v5472_v52 = vld [vmem:[#allocation7 + $0xe0] sm:$0xff] }
  0x3c   :  { %281 = vst.msk [vmem:[#allocation2 + $0x288] sm:$0xff] %vm256_vm0, %v4920_v13  ;;  %257 = vst.msk [vmem:[#allocation2 + $0x48] sm:$0xff] %vm256_vm0, %v4922_v17  ;;  %v5474_v53 = vld [vmem:[#allocation7 + $0xe8] sm:$0xff]  ;;  %v4936_v55 = vld [vmem:[#allocation7 + $0x54] ss:$8 sps:$4 sm:$0xff]  }
  0x3d   :  { %259 = vst.msk [vmem:[#allocation2 + $0x78] sm:$0xff] %vm256_vm0, %v4924_v22  ;;  %742 = vmatpush1.bf16.msra.mxu0 %v4911_v18  ;;  %4870 = vmatpush1.bf16.msra.mxu1 %v4911_v18  ;;  %283 = vst.msk [vmem:[#allocation2 + $0x2b8] sm:$0xff] %vm256_vm0, %v4926_v26  ;;  %v4546_v54 = vcombine.low %v5472_v52, %v5474_v53  ;;  %v372_v56 = vld [vmem:[#allocation2 + $0x38] sm:$0xff]  ;;  %v5483_v58 = vld [vmem:[#allocation7 + $0x50] sm:$0xff] }
  0x3e   :  { %743 = vmatprep.subr.bf16.mxu0 %v5212_v0  ;;  %4859 = vmatprep.subr.bf16.mxu1 %v5212_v0  ;;  %261 = vst.msk [vmem:[#allocation2 + $0xa8] sm:$0xff] %vm256_vm0, %v4928_v30  ;;  %263 = vst.msk [vmem:[#allocation2 + $0xd8] sm:$0xff] %vm256_vm0, %v4930_v36  ;;  %v5485_v59 = vld [vmem:[#allocation7 + $0x58] sm:$0xff]  ;;  %v450_v1 = vld [vmem:[#allocation2 + $0x2a8] sm:$0xff] }
  0x3f   :  { %265 = vst.msk [vmem:[#allocation2 + $0x108] sm:$0xff] %vm256_vm0, %v4932_v42  ;;  %285 = vst.msk [vmem:[#allocation2 + $0x2e8] sm:$0xff] %vm256_vm0, %v4934_v49  ;;  %v4528_v60 = vcombine.low %v5483_v58, %v5485_v59  ;;  %v376_v63 = vld [vmem:[#allocation2 + $0x58] sm:$0xff]  ;;  %v4938_v2 = vld [vmem:[#allocation7 + $0x64] ss:$8 sps:$4 sm:$0xff]  }
  0x40   :  { %v442_v48 = vld [vmem:[#allocation2 + $0x268] sm:$0xff]  ;;  %267 = vst.msk [vmem:[#allocation2 + $0x138] sm:$0xff] %vm256_vm0, %v4936_v55  ;;  %v448_v62 = vld [vmem:[#allocation2 + $0x298] sm:$0xff]  ;;  %269 = vst.msk [vmem:[#allocation2 + $0x168] sm:$0xff] %vm256_vm0, %v4938_v2 }
  0x41   :  { %744 = vmatpush1.bf16.msra.mxu0 %v4912_v31  ;;  %4871 = vmatpush1.bf16.msra.mxu1 %v4912_v31  ;;  %v378_v3 = vld [vmem:[#allocation2 + $0x68] sm:$0xff]  ;;  %v5506_v5 = vld [vmem:[#allocation7 + $0x60] sm:$0xff]  ;;  %v456_v11 = vld [vmem:[#allocation2 + $0x2d8] sm:$0xff] }
  0x42   :  { %v440_v32 = vld [vmem:[#allocation2 + $0x258] sm:$0xff]  ;;  %745 = vmatprep.subr.bf16.mxu0 %v5212_v0  ;;  %4860 = vmatprep.subr.bf16.mxu1 %v5212_v0  ;;  %v5508_v6 = vld [vmem:[#allocation7 + $0x68] sm:$0xff]  ;;  %v5529_v15 = vld [vmem:[#allocation7 + $0x70] sm:$0xff] }
  0x43   :  { %4599 = vmatprep.mubr.msk.bf16.mxu1 %vm256_vm0, %v440_v32  ;;  %v446_v57 = vld [vmem:[#allocation2 + $0x288] sm:$0xff]  ;;  %v4530_v7 = vcombine.low %v5506_v5, %v5508_v6  ;;  %v4940_v12 = vld [vmem:[#allocation7 + $0x74] ss:$8 sps:$4 sm:$0xff]   ;;  %v5552_v28 = vld [vmem:[#allocation7 + $0x80] sm:$0xff] }
  0x44   :  { %v374_v61 = vld [vmem:[#allocation2 + $0x48] sm:$0xff]  ;;  %v452_v4 = vld [vmem:[#allocation2 + $0x2b8] sm:$0xff]  ;;  %271 = vst.msk [vmem:[#allocation2 + $0x198] sm:$0xff] %vm256_vm0, %v4940_v12  ;;  %v92_v21 = vld [vmem:[#allocation7 + $0xf0] sm:$0xff] }
  0x45   :  { %746 = vmatpush1.bf16.msra.mxu0 %v4913_v38  ;;  %4872 = vmatpush1.bf16.msra.mxu1 %v4913_v38  ;;  %v380_v8 = vld [vmem:[#allocation2 + $0x78] sm:$0xff]  ;;  %v382_v10 = vld [vmem:[#allocation2 + $0x88] sm:$0xff] }
  0x46   :  { %747 = vmatprep.subr.bf16.mxu0 %v5212_v0  ;;  %4861 = vmatprep.subr.bf16.mxu1 %v5212_v0  ;;  %v384_v13 = vld [vmem:[#allocation2 + $0x98] sm:$0xff]  ;;  %v462_v25 = vld [vmem:[#allocation2 + $0x308] sm:$0xff] }
  0x47   :  { %v5531_v16 = vld [vmem:[#allocation7 + $0x78] sm:$0xff]  ;;  %v4944_v26 = vld [vmem:[#allocation7 + $0x84] ss:$8 sps:$4 sm:$0xff]  }
  0x48   :  { %v4532_v17 = vcombine.low %v5529_v15, %v5531_v16  ;;  %v4942_v18 = vld [vmem:[#allocation7 + $0xf4] ss:$8 sps:$4 sm:$0xff]   ;;  %273 = vst.msk [vmem:[#allocation2 + $0x1c8] sm:$0xff] %vm256_vm0, %v4944_v26  ;;  %v5554_v29 = vld [vmem:[#allocation7 + $0x88] sm:$0xff] }
  0x49   :  { %748 = vmatpush1.bf16.msra.mxu0 %v4914_v39  ;;  %4873 = vmatpush1.bf16.msra.mxu1 %v4914_v39  ;;  %287 = vst.msk [vmem:[#allocation2 + $0x318] sm:$0xff] %vm256_vm0, %v4942_v18  ;;  %v460_v20 = vld [vmem:[#allocation2 + $0x2f8] sm:$0xff]  ;;  %v466_v32 = vld [vmem:[#allocation2 + $0x328] sm:$0xff] }
  0x4a   :  { %749 = vmatprep.subr.bf16.mxu0 %v5212_v0  ;;  %4862 = vmatprep.subr.bf16.mxu1 %v5212_v0  ;;  %v93_v22 = vld [vmem:[#allocation7 + $0xf8] sm:$0xff]  ;;  %v394_v36 = vld [vmem:[#allocation2 + $0xe8] sm:$0xff] }
  0x4b   :  { %v388_v24 = vld [vmem:[#allocation2 + $0xb8] sm:$0xff]  ;;  %v398_v42 = vld [vmem:[#allocation2 + $0x108] sm:$0xff] }
  0x4c   :  { %v392_v31 = vld [vmem:[#allocation2 + $0xd8] sm:$0xff]  ;;  %v406_v43 = vld [vmem:[#allocation2 + $0x148] sm:$0xff] }
  0x4d   :  { %750 = vmatpush1.bf16.msra.mxu0 %v4915_v40  ;;  %4874 = vmatpush1.bf16.msra.mxu1 %v4915_v40  ;;  %v4946_v38 = vld [vmem:[#allocation7 + $0x94] ss:$8 sps:$4 sm:$0xff]   ;;  %v414_v52 = vld [vmem:[#allocation2 + $0x188] sm:$0xff] }
  0x4e   :  { %751 = vmatprep.subr.bf16.mxu0 %v5212_v0  ;;  %4863 = vmatprep.subr.bf16.mxu1 %v5212_v0  ;;  %v396_v39 = vld [vmem:[#allocation2 + $0xf8] sm:$0xff]  ;;  %275 = vst.msk [vmem:[#allocation2 + $0x1f8] sm:$0xff] %vm256_vm0, %v4946_v38  ;;  %v5569_v40 = vld [vmem:[#allocation7 + $0x90] sm:$0xff] }
  0x4f   :  { %v400_v35 = vld [vmem:[#allocation2 + $0x118] sm:$0xff] }
  0x50   :  { %v464_v30 = vld [vmem:[#allocation2 + $0x318] sm:$0xff] }
  0x51   :  { %752 = vmatpush1.bf16.msra.mxu0 %v4916_v41  ;;  %4875 = vmatpush1.bf16.msra.mxu1 %v4916_v41  ;;  %v5571_v41 = vld [vmem:[#allocation7 + $0x98] sm:$0xff] }
  0x52   :  { %753 = vmatprep.subr.bf16.mxu0 %v5212_v0  ;;  %4864 = vmatprep.subr.bf16.mxu1 %v5212_v0  ;;  %v4536_v34 = vcombine.low %v5569_v40, %v5571_v41  ;;  %v404_v49 = vld [vmem:[#allocation2 + $0x138] sm:$0xff] }
  0x53   :  { %v408_v44 = vld [vmem:[#allocation2 + $0x158] sm:$0xff] }
  0x54   :  { %v416_v53 = vld [vmem:[#allocation2 + $0x198] sm:$0xff] }
  0x55   :  { %754 = vmatpush1.bf16.msra.mxu0 %v4917_v45  ;;  %4876 = vmatpush1.bf16.msra.mxu1 %v4917_v45  ;;  %v402_v45 = vld [vmem:[#allocation2 + $0x128] sm:$0xff]  ;;  %v420_v55 = vld [vmem:[#allocation2 + $0x1b8] sm:$0xff] }
  0x56   :  { %v432_v40 = vld [vmem:[#allocation2 + $0x218] sm:$0xff] }
  0x58   :  { %764 = vmatmul.mubr.bf16.vlgmr.msra.gmra.mrb[0].mxu0 %v5212_v0  ;;  %1060 = vmatmul.mubr.bf16.vlgmr.msra.gmra.mrb[0].mxu1 %v4540_v9  ;;  %v454_v9 = vld [vmem:[#allocation2 + $0x2c8] sm:$0xff] }
  0x59   :  { %4563 = vmatprep.mubr.msk.bf16.mxu0 %vm256_vm0, %v368_v47  ;;  %4600 = vmatprep.mubr.msk.bf16.mxu1 %vm256_vm0, %v442_v48  ;;  %v5584_v47 = vld [vmem:[#allocation7 + $0xa0] sm:$0xff]  ;;  %v5586_v48 = vld [vmem:[#allocation7 + $0xa8] sm:$0xff] }
  0x60   :  { %772 = vmatmul.mubr.bf16.gmra.mrb[4].mxu0 %v5212_v0  ;;  %1068 = vmatmul.mubr.bf16.gmra.mrb[4].mxu1 %v5212_v0 }
  0x61   :  { %4564 = vmatprep.mubr.msk.bf16.mxu0 %vm256_vm0, %v370_v50  ;;  %4601 = vmatprep.mubr.msk.bf16.mxu1 %vm256_vm0, %v444_v51  ;;  %v4538_v50 = vcombine.low %v5584_v47, %v5586_v48  ;;  %v412_v51 = vld [vmem:[#allocation2 + $0x178] sm:$0xff]  ;;  %v438_v47 = vld [vmem:[#allocation2 + $0x248] sm:$0xff] }
  0x68   :  { %780 = vmatmul.mubr.bf16.gmra.mrb[8].mxu0 %v5212_v0  ;;  %1076 = vmatmul.mubr.bf16.gmra.mrb[8].mxu1 %v5212_v0 }
  0x69   :  { %4565 = vmatprep.mubr.msk.bf16.mxu0 %vm256_vm0, %v372_v56  ;;  %4602 = vmatprep.mubr.msk.bf16.mxu1 %vm256_vm0, %v446_v57 }
  0x70   :  { %788 = vmatmul.mubr.bf16.gmra.mrb[12].mxu0 %v5212_v0  ;;  %1084 = vmatmul.mubr.bf16.gmra.mrb[12].mxu1 %v4542_v14  ;;  %v458_v14 = vld [vmem:[#allocation2 + $0x2e8] sm:$0xff] }
  0x71   :  { %4566 = vmatprep.mubr.msk.bf16.mxu0 %vm256_vm0, %v374_v61  ;;  %4603 = vmatprep.mubr.msk.bf16.mxu1 %vm256_vm0, %v448_v62 }
  0x78   :  { %796 = vmatmul.mubr.bf16.gmra.mrb[16].mxu0 %v4518_v19  ;;  %1092 = vmatmul.mubr.bf16.gmra.mrb[16].mxu1 %v5212_v0  ;;  %v386_v19 = vld [vmem:[#allocation2 + $0xa8] sm:$0xff] }
  0x79   :  { %4567 = vmatprep.mubr.msk.bf16.mxu0 %vm256_vm0, %v376_v63  ;;  %4604 = vmatprep.mubr.msk.bf16.mxu1 %vm256_vm0, %v450_v1  ;;  %v422_v63 = vld [vmem:[#allocation2 + $0x1c8] sm:$0xff] }
  0x80   :  { %804 = vmatmul.mubr.bf16.gmra.mrb[20].mxu0 %v5212_v0  ;;  %1100 = vmatmul.mubr.bf16.gmra.mrb[20].mxu1 %v5212_v0 }
  0x81   :  { %4568 = vmatprep.mubr.msk.bf16.mxu0 %vm256_vm0, %v378_v3  ;;  %4605 = vmatprep.mubr.msk.bf16.mxu1 %vm256_vm0, %v452_v4 }
  0x88   :  { %812 = vmatmul.mubr.bf16.gmra.mrb[24].mxu0 %v5212_v0  ;;  %1108 = vmatmul.mubr.bf16.gmra.mrb[24].mxu1 %v4544_v27  ;;  %v390_v27 = vld [vmem:[#allocation2 + $0xc8] sm:$0xff] }
  0x89   :  { %4569 = vmatprep.mubr.msk.bf16.mxu0 %vm256_vm0, %v380_v8  ;;  %4606 = vmatprep.mubr.msk.bf16.mxu1 %vm256_vm0, %v454_v9 }
  0x90   :  { %820 = vmatmul.mubr.bf16.gmra.mrb[28].mxu0 %v4520_v23  ;;  %1116 = vmatmul.mubr.bf16.gmra.mrb[28].mxu1 %v5212_v0  ;;  %v4548_v23 = vcombine.low %v92_v21, %v93_v22  ;;  %v426_v21 = vld [vmem:[#allocation2 + $0x1e8] sm:$0xff] }
  0x91   :  { %4570 = vmatprep.mubr.msk.bf16.mxu0 %vm256_vm0, %v382_v10  ;;  %4607 = vmatprep.mubr.msk.bf16.mxu1 %vm256_vm0, %v456_v11  ;;  %v424_v10 = vld [vmem:[#allocation2 + $0x1d8] sm:$0xff] }
  0x98   :  { %828 = vmatmul.mubr.bf16.gmra.mrb[32].mxu0 %v5212_v0  ;;  %1124 = vmatmul.mubr.bf16.gmra.mrb[32].mxu1 %v5212_v0 }
  0x99   :  { %4571 = vmatprep.mubr.msk.bf16.mxu0 %vm256_vm0, %v384_v13  ;;  %4608 = vmatprep.mubr.msk.bf16.mxu1 %vm256_vm0, %v458_v14 }
  0xa0   :  { %836 = vmatmul.mubr.bf16.gmra.mrb[36].mxu0 %v5212_v0  ;;  %1132 = vmatmul.mubr.bf16.gmra.mrb[36].mxu1 %v4546_v54  ;;  %v418_v54 = vld [vmem:[#allocation2 + $0x1a8] sm:$0xff] }
  0xa1   :  { %4572 = vmatprep.mubr.msk.bf16.mxu0 %vm256_vm0, %v386_v19  ;;  %4609 = vmatprep.mubr.msk.bf16.mxu1 %vm256_vm0, %v460_v20 }
  0xa8   :  { %844 = vmatmul.mubr.bf16.gmra.mrb[40].mxu0 %v4522_v33  ;;  %1140 = vmatmul.mubr.bf16.gmra.mrb[40].mxu1 %v5212_v0  ;;  %v4534_v33 = vcombine.low %v5552_v28, %v5554_v29 }
  0xa9   :  { %4573 = vmatprep.mubr.msk.bf16.mxu0 %vm256_vm0, %v388_v24  ;;  %4610 = vmatprep.mubr.msk.bf16.mxu1 %vm256_vm0, %v462_v25 }
  0xb0   :  { %852 = vmatmul.mubr.bf16.gmra.mrb[44].mxu0 %v5212_v0  ;;  %1148 = vmatmul.mubr.bf16.gmra.mrb[44].mxu1 %v5212_v0 }
  0xb1   :  { %4574 = vmatprep.mubr.msk.bf16.mxu0 %vm256_vm0, %v390_v27  ;;  %4611 = vmatprep.mubr.msk.bf16.mxu1 %vm256_vm0, %v464_v30 }
  0xb8   :  { %860 = vmatmul.mubr.bf16.gmra.mrb[48].mxu0 %v5212_v0  ;;  %1156 = vmatmul.mubr.bf16.gmra.mrb[48].mxu1 %v4548_v23 }
  0xb9   :  { %4575 = vmatprep.mubr.msk.bf16.mxu0 %vm256_vm0, %v392_v31  ;;  %4612 = vmatprep.mubr.msk.bf16.mxu1 %vm256_vm0, %v466_v32  ;;  %v428_v31 = vld [vmem:[#allocation2 + $0x1f8] sm:$0xff] }
  0xc0   :  { %868 = vmatmul.mubr.bf16.gmra.mrb[52].mxu0 %v4524_v37  ;;  %1164 = vmatmul.mubr.bf16.gmra.mrb[52].mxu1 %v5212_v0  ;;  %v4948_v37 = vld [vmem:[#allocation7 + $0xa4] ss:$8 sps:$4 sm:$0xff]  }
  0xc1   :  { %4576 = vmatprep.mubr.msk.bf16.mxu0 %vm256_vm0, %v394_v36  ;;  %277 = vst.msk [vmem:[#allocation2 + $0x228] sm:$0xff] %vm256_vm0, %v4948_v37 }
  0xc8   :  { %876 = vmatmul.mubr.bf16.gmra.mrb[56].mxu0 %v5212_v0 }
  0xc9   :  { %4577 = vmatprep.mubr.msk.bf16.mxu0 %vm256_vm0, %v396_v39 }
  0xd0   :  { %884 = vmatmul.mubr.bf16.gmra.mrb[60].mxu0 %v5212_v0 }
  0xd1   :  { %4578 = vmatprep.mubr.msk.bf16.mxu0 %vm256_vm0, %v398_v42 }
  0xd8   :  { %892 = vmatmul.mubr.bf16.gmra.mrb[64].mxu0 %v4526_v46  ;;  %v410_v46 = vld [vmem:[#allocation2 + $0x168] sm:$0xff] }
  0xd9   :  { %4579 = vmatprep.mubr.msk.bf16.mxu0 %vm256_vm0, %v400_v35 }
  0xe0   :  { %900 = vmatmul.mubr.bf16.gmra.mrb[68].mxu0 %v5212_v0 }
  0xe1   :  { %4580 = vmatprep.mubr.msk.bf16.mxu0 %vm256_vm0, %v402_v45 }
  0xe8   :  { %908 = vmatmul.mubr.bf16.gmra.mrb[72].mxu0 %v5212_v0 }
  0xe9   :  { %4581 = vmatprep.mubr.msk.bf16.mxu0 %vm256_vm0, %v404_v49 }
  0xf0   :  { %916 = vmatmul.mubr.bf16.gmra.mrb[76].mxu0 %v4528_v60 }
  0xf1   :  { %4582 = vmatprep.mubr.msk.bf16.mxu0 %vm256_vm0, %v406_v43 }
  0xf8   :  { %924 = vmatmul.mubr.bf16.gmra.mrb[80].mxu0 %v5212_v0 }
  0xf9   :  { %4583 = vmatprep.mubr.msk.bf16.mxu0 %vm256_vm0, %v408_v44 }
 0x100   :  { %932 = vmatmul.mubr.bf16.gmra.mrb[84].mxu0 %v5212_v0 }
 0x101   :  { %4584 = vmatprep.mubr.msk.bf16.mxu0 %vm256_vm0, %v410_v46 }
 0x108   :  { %940 = vmatmul.mubr.bf16.gmra.mrb[88].mxu0 %v4530_v7 }
 0x109   :  { %4585 = vmatprep.mubr.msk.bf16.mxu0 %vm256_vm0, %v412_v51 }
 0x110   :  { %948 = vmatmul.mubr.bf16.gmra.mrb[92].mxu0 %v5212_v0 }
 0x111   :  { %4586 = vmatprep.mubr.msk.bf16.mxu0 %vm256_vm0, %v414_v52 }
 0x118   :  { %956 = vmatmul.mubr.bf16.gmra.mrb[96].mxu0 %v5212_v0 }
 0x119   :  { %4587 = vmatprep.mubr.msk.bf16.mxu0 %vm256_vm0, %v416_v53 }
 0x120   :  { %964 = vmatmul.mubr.bf16.gmra.mrb[100].mxu0 %v4532_v17 }
 0x121   :  { %4588 = vmatprep.mubr.msk.bf16.mxu0 %vm256_vm0, %v418_v54 }
 0x128   :  { %972 = vmatmul.mubr.bf16.gmra.mrb[104].mxu0 %v5212_v0 }
 0x129   :  { %4589 = vmatprep.mubr.msk.bf16.mxu0 %vm256_vm0, %v420_v55 }
 0x12b   :  { %v1061_v56 = vpop.f32.mrb[0].mxu1  ;;  %v765_v57 = vpop.f32.mrb[0].mxu0 }
 0x12c   :  { %1271 = vst.msk [vmem:[#allocation3 + $0x250] sm:$0xff] %vm1196_vm1, %v1061_v56  ;;  %v1063_v58 = vpop.f32.mrb[1].mxu1  ;;  %v767_v59 = vpop.f32.mrb[1].mxu0 }
 0x12d   :  { %v1064_v60 = vpop.f32.mrb[2].mxu1  ;;  %v768_v61 = vpop.f32.mrb[2].mxu0  ;;  %v5663_v59 = vld [vmem:[#allocation2] sm:$0xff] }
 0x12e   :  { %1272 = vst.msk [vmem:[#allocation3 + $0x258] sm:$0xff] %vm1196_vm1, %v1064_v60  ;;  %v1066_v62 = vpop.f32.mrb[3].mxu1  ;;  %1198 = vst.msk [vmem:[#allocation3 + $0x8] sm:$0xff] %vm1196_vm1, %v768_v61  ;;  %v770_v1 = vpop.f32.mrb[3].mxu0 }
 0x130   :  { %980 = vmatmul.mubr.bf16.gmra.mrb[108].mxu0 %v5212_v0 }
 0x131   :  { %4590 = vmatprep.mubr.msk.bf16.mxu0 %vm256_vm0, %v422_v63 }
 0x133   :  { %v1069_v2 = vpop.f32.mrb[4].mxu1  ;;  %v1936_v3 = vld [vmem:[#allocation3 + $0x250] sm:$0xff]  ;;  %v773_v4 = vpop.f32.mrb[4].mxu0 }
 0x134   :  { %1273 = vst.msk [vmem:[#allocation3 + $0x260] sm:$0xff] %vm1196_vm1, %v1069_v2  ;;  %2022 = vrot.lane.b32.xlu0 %v1936_v3, %s5213_s1  ;;  %1199 = vst.msk [vmem:[#allocation3 + $0x10] sm:$0xff] %vm1196_vm1, %v773_v4  ;;  %v1071_v5 = vpop.f32.mrb[5].mxu1  ;;  %v775_v6 = vpop.f32.mrb[5].mxu0 }
 0x135   :  { %v1745_v7 = vld [vmem:[#allocation3 + $0x257] sm:$0xff]  ;;  %v1072_v8 = vpop.f32.mrb[6].mxu1  ;;  %v776_v9 = vpop.f32.mrb[6].mxu0  ;;  %v434_v6 = vld [vmem:[#allocation2 + $0x228] sm:$0xff] }
 0x136   :  { %1832 = vrot.lane.b32.xlu1 %v1745_v7, %s5214_s15  ;;  %v1074_v11 = vpop.f32.mrb[7].mxu1  ;;  %1200 = vst.msk [vmem:[#allocation3 + $0x18] sm:$0xff] %vm1196_vm1, %v776_v9  ;;  %v778_v12 = vpop.f32.mrb[7].mxu0  ;;  %v1937_v13 = vld [vmem:[#allocation3 + $0x258] sm:$0xff] }
 0x137   :  { %v2128_v23 = vld [vmem:[#allocation3 + $0x251] sm:$0xff] }
 0x138   :  { %1449 = vrot.lane.b32.xlu0 %v1936_v3, %s5215_s16  ;;  %988 = vmatmul.mubr.bf16.gmra.mrb[112].mxu0 %v4534_v33 }
 0x139   :  { %4591 = vmatprep.mubr.msk.bf16.mxu0 %vm256_vm0, %v424_v10 }
 0x13a   :  { %2024 = vrot.lane.b32.xlu1 %v1937_v13, %s5213_s1 }
 0x13b   :  { %v1077_v14 = vpop.f32.mrb[8].mxu1  ;;  %v781_v15 = vpop.f32.mrb[8].mxu0  ;;  %v2129_v33 = vld [vmem:[#allocation3 + $0x259] sm:$0xff]  ;;  %v1337_v36 = vld [vmem:[#allocation3 + $0x10] sm:$0xff] }
 0x13c   :  { %2595 = vrot.lane.b32.xlu0 %v1936_v3, %s5216_s17  ;;  %v1079_v16 = vpop.f32.mrb[9].mxu1  ;;  %1201 = vst.msk [vmem:[#allocation3 + $0x20] sm:$0xff] %vm1196_vm1, %v781_v15  ;;  %v783_v17 = vpop.f32.mrb[9].mxu0  ;;  %v436_v15 = vld [vmem:[#allocation2 + $0x238] sm:$0xff] }
 0x13d   :  { %v1080_v18 = vpop.f32.mrb[10].mxu1  ;;  %v784_v19 = vpop.f32.mrb[10].mxu0  ;;  %v1338_v44 = vld [vmem:[#allocation3 + $0x18] sm:$0xff] }
 0x13e   :  { %1451 = vrot.lane.b32.xlu1 %v1937_v13, %s5215_s16  ;;  %1276 = vst.msk [vmem:[#allocation3 + $0x278] sm:$0xff] %vm1196_vm1, %v1080_v18  ;;  %v1082_v20 = vpop.f32.mrb[11].mxu1  ;;  %v786_v22 = vpop.f32.mrb[11].mxu0  ;;  %v1529_v46 = vld [vmem:[#allocation3 + $0x11] sm:$0xff] }
 0x140   :  { %2214 = vrot.lane.b32.xlu0 %v2128_v23, %s5217_s18  ;;  %996 = vmatmul.mubr.bf16.gmra.mrb[116].mxu0 %v5212_v0 }
 0x141   :  { %4592 = vmatprep.mubr.msk.bf16.mxu0 %vm256_vm0, %v426_v21 }
 0x142   :  { %2405 = vrot.lane.b32.xlu1 %v1745_v7, %s5218_s19 }
 0x143   :  { %v1085_v24 = vpop.f32.mrb[12].mxu1  ;;  %v789_v25 = vpop.f32.mrb[12].mxu0  ;;  %v1530_v55 = vld [vmem:[#allocation3 + $0x19] sm:$0xff] }
 0x144   :  { %1641 = vrot.lane.b32.xlu0 %v2128_v23, %s5219_s20  ;;  %1277 = vst.msk [vmem:[#allocation3 + $0x280] sm:$0xff] %vm1196_vm1, %v1085_v24  ;;  %v1087_v26 = vpop.f32.mrb[13].mxu1  ;;  %v791_v27 = vpop.f32.mrb[13].mxu0 }
 0x145   :  { %v1088_v30 = vpop.f32.mrb[14].mxu1  ;;  %v792_v28 = vpop.f32.mrb[14].mxu0 }
 0x146   :  { %2597 = vrot.lane.b32.xlu1 %v1937_v13, %s5216_s17  ;;  %1278 = vst.msk [vmem:[#allocation3 + $0x288] sm:$0xff] %vm1196_vm1, %v1088_v30  ;;  %v1090_v29 = vpop.f32.mrb[15].mxu1  ;;  %1204 = vst.msk [vmem:[#allocation3 + $0x38] sm:$0xff] %vm1196_vm1, %v792_v28  ;;  %v794_v32 = vpop.f32.mrb[15].mxu0 }
 0x148   :  { %2787 = vrot.lane.b32.xlu0 %v2128_v23, %s5220_s21  ;;  %1004 = vmatmul.mubr.bf16.gmra.mrb[120].mxu0 %v5212_v0  ;;  %v430_v0 = vld [vmem:[#allocation2 + $0x208] sm:$0xff] }
 0x149   :  { %4593 = vmatprep.mubr.msk.bf16.mxu0 %vm256_vm0, %v428_v31 }
 0x14a   :  { %2216 = vrot.lane.b32.xlu1 %v2129_v33, %s5217_s18 }
 0x14b   :  { %v1093_v38 = vpop.f32.mrb[16].mxu1  ;;  %v797_v39 = vpop.f32.mrb[16].mxu0  ;;  %v1363_v56 = vld [vmem:[#allocation3 + $0x280] sm:$0xff] }
 0x14c   :  { %1401 = vrot.lane.b32.xlu0 %v1337_v36, %s5215_s16  ;;  %1279 = vst.msk [vmem:[#allocation3 + $0x290] sm:$0xff] %vm1196_vm1, %v1093_v38  ;;  %1205 = vst.msk [vmem:[#allocation3 + $0x40] sm:$0xff] %vm1196_vm1, %v797_v39  ;;  %v799_v42 = vpop.f32.mrb[17].mxu0  ;;  %v1095_v35 = vpop.f32.mrb[17].mxu1  ;;  %v2321_v61 = vld [vmem:[#allocation3 + $0x27f] sm:$0xff] }
 0x14d   :  { %v800_v37 = vpop.f32.mrb[18].mxu0  ;;  %v1096_v45 = vpop.f32.mrb[18].mxu1  ;;  %v1364_v60 = vld [vmem:[#allocation3 + $0x288] sm:$0xff] }
 0x14e   :  { %1643 = vrot.lane.b32.xlu1 %v2129_v33, %s5219_s20  ;;  %1206 = vst.msk [vmem:[#allocation3 + $0x48] sm:$0xff] %vm1196_vm1, %v800_v37  ;;  %v802_v49 = vpop.f32.mrb[19].mxu0  ;;  %v1098_v43 = vpop.f32.mrb[19].mxu1  ;;  %v2322_v3 = vld [vmem:[#allocation3 + $0x287] sm:$0xff] }
 0x14f   :  { %v1555_v18 = vld [vmem:[#allocation3 + $0x281] sm:$0xff] }
 0x150   :  { %1403 = vrot.lane.b32.xlu0 %v1338_v44, %s5215_s16  ;;  %1012 = vmatmul.mubr.bf16.gmra.mrb[124].mxu0 %v4536_v34 }
 0x151   :  { %4594 = vmatprep.mubr.msk.bf16.mxu0 %vm256_vm0, %v430_v0 }
 0x152   :  { %2789 = vrot.lane.b32.xlu1 %v2129_v33, %s5220_s21 }
 0x153   :  { %v805_v51 = vpop.f32.mrb[20].mxu0  ;;  %v1101_v52 = vpop.f32.mrb[20].mxu1  ;;  %v1339_v19 = vld [vmem:[#allocation3 + $0x40] sm:$0xff]  ;;  %v1556_v26 = vld [vmem:[#allocation3 + $0x289] sm:$0xff] }
 0x154   :  { %1593 = vrot.lane.b32.xlu0 %v1529_v46, %s5219_s20  ;;  %1207 = vst.msk [vmem:[#allocation3 + $0x50] sm:$0xff] %vm1196_vm1, %v805_v51  ;;  %v1103_v53 = vpop.f32.mrb[21].mxu1  ;;  %v807_v54 = vpop.f32.mrb[21].mxu0  ;;  %v5701_v38 = vld [vmem:[#allocation3 + $0x3f] sm:$0xff] }
 0x155   :  { %v1104_v57 = vpop.f32.mrb[22].mxu1  ;;  %v808_v58 = vpop.f32.mrb[22].mxu0  ;;  %v1340_v45 = vld [vmem:[#allocation3 + $0x48] sm:$0xff] }
 0x156   :  { %1595 = vrot.lane.b32.xlu1 %v1530_v55, %s5219_s20  ;;  %1282 = vst.msk [vmem:[#allocation3 + $0x2a8] sm:$0xff] %vm1196_vm1, %v1104_v57  ;;  %v1106_v41 = vpop.f32.mrb[23].mxu1  ;;  %v810_v34 = vpop.f32.mrb[23].mxu0  ;;  %v1531_v46 = vld [vmem:[#allocation3 + $0x41] sm:$0xff] }
 0x157   :  { %v5713_v51 = vld [vmem:[#allocation3 + $0x47] sm:$0xff] }
 0x158   :  { %1453 = vrot.lane.b32.xlu0 %v1363_v56, %s5215_s16  ;;  %1020 = vmatmul.mubr.bf16.gmra.mrb[128].mxu0 %v5663_v59 }
 0x159   :  { %4595 = vmatprep.mubr.msk.bf16.mxu0 %vm256_vm0, %v432_v40 }
 0x15a   :  { %1455 = vrot.lane.b32.xlu1 %v1364_v60, %s5215_s16 }
 0x15b   :  { %v1109_v62 = vpop.f32.mrb[24].mxu1  ;;  %v813_v63 = vpop.f32.mrb[24].mxu0  ;;  %v1532_v34 = vld [vmem:[#allocation3 + $0x49] sm:$0xff] }
 0x15c   :  { %2407 = vrot.lane.b32.xlu0 %v2321_v61, %s5218_s19  ;;  %1283 = vst.msk [vmem:[#allocation3 + $0x2b0] sm:$0xff] %vm1196_vm1, %v1109_v62  ;;  %v1111_v1 = vpop.f32.mrb[25].mxu1  ;;  %v815_v2 = vpop.f32.mrb[25].mxu0 }
 0x15d   :  { %v1112_v4 = vpop.f32.mrb[26].mxu1  ;;  %v816_v5 = vpop.f32.mrb[26].mxu0 }
 0x15e   :  { %2409 = vrot.lane.b32.xlu1 %v2322_v3, %s5218_s19  ;;  %1284 = vst.msk [vmem:[#allocation3 + $0x2b8] sm:$0xff] %vm1196_vm1, %v1112_v4  ;;  %v1114_v7 = vpop.f32.mrb[27].mxu1  ;;  %1210 = vst.msk [vmem:[#allocation3 + $0x68] sm:$0xff] %vm1196_vm1, %v816_v5  ;;  %v818_v8 = vpop.f32.mrb[27].mxu0 }
 0x160   :  { %1834 = vrot.lane.b32.xlu0 %v2321_v61, %s5214_s15  ;;  %1028 = vmatmul.mubr.bf16.gmra.mrb[132].mxu0 %v5663_v59 }
 0x161   :  { %4596 = vmatprep.mubr.msk.bf16.mxu0 %vm256_vm0, %v434_v6 }
 0x162   :  { %1836 = vrot.lane.b32.xlu1 %v2322_v3, %s5214_s15 }
 0x163   :  { %v1117_v9 = vpop.f32.mrb[28].mxu1  ;;  %v821_v10 = vpop.f32.mrb[28].mxu0  ;;  %v1748_v41 = vld [vmem:[#allocation3 + $0x2af] sm:$0xff] }
 0x164   :  { %2599 = vrot.lane.b32.xlu0 %v1363_v56, %s5216_s17  ;;  %1285 = vst.msk [vmem:[#allocation3 + $0x2c0] sm:$0xff] %vm1196_vm1, %v1117_v9  ;;  %1211 = vst.msk [vmem:[#allocation3 + $0x70] sm:$0xff] %vm1196_vm1, %v821_v10  ;;  %v1119_v11 = vpop.f32.mrb[29].mxu1  ;;  %v823_v12 = vpop.f32.mrb[29].mxu0 }
 0x165   :  { %v1120_v13 = vpop.f32.mrb[30].mxu1  ;;  %v824_v14 = vpop.f32.mrb[30].mxu0  ;;  %v1749_v6 = vld [vmem:[#allocation3 + $0x2b7] sm:$0xff] }
 0x166   :  { %2601 = vrot.lane.b32.xlu1 %v1364_v60, %s5216_s17  ;;  %v1122_v16 = vpop.f32.mrb[31].mxu1  ;;  %1212 = vst.msk [vmem:[#allocation3 + $0x78] sm:$0xff] %vm1196_vm1, %v824_v14  ;;  %v826_v17 = vpop.f32.mrb[31].mxu0  ;;  %v1941_v11 = vld [vmem:[#allocation3 + $0x2b8] sm:$0xff] }
 0x167   :  { %v2132_v16 = vld [vmem:[#allocation3 + $0x2b1] sm:$0xff] }
 0x168   :  { %2026 = vrot.lane.b32.xlu0 %v1363_v56, %s5213_s1  ;;  %1036 = vmatmul.mubr.bf16.gmra.mrb[136].mxu0 %v4538_v50 }
 0x169   :  { %4597 = vmatprep.mubr.msk.bf16.mxu0 %vm256_vm0, %v436_v15 }
 0x16a   :  { %2028 = vrot.lane.b32.xlu1 %v1364_v60, %s5213_s1  ;;  %v1940_v60 = vld [vmem:[#allocation3 + $0x2b0] sm:$0xff] }
 0x16b   :  { %v829_v20 = vpop.f32.mrb[32].mxu0  ;;  %v1125_v21 = vpop.f32.mrb[32].mxu1 }
 0x16c   :  { %1645 = vrot.lane.b32.xlu0 %v1555_v18, %s5219_s20  ;;  %1213 = vst.msk [vmem:[#allocation3 + $0x80] sm:$0xff] %vm1196_vm1, %v829_v20  ;;  %v1127_v22 = vpop.f32.mrb[33].mxu1  ;;  %v831_v23 = vpop.f32.mrb[33].mxu0 }
 0x16d   :  { %v1128_v24 = vpop.f32.mrb[34].mxu1  ;;  %v832_v25 = vpop.f32.mrb[34].mxu0  ;;  %v2133_v23 = vld [vmem:[#allocation3 + $0x2b9] sm:$0xff] }
 0x16e   :  { %1405 = vrot.lane.b32.xlu1 %v1339_v19, %s5215_s16  ;;  %1288 = vst.msk [vmem:[#allocation3 + $0x2d8] sm:$0xff] %vm1196_vm1, %v1128_v24  ;;  %v1130_v48 = vpop.f32.mrb[35].mxu1  ;;  %v834_v50 = vpop.f32.mrb[35].mxu0 }
 0x16f   :  { %v5747_v48 = vld [vmem:[#allocation3 + $0x6f] sm:$0xff] }
 0x170   :  { %2791 = vrot.lane.b32.xlu0 %v1555_v18, %s5220_s21  ;;  %1044 = vmatmul.mubr.bf16.gmra.mrb[140].mxu0 %v5663_v59 }
 0x171   :  { %4598 = vmatprep.mubr.msk.bf16.mxu0 %vm256_vm0, %v438_v47 }
 0x172   :  { %1647 = vrot.lane.b32.xlu1 %v1556_v26, %s5219_s20 }
 0x173   :  { %v1133_v27 = vpop.f32.mrb[36].mxu1  ;;  %v837_v30 = vpop.f32.mrb[36].mxu0 }
 0x174   :  { %2218 = vrot.lane.b32.xlu0 %v1555_v18, %s5217_s18  ;;  %1289 = vst.msk [vmem:[#allocation3 + $0x2e0] sm:$0xff] %vm1196_vm1, %v1133_v27  ;;  %v1135_v28 = vpop.f32.mrb[37].mxu1  ;;  %v839_v29 = vpop.f32.mrb[37].mxu0  ;;  %v1916_v27 = vld [vmem:[#allocation3 + $0x70] sm:$0xff] }
 0x175   :  { %v1136_v31 = vpop.f32.mrb[38].mxu1  ;;  %v840_v32 = vpop.f32.mrb[38].mxu0 }
 0x176   :  { %2793 = vrot.lane.b32.xlu1 %v1556_v26, %s5220_s21  ;;  %1290 = vst.msk [vmem:[#allocation3 + $0x2e8] sm:$0xff] %vm1196_vm1, %v1136_v31  ;;  %v1138_v33 = vpop.f32.mrb[39].mxu1  ;;  %1216 = vst.msk [vmem:[#allocation3 + $0x98] sm:$0xff] %vm1196_vm1, %v840_v32  ;;  %v842_v36 = vpop.f32.mrb[39].mxu0 }
 0x178   :  { %1052 = vmatmul.mubr.bf16.gmra.mrb[144].mxu0 %v5663_v59  ;;  %1786 = vrot.lane.b32.xlu0 %v5701_v38, %s5214_s15 }
 0x17a   :  { %2220 = vrot.lane.b32.xlu1 %v1556_v26, %s5217_s18 }
 0x17b   :  { %v1141_v39 = vpop.f32.mrb[40].mxu1  ;;  %v845_v42 = vpop.f32.mrb[40].mxu0 }
 0x17c   :  { %1978 = vrot.lane.b32.xlu0 %v1339_v19, %s5213_s1  ;;  %1291 = vst.msk [vmem:[#allocation3 + $0x2f0] sm:$0xff] %vm1196_vm1, %v1141_v39  ;;  %1217 = vst.msk [vmem:[#allocation3 + $0xa0] sm:$0xff] %vm1196_vm1, %v845_v42  ;;  %v1143_v35 = vpop.f32.mrb[41].mxu1  ;;  %v847_v37 = vpop.f32.mrb[41].mxu0  ;;  %v5767_v39 = vld [vmem:[#allocation3 + $0x77] sm:$0xff] }
 0x17d   :  { %v1144_v0 = vpop.f32.mrb[42].mxu1  ;;  %v848_v49 = vpop.f32.mrb[42].mxu0  ;;  %v468_v35 = vld [vmem:[#allocation2 + $0x338] sm:$0xff] }
 0x17e   :  { %1407 = vrot.lane.b32.xlu1 %v1340_v45, %s5215_s16  ;;  %v1146_v43 = vpop.f32.mrb[43].mxu1  ;;  %1218 = vst.msk [vmem:[#allocation3 + $0xa8] sm:$0xff] %vm1196_vm1, %v848_v49  ;;  %v850_v44 = vpop.f32.mrb[43].mxu0  ;;  %4613 = vmatprep.mubr.msk.bf16.mxu1 %vm256_vm0, %v468_v35  ;;  %v1917_v49 = vld [vmem:[#allocation3 + $0x78] sm:$0xff] }
 0x17f   :  { %1172 = vmatmul.mubr.bf16.gmra.mrb[56].mxu1 %v5663_v59 }
 0x180   :  { %1597 = vrot.lane.b32.xlu0 %v1531_v46, %s5219_s20 }
 0x182   :  { %1788 = vrot.lane.b32.xlu1 %v5713_v51, %s5214_s15 }
 0x183   :  { %v853_v52 = vpop.f32.mrb[44].mxu0  ;;  %v1149_v53 = vpop.f32.mrb[44].mxu1 }
 0x184   :  { %2170 = vrot.lane.b32.xlu0 %v1531_v46, %s5217_s18  ;;  %1219 = vst.msk [vmem:[#allocation3 + $0xb0] sm:$0xff] %vm1196_vm1, %v853_v52  ;;  %v855_v54 = vpop.f32.mrb[45].mxu0  ;;  %v1151_v55 = vpop.f32.mrb[45].mxu1 }
 0x185   :  { %v856_v56 = vpop.f32.mrb[46].mxu0  ;;  %v1152_v57 = vpop.f32.mrb[46].mxu1  ;;  %v470_v54 = vld [vmem:[#allocation2 + $0x348] sm:$0xff]  ;;  %v2108_v55 = vld [vmem:[#allocation3 + $0x71] sm:$0xff] }
 0x186   :  { %1980 = vrot.lane.b32.xlu1 %v1340_v45, %s5213_s1  ;;  %v858_v58 = vpop.f32.mrb[47].mxu0  ;;  %1294 = vst.msk [vmem:[#allocation3 + $0x308] sm:$0xff] %vm1196_vm1, %v1152_v57  ;;  %v1154_v40 = vpop.f32.mrb[47].mxu1  ;;  %4614 = vmatprep.mubr.msk.bf16.mxu1 %vm256_vm0, %v470_v54 }
 0x187   :  { %1180 = vmatmul.mubr.bf16.gmra.mrb[60].mxu1 %v5663_v59 }
 0x188   :  { %1838 = vrot.lane.b32.xlu0 %v1748_v41, %s5214_s15 }
 0x18a   :  { %1599 = vrot.lane.b32.xlu1 %v1532_v34, %s5219_s20 }
 0x18b   :  { %v861_v61 = vpop.f32.mrb[48].mxu0  ;;  %v1157_v62 = vpop.f32.mrb[48].mxu1 }
 0x18c   :  { %2030 = vrot.lane.b32.xlu0 %v1940_v60, %s5213_s1  ;;  %v863_v63 = vpop.f32.mrb[49].mxu0  ;;  %1295 = vst.msk [vmem:[#allocation3 + $0x310] sm:$0xff] %vm1196_vm1, %v1157_v62  ;;  %v1159_v1 = vpop.f32.mrb[49].mxu1  ;;  %v472_v62 = vld [vmem:[#allocation2 + $0x358] sm:$0xff] }
 0x18d   :  { %v864_v2 = vpop.f32.mrb[50].mxu0  ;;  %v1160_v3 = vpop.f32.mrb[50].mxu1  ;;  %4615 = vmatprep.mubr.msk.bf16.mxu1 %vm256_vm0, %v472_v62 }
 0x18e   :  { %2172 = vrot.lane.b32.xlu1 %v1532_v34, %s5217_s18  ;;  %1222 = vst.msk [vmem:[#allocation3 + $0xc8] sm:$0xff] %vm1196_vm1, %v864_v2  ;;  %v866_v4 = vpop.f32.mrb[51].mxu0  ;;  %1296 = vst.msk [vmem:[#allocation3 + $0x318] sm:$0xff] %vm1196_vm1, %v1160_v3  ;;  %v1162_v5 = vpop.f32.mrb[51].mxu1  ;;  %v2109_v3 = vld [vmem:[#allocation3 + $0x79] sm:$0xff] }
 0x18f   :  { %1188 = vmatmul.mubr.bf16.gmra.mrb[64].mxu1 %v5663_v59  ;;  %v1367_v4 = vld [vmem:[#allocation3 + $0x2e0] sm:$0xff] }
 0x190   :  { %1457 = vrot.lane.b32.xlu0 %v1940_v60, %s5215_s16 }
 0x192   :  { %1840 = vrot.lane.b32.xlu1 %v1749_v6, %s5214_s15 }
 0x193   :  { %v869_v7 = vpop.f32.mrb[52].mxu0  ;;  %v1165_v8 = vpop.f32.mrb[52].mxu1 }
 0x194   :  { %2411 = vrot.lane.b32.xlu0 %v1748_v41, %s5218_s19  ;;  %1223 = vst.msk [vmem:[#allocation3 + $0xd0] sm:$0xff] %vm1196_vm1, %v869_v7  ;;  %v871_v9 = vpop.f32.mrb[53].mxu0  ;;  %1297 = vst.msk [vmem:[#allocation3 + $0x320] sm:$0xff] %vm1196_vm1, %v1165_v8  ;;  %v1167_v10 = vpop.f32.mrb[53].mxu1 }
 0x195   :  { %v872_v12 = vpop.f32.mrb[54].mxu0  ;;  %v1168_v13 = vpop.f32.mrb[54].mxu1  ;;  %v2325_v10 = vld [vmem:[#allocation3 + $0x2df] sm:$0xff] }
 0x196   :  { %2032 = vrot.lane.b32.xlu1 %v1941_v11, %s5213_s1  ;;  %1224 = vst.msk [vmem:[#allocation3 + $0xd8] sm:$0xff] %vm1196_vm1, %v872_v12  ;;  %v874_v14 = vpop.f32.mrb[55].mxu0  ;;  %v1170_v15 = vpop.f32.mrb[55].mxu1 }
 0x198   :  { %2603 = vrot.lane.b32.xlu0 %v1940_v60, %s5216_s17 }
 0x19a   :  { %1459 = vrot.lane.b32.xlu1 %v1941_v11, %s5215_s16 }
 0x19b   :  { %v877_v17 = vpop.f32.mrb[56].mxu0 }
 0x19c   :  { %2222 = vrot.lane.b32.xlu0 %v2132_v16, %s5217_s18  ;;  %1225 = vst.msk [vmem:[#allocation3 + $0xe0] sm:$0xff] %vm1196_vm1, %v877_v17  ;;  %v879_v18 = vpop.f32.mrb[57].mxu0  ;;  %v1368_v17 = vld [vmem:[#allocation3 + $0x2e8] sm:$0xff] }
 0x19d   :  { %v880_v19 = vpop.f32.mrb[58].mxu0 }
 0x19e   :  { %2413 = vrot.lane.b32.xlu1 %v1749_v6, %s5218_s19  ;;  %v882_v20 = vpop.f32.mrb[59].mxu0 }
 0x1a0   :  { %1649 = vrot.lane.b32.xlu0 %v2132_v16, %s5219_s20 }
 0x1a2   :  { %2605 = vrot.lane.b32.xlu1 %v1941_v11, %s5216_s17 }
 0x1a3   :  { %v885_v21 = vpop.f32.mrb[60].mxu0 }
 0x1a4   :  { %2795 = vrot.lane.b32.xlu0 %v2132_v16, %s5220_s21  ;;  %v887_v22 = vpop.f32.mrb[61].mxu0 }
 0x1a5   :  { %v888_v24 = vpop.f32.mrb[62].mxu0  ;;  %v2326_v22 = vld [vmem:[#allocation3 + $0x2e7] sm:$0xff] }
 0x1a6   :  { %v5743_v25 = vpop.permute.xlu0 %2022  ;;  %2224 = vrot.lane.b32.xlu1 %v2133_v23, %s5217_s18  ;;  %1228 = vst.msk [vmem:[#allocation3 + $0xf8] sm:$0xff] %vm1196_vm1, %v888_v24  ;;  %v890_v47 = vpop.f32.mrb[63].mxu0 }
 0x1a7   :  { %7031 = vst [vmem:[#allocation16_spill] sm:$0xff] %v5743_v25 }
 0x1a8   :  { %v5749_v50 = vpop.permute.xlu1 %1832  ;;  %1790 = vrot.lane.b32.xlu0 %v5747_v48, %s5214_s15 }
 0x1a9   :  { %7032 = vst [vmem:[#allocation17_spill] sm:$0xff] %v5749_v50 }
 0x1aa   :  { %v5753_v26 = vpop.permute.xlu0 %1449  ;;  %1651 = vrot.lane.b32.xlu1 %v2133_v23, %s5219_s20 }
 0x1ab   :  { %v893_v30 = vpop.f32.mrb[64].mxu0 }
 0x1ac   :  { %v5756_v28 = vpop.permute.xlu1 %2024  ;;  %1982 = vrot.lane.b32.xlu0 %v1916_v27, %s5213_s1  ;;  %1229 = vst.msk [vmem:[#allocation3 + $0x100] sm:$0xff] %vm1196_vm1, %v893_v30  ;;  %v895_v29 = vpop.f32.mrb[65].mxu0 }
 0x1ad   :  { %7033 = vst [vmem:[#allocation18_spill] sm:$0xff] %v5756_v28  ;;  %v896_v31 = vpop.f32.mrb[66].mxu0  ;;  %v1559_v29 = vld [vmem:[#allocation3 + $0x2e1] sm:$0xff] }
 0x1ae   :  { %v5760_v32 = vpop.permute.xlu0 %2595  ;;  %2797 = vrot.lane.b32.xlu1 %v2133_v23, %s5220_s21  ;;  %1230 = vst.msk [vmem:[#allocation3 + $0x108] sm:$0xff] %vm1196_vm1, %v896_v31  ;;  %v898_v33 = vpop.f32.mrb[67].mxu0 }
 0x1af   :  { %7034 = vst [vmem:[#allocation19_spill] sm:$0xff] %v5760_v32 }
 0x1b0   :  { %v5764_v36 = vpop.permute.xlu1 %1451  ;;  %1409 = vrot.lane.b32.xlu0 %v1916_v27, %s5215_s16 }
 0x1b2   :  { %v5769_v42 = vpop.permute.xlu0 %2214  ;;  %1792 = vrot.lane.b32.xlu1 %v5767_v39, %s5214_s15 }
 0x1b3   :  { %7035 = vst [vmem:[#allocation20_spill] sm:$0xff] %v5769_v42  ;;  %v901_v37 = vpop.f32.mrb[68].mxu0  ;;  %v2112_v42 = vld [vmem:[#allocation3 + $0xd1] sm:$0xff] }
 0x1b4   :  { %v5774_v45 = vpop.permute.xlu1 %2405  ;;  %2363 = vrot.lane.b32.xlu0 %v5747_v48, %s5218_s19  ;;  %1231 = vst.msk [vmem:[#allocation3 + $0x110] sm:$0xff] %vm1196_vm1, %v901_v37  ;;  %v903_v0 = vpop.f32.mrb[69].mxu0 }
 0x1b5   :  { %7036 = vst [vmem:[#allocation21_spill] sm:$0xff] %v5774_v45  ;;  %v904_v43 = vpop.f32.mrb[70].mxu0 }
 0x1b6   :  { %v5780_v44 = vpop.permute.xlu0 %1641  ;;  %1984 = vrot.lane.b32.xlu1 %v1917_v49, %s5213_s1  ;;  %v906_v46 = vpop.f32.mrb[71].mxu0 }
 0x1b8   :  { %v5783_v52 = vpop.permute.xlu1 %2597  ;;  %2555 = vrot.lane.b32.xlu0 %v1916_v27, %s5216_s17 }
 0x1b9   :  { %7037 = vst [vmem:[#allocation22_spill] sm:$0xff] %v5783_v52  ;;  %v2136_v52 = vld [vmem:[#allocation3 + $0x311] sm:$0xff] }
 0x1ba   :  { %v5786_v53 = vpop.permute.xlu0 %2787  ;;  %1411 = vrot.lane.b32.xlu1 %v1917_v49, %s5215_s16 }
 0x1bb   :  { %7038 = vst [vmem:[#allocation23_spill] sm:$0xff] %v5786_v53  ;;  %v909_v56 = vpop.f32.mrb[72].mxu0  ;;  %v2137_v53 = vld [vmem:[#allocation3 + $0x319] sm:$0xff] }
 0x1bc   :  { %v5790_v57 = vpop.permute.xlu1 %2216  ;;  %2174 = vrot.lane.b32.xlu0 %v2108_v55, %s5217_s18  ;;  %v911_v58 = vpop.f32.mrb[73].mxu0 }
 0x1bd   :  { %7039 = vst [vmem:[#allocation24_spill] sm:$0xff] %v5790_v57  ;;  %v912_v40 = vpop.f32.mrb[74].mxu0  ;;  %v1560_v58 = vld [vmem:[#allocation3 + $0x2e9] sm:$0xff] }
 0x1be   :  { %v5794_v41 = vpop.permute.xlu0 %1401  ;;  %2365 = vrot.lane.b32.xlu1 %v5767_v39, %s5218_s19  ;;  %1234 = vst.msk [vmem:[#allocation3 + $0x128] sm:$0xff] %vm1196_vm1, %v912_v40  ;;  %v914_v34 = vpop.f32.mrb[75].mxu0  ;;  %v1343_v40 = vld [vmem:[#allocation3 + $0xa0] sm:$0xff]  ;;  %v1305_v57 = vld [vmem:[#allocation3 + $0xf] sm:$0xff] }
 0x1bf   :  { %v1497_v28 = vadd.f32 %v5794_v41, %v1305_v57 }
 0x1c0   :  { %v5799_v60 = vpop.permute.xlu1 %1643  ;;  %1601 = vrot.lane.b32.xlu0 %v2108_v55, %s5219_s20 }
 0x1c2   :  { %v5802_v61 = vpop.permute.xlu0 %1403  ;;  %2557 = vrot.lane.b32.xlu1 %v1917_v49, %s5216_s17 }
 0x1c3   :  { %v917_v63 = vpop.f32.mrb[76].mxu0 }
 0x1c4   :  { %v5806_v1 = vpop.permute.xlu1 %2789  ;;  %2747 = vrot.lane.b32.xlu0 %v2108_v55, %s5220_s21  ;;  %1235 = vst.msk [vmem:[#allocation3 + $0x130] sm:$0xff] %vm1196_vm1, %v917_v63  ;;  %v919_v2 = vpop.f32.mrb[77].mxu0 }
 0x1c5   :  { %7040 = vst [vmem:[#allocation25_spill] sm:$0xff] %v5806_v1  ;;  %v920_v5 = vpop.f32.mrb[78].mxu0 }
 0x1c6   :  { %v5811_v6 = vpop.permute.xlu0 %1593  ;;  %2176 = vrot.lane.b32.xlu1 %v2109_v3, %s5217_s18  ;;  %1236 = vst.msk [vmem:[#allocation3 + $0x138] sm:$0xff] %vm1196_vm1, %v920_v5  ;;  %v922_v7 = vpop.f32.mrb[79].mxu0 }
 0x1c8   :  { %v5815_v8 = vpop.permute.xlu1 %1595  ;;  %1461 = vrot.lane.b32.xlu0 %v1367_v4, %s5215_s16 }
 0x1ca   :  { %v5818_v9 = vpop.permute.xlu0 %1453  ;;  %1603 = vrot.lane.b32.xlu1 %v2109_v3, %s5219_s20 }
 0x1cb   :  { %v925_v59 = vpop.f32.mrb[80].mxu0 }
 0x1cc   :  { %v5821_v11 = vpop.permute.xlu1 %1455  ;;  %2415 = vrot.lane.b32.xlu0 %v2325_v10, %s5218_s19  ;;  %1237 = vst.msk [vmem:[#allocation3 + $0x140] sm:$0xff] %vm1196_vm1, %v925_v59  ;;  %v927_v12 = vpop.f32.mrb[81].mxu0 }
 0x1cd   :  { %v928_v13 = vpop.f32.mrb[82].mxu0 }
 0x1ce   :  { %v5825_v14 = vpop.permute.xlu0 %2407  ;;  %2749 = vrot.lane.b32.xlu1 %v2109_v3, %s5220_s21  ;;  %v930_v15 = vpop.f32.mrb[83].mxu0 }
 0x1cf   :  { %7041 = vst [vmem:[#allocation26_spill] sm:$0xff] %v5825_v14 }
 0x1d0   :  { %v5828_v16 = vpop.permute.xlu1 %2409  ;;  %1842 = vrot.lane.b32.xlu0 %v2325_v10, %s5214_s15 }
 0x1d1   :  { %7042 = vst [vmem:[#allocation27_spill] sm:$0xff] %v5828_v16 }
 0x1d2   :  { %v5831_v18 = vpop.permute.xlu0 %1834  ;;  %1463 = vrot.lane.b32.xlu1 %v1368_v17, %s5215_s16 }
 0x1d3   :  { %v933_v19 = vpop.f32.mrb[84].mxu0 }
 0x1d4   :  { %v5834_v20 = vpop.permute.xlu1 %1836  ;;  %2607 = vrot.lane.b32.xlu0 %v1367_v4, %s5216_s17  ;;  %v935_v21 = vpop.f32.mrb[85].mxu0 }
 0x1d5   :  { %v936_v23 = vpop.f32.mrb[86].mxu0 }
 0x1d6   :  { %v5837_v24 = vpop.permute.xlu0 %2599  ;;  %2417 = vrot.lane.b32.xlu1 %v2326_v22, %s5218_s19  ;;  %1240 = vst.msk [vmem:[#allocation3 + $0x158] sm:$0xff] %vm1196_vm1, %v936_v23  ;;  %v938_v47 = vpop.f32.mrb[87].mxu0 }
 0x1d7   :  { %7043 = vst [vmem:[#allocation28_spill] sm:$0xff] %v5837_v24  ;;  %v5895_v47 = vld [vmem:[#allocation3 + $0xa7] sm:$0xff]  ;;  %v5971_v24 = vld [vmem:[#allocation3 + $0xd7] sm:$0xff] }
 0x1d8   :  { %v5841_v27 = vpop.permute.xlu1 %2601  ;;  %2034 = vrot.lane.b32.xlu0 %v1367_v4, %s5213_s1  ;;  %v5874_v4 = vld [vmem:[#allocation3 + $0x9f] sm:$0xff] }
 0x1d9   :  { %7044 = vst [vmem:[#allocation29_spill] sm:$0xff] %v5841_v27 }
 0x1da   :  { %v5844_v30 = vpop.permute.xlu0 %2026  ;;  %1844 = vrot.lane.b32.xlu1 %v2326_v22, %s5214_s15 }
 0x1db   :  { %v941_v31 = vpop.f32.mrb[88].mxu0 }
 0x1dc   :  { %v5847_v33 = vpop.permute.xlu1 %2028  ;;  %1653 = vrot.lane.b32.xlu0 %v1559_v29, %s5219_s20  ;;  %1241 = vst.msk [vmem:[#allocation3 + $0x160] sm:$0xff] %vm1196_vm1, %v941_v31  ;;  %v943_v35 = vpop.f32.mrb[89].mxu0 }
 0x1dd   :  { %v944_v37 = vpop.f32.mrb[90].mxu0 }
 0x1de   :  { %v5851_v0 = vpop.permute.xlu0 %1645  ;;  %2609 = vrot.lane.b32.xlu1 %v1368_v17, %s5216_s17  ;;  %1242 = vst.msk [vmem:[#allocation3 + $0x168] sm:$0xff] %vm1196_vm1, %v944_v37  ;;  %v946_v49 = vpop.f32.mrb[91].mxu0 }
 0x1e0   :  { %v5855_v43 = vpop.permute.xlu1 %1405  ;;  %2799 = vrot.lane.b32.xlu0 %v1559_v29, %s5220_s21 }
 0x1e2   :  { %v5858_v46 = vpop.permute.xlu0 %2791  ;;  %2036 = vrot.lane.b32.xlu1 %v1368_v17, %s5213_s1  ;;  %v1344_v17 = vld [vmem:[#allocation3 + $0xa8] sm:$0xff] }
 0x1e3   :  { %7045 = vst [vmem:[#allocation30_spill] sm:$0xff] %v5858_v46  ;;  %v949_v54 = vpop.f32.mrb[92].mxu0 }
 0x1e4   :  { %v5861_v55 = vpop.permute.xlu1 %1647  ;;  %2226 = vrot.lane.b32.xlu0 %v1559_v29, %s5217_s18  ;;  %1243 = vst.msk [vmem:[#allocation3 + $0x170] sm:$0xff] %vm1196_vm1, %v949_v54  ;;  %v951_v56 = vpop.f32.mrb[93].mxu0  ;;  %v1535_v54 = vld [vmem:[#allocation3 + $0xa1] sm:$0xff] }
 0x1e5   :  { %v952_v34 = vpop.f32.mrb[94].mxu0 }
 0x1e6   :  { %v5865_v62 = vpop.permute.xlu0 %2218  ;;  %1655 = vrot.lane.b32.xlu1 %v1560_v58, %s5219_s20  ;;  %v954_v63 = vpop.f32.mrb[95].mxu0 }
 0x1e8   :  { %v5868_v2 = vpop.permute.xlu1 %2793  ;;  %1413 = vrot.lane.b32.xlu0 %v1343_v40, %s5215_s16 }
 0x1e9   :  { %7046 = vst [vmem:[#allocation31_spill] sm:$0xff] %v5868_v2  ;;  %v1753_v2 = vld [vmem:[#allocation3 + $0x317] sm:$0xff] }
 0x1ea   :  { %v5871_v3 = vpop.permute.xlu0 %1786  ;;  %2801 = vrot.lane.b32.xlu1 %v1560_v58, %s5220_s21 }
 0x1eb   :  { %v957_v5 = vpop.f32.mrb[96].mxu0 }
 0x1ec   :  { %v5876_v7 = vpop.permute.xlu1 %2220  ;;  %2367 = vrot.lane.b32.xlu0 %v5874_v4, %s5218_s19  ;;  %v959_v10 = vpop.f32.mrb[97].mxu0 }
 0x1ed   :  { %v960_v59 = vpop.f32.mrb[98].mxu0 }
 0x1ee   :  { %v5880_v12 = vpop.permute.xlu0 %1978  ;;  %2228 = vrot.lane.b32.xlu1 %v1560_v58, %s5217_s18  ;;  %1246 = vst.msk [vmem:[#allocation3 + $0x188] sm:$0xff] %vm1196_vm1, %v960_v59  ;;  %v962_v13 = vpop.f32.mrb[99].mxu0 }
 0x1f0   :  { %v5884_v15 = vpop.permute.xlu1 %1407  ;;  %1794 = vrot.lane.b32.xlu0 %v5874_v4, %s5214_s15 }
 0x1f2   :  { %v5888_v19 = vpop.permute.xlu0 %1597  ;;  %1415 = vrot.lane.b32.xlu1 %v1344_v17, %s5215_s16 }
 0x1f3   :  { %v965_v21 = vpop.f32.mrb[100].mxu0 }
 0x1f4   :  { %v5891_v22 = vpop.permute.xlu1 %1788  ;;  %2559 = vrot.lane.b32.xlu0 %v1343_v40, %s5216_s17  ;;  %1247 = vst.msk [vmem:[#allocation3 + $0x190] sm:$0xff] %vm1196_vm1, %v965_v21  ;;  %v967_v23 = vpop.f32.mrb[101].mxu0 }
 0x1f5   :  { %v968_v29 = vpop.f32.mrb[102].mxu0 }
 0x1f6   :  { %v5897_v31 = vpop.permute.xlu0 %2170  ;;  %2369 = vrot.lane.b32.xlu1 %v5895_v47, %s5218_s19  ;;  %1248 = vst.msk [vmem:[#allocation3 + $0x198] sm:$0xff] %vm1196_vm1, %v968_v29  ;;  %v970_v35 = vpop.f32.mrb[103].mxu0  ;;  %v1536_v29 = vld [vmem:[#allocation3 + $0xa9] sm:$0xff] }
 0x1f8   :  { %v5902_v37 = vpop.permute.xlu1 %1980  ;;  %1986 = vrot.lane.b32.xlu0 %v1343_v40, %s5213_s1 }
 0x1fa   :  { %v5905_v49 = vpop.permute.xlu0 %1838  ;;  %1796 = vrot.lane.b32.xlu1 %v5895_v47, %s5214_s15 }
 0x1fb   :  { %7047 = vst [vmem:[#allocation32_spill] sm:$0xff] %v5905_v49  ;;  %v973_v56 = vpop.f32.mrb[104].mxu0 }
 0x1fc   :  { %v5909_v58 = vpop.permute.xlu1 %1599  ;;  %1605 = vrot.lane.b32.xlu0 %v1535_v54, %s5219_s20  ;;  %1249 = vst.msk [vmem:[#allocation3 + $0x1a0] sm:$0xff] %vm1196_vm1, %v973_v56  ;;  %v975_v34 = vpop.f32.mrb[105].mxu0 }
 0x1fd   :  { %v976_v63 = vpop.f32.mrb[106].mxu0 }
 0x1fe   :  { %v5913_v5 = vpop.permute.xlu0 %2030  ;;  %2561 = vrot.lane.b32.xlu1 %v1344_v17, %s5216_s17  ;;  %v978_v40 = vpop.f32.mrb[107].mxu0  ;;  %v1752_v63 = vld [vmem:[#allocation3 + $0x30f] sm:$0xff] }
 0x1ff   :  { %7048 = vst [vmem:[#allocation33_spill] sm:$0xff] %v5913_v5  ;;  %v1306_v5 = vld [vmem:[#allocation3 + $0x17] sm:$0xff] }
 0x200   :  { %v5916_v10 = vpop.permute.xlu1 %2172  ;;  %2751 = vrot.lane.b32.xlu0 %v1535_v54, %s5220_s21 }
 0x202   :  { %v5919_v59 = vpop.permute.xlu0 %1457  ;;  %1988 = vrot.lane.b32.xlu1 %v1344_v17, %s5213_s1 }
 0x203   :  { %7049 = vst [vmem:[#allocation34_spill] sm:$0xff] %v5919_v59  ;;  %v981_v13 = vpop.f32.mrb[108].mxu0 }
 0x204   :  { %v5922_v21 = vpop.permute.xlu1 %1840  ;;  %2178 = vrot.lane.b32.xlu0 %v1535_v54, %s5217_s18  ;;  %v983_v23 = vpop.f32.mrb[109].mxu0  ;;  %v1944_v54 = vld [vmem:[#allocation3 + $0x310] sm:$0xff] }
 0x205   :  { %7050 = vst [vmem:[#allocation35_spill] sm:$0xff] %v5922_v21  ;;  %v984_v35 = vpop.f32.mrb[110].mxu0 }
 0x206   :  { %v5925_v56 = vpop.permute.xlu0 %2411  ;;  %1607 = vrot.lane.b32.xlu1 %v1536_v29, %s5219_s20  ;;  %1252 = vst.msk [vmem:[#allocation3 + $0x1b8] sm:$0xff] %vm1196_vm1, %v984_v35  ;;  %v986_v34 = vpop.f32.mrb[111].mxu0 }
 0x208   :  { %v5929_v40 = vpop.permute.xlu1 %2032  ;;  %1846 = vrot.lane.b32.xlu0 %v1752_v63, %s5214_s15 }
 0x209   :  { %7051 = vst [vmem:[#allocation36_spill] sm:$0xff] %v5929_v40  ;;  %v1347_v40 = vld [vmem:[#allocation3 + $0x100] sm:$0xff] }
 0x20a   :  { %v5932_v17 = vpop.permute.xlu0 %2603  ;;  %2753 = vrot.lane.b32.xlu1 %v1536_v29, %s5220_s21 }
 0x20b   :  { %v989_v13 = vpop.f32.mrb[112].mxu0 }
 0x20c   :  { %v5935_v23 = vpop.permute.xlu1 %1459  ;;  %2038 = vrot.lane.b32.xlu0 %v1944_v54, %s5213_s1  ;;  %1253 = vst.msk [vmem:[#allocation3 + $0x1c0] sm:$0xff] %vm1196_vm1, %v989_v13  ;;  %v991_v1 = vpop.f32.mrb[113].mxu0  ;;  %v5949_v54 = vld [vmem:[#allocation3 + $0xcf] sm:$0xff] }
 0x20d   :  { %7052 = vst [vmem:[#allocation37_spill] sm:$0xff] %v5935_v23  ;;  %v992_v35 = vpop.f32.mrb[114].mxu0 }
 0x20e   :  { %v5939_v34 = vpop.permute.xlu0 %2222  ;;  %2180 = vrot.lane.b32.xlu1 %v1536_v29, %s5217_s18  ;;  %1254 = vst.msk [vmem:[#allocation3 + $0x1c8] sm:$0xff] %vm1196_vm1, %v992_v35  ;;  %v994_v63 = vpop.f32.mrb[115].mxu0  ;;  %v1945_v35 = vld [vmem:[#allocation3 + $0x318] sm:$0xff] }
 0x20f   :  { %7053 = vst [vmem:[#allocation38_spill] sm:$0xff] %v5939_v34 }
 0x210   :  { %v5943_v46 = vpop.permute.xlu1 %2413  ;;  %2230 = vrot.lane.b32.xlu0 %v2136_v52, %s5217_s18 }
 0x212   :  { %v5946_v23 = vpop.permute.xlu0 %1649  ;;  %1848 = vrot.lane.b32.xlu1 %v1753_v2, %s5214_s15  ;;  %v4950_v2 = vld [vmem:[%s7023_s3] sm:$0x1f]   ;;  %s5228_s3 = smov 50  }
 0x213   :  { %7054 = vst [vmem:[#allocation39_spill] sm:$0xff] %v5946_v23  ;;  %v997_v1 = vpop.f32.mrb[116].mxu0  ;;  %v1920_v23 = vld [vmem:[#allocation3 + $0xd0] sm:$0xff]  ;;  %4877 = vmatprep.subr.msk.bf16.mxu1 %vm3185_vm2, %v4950_v2 }
 0x214   :  { %v5951_v13 = vpop.permute.xlu1 %2605  ;;  %1798 = vrot.lane.b32.xlu0 %v5949_v54, %s5214_s15  ;;  %1255 = vst.msk [vmem:[#allocation3 + $0x1d0] sm:$0xff] %vm1196_vm1, %v997_v1  ;;  %v999_v29 = vpop.f32.mrb[117].mxu0  ;;  %v3187_v1 = vsel %vm3185_vm2, %v4950_v2, 0 }
 0x215   :  { %v1000_v63 = vpop.f32.mrb[118].mxu0  ;;  %4758 = vmatpush3.bf16.msra.mxu1 %v3187_v1 }
 0x216   :  { %v5956_v45 = vpop.permute.xlu0 %2795  ;;  %2040 = vrot.lane.b32.xlu1 %v1945_v35, %s5213_s1  ;;  %v1002_v52 = vpop.f32.mrb[119].mxu0 }
 0x217   :  { %7055 = vst [vmem:[#allocation40_spill] sm:$0xff] %v5956_v45 }
 0x218   :  { %v5962_v59 = vpop.permute.xlu1 %2224  ;;  %1990 = vrot.lane.b32.xlu0 %v1920_v23, %s5213_s1 }
 0x219   :  { %7056 = vst [vmem:[#allocation41_spill] sm:$0xff] %v5962_v59 }
 0x21a   :  { %v5965_v29 = vpop.permute.xlu0 %1790  ;;  %2232 = vrot.lane.b32.xlu1 %v2137_v53, %s5217_s18  ;;  %v1921_v53 = vld [vmem:[#allocation3 + $0xd8] sm:$0xff] }
 0x21b   :  { %v1005_v35 = vpop.f32.mrb[120].mxu0 }
 0x21c   :  { %v5968_v63 = vpop.permute.xlu1 %1651  ;;  %1417 = vrot.lane.b32.xlu0 %v1920_v23, %s5215_s16  ;;  %v1007_v52 = vpop.f32.mrb[121].mxu0 }
 0x21d   :  { %7057 = vst [vmem:[#allocation42_spill] sm:$0xff] %v5968_v63  ;;  %v1008_v27 = vpop.f32.mrb[122].mxu0 }
 0x21e   :  { %v5973_v32 = vpop.permute.xlu0 %1982  ;;  %1800 = vrot.lane.b32.xlu1 %v5971_v24, %s5214_s15  ;;  %1258 = vst.msk [vmem:[#allocation3 + $0x1e8] sm:$0xff] %vm1196_vm1, %v1008_v27  ;;  %v1010_v2 = vpop.f32.mrb[123].mxu0 }
 0x220   :  { %v5978_v14 = vpop.permute.xlu1 %2797  ;;  %2371 = vrot.lane.b32.xlu0 %v5949_v54, %s5218_s19 }
 0x221   :  { %7058 = vst [vmem:[#allocation43_spill] sm:$0xff] %v5978_v14 }
 0x222   :  { %v5982_v1 = vpop.permute.xlu0 %1409  ;;  %1992 = vrot.lane.b32.xlu1 %v1921_v53, %s5213_s1 }
 0x223   :  { %v1013_v35 = vpop.f32.mrb[124].mxu0 }
 0x224   :  { %v5985_v52 = vpop.permute.xlu1 %1792  ;;  %2563 = vrot.lane.b32.xlu0 %v1920_v23, %s5216_s17  ;;  %1259 = vst.msk [vmem:[#allocation3 + $0x1f0] sm:$0xff] %vm1196_vm1, %v1013_v35  ;;  %v1015_v63 = vpop.f32.mrb[125].mxu0  ;;  %v1689_v23 = vadd.f32 %v5811_v6, %v1497_v28  ;;  %v2113_v6 = vld [vmem:[#allocation3 + $0xd9] sm:$0xff] }
 0x225   :  { %v1016_v27 = vpop.f32.mrb[126].mxu0 }
 0x226   :  { %v2364_v2 = vpop.permute.xlu0 %2363  ;;  %1419 = vrot.lane.b32.xlu1 %v1921_v53, %s5215_s16  ;;  %1260 = vst.msk [vmem:[#allocation3 + $0x1f8] sm:$0xff] %vm1196_vm1, %v1016_v27  ;;  %v1018_v16 = vpop.f32.mrb[127].mxu0  ;;  %v1882_v27 = vadd.f32 %v5871_v3, %v1689_v23 }
 0x228   :  { %v5991_v25 = vpop.permute.xlu1 %1984  ;;  %2182 = vrot.lane.b32.xlu0 %v2112_v42, %s5217_s18  ;;  %v2074_v41 = vadd.f32 %v5880_v12, %v1882_v27 }
 0x22a   :  { %v2556_v34 = vpop.permute.xlu0 %2555  ;;  %2373 = vrot.lane.b32.xlu1 %v5971_v24, %s5218_s19  ;;  %v2266_v28 = vadd.f32 %v5897_v31, %v2074_v41 }
 0x22b   :  { %v1021_v63 = vpop.f32.mrb[128].mxu0 }
 0x22c   :  { %v5998_v35 = vpop.permute.xlu1 %1411  ;;  %1609 = vrot.lane.b32.xlu0 %v2112_v42, %s5219_s20  ;;  %1261 = vst.msk [vmem:[#allocation3 + $0x200] sm:$0xff] %vm1196_vm1, %v1021_v63  ;;  %v1023_v16 = vpop.f32.mrb[129].mxu0  ;;  %v2459_v3 = vadd.f32 %v2364_v2, %v2266_v28 }
 0x22d   :  { %v1024_v50 = vpop.f32.mrb[130].mxu0 }
 0x22e   :  { %v6003_v59 = vpop.permute.xlu0 %2174  ;;  %2565 = vrot.lane.b32.xlu1 %v1921_v53, %s5216_s17  ;;  %v1026_v57 = vpop.f32.mrb[131].mxu0  ;;  %v1498_v50 = vadd.f32 %v5802_v61, %v1306_v5  ;;  %v6018_v61 = vld [vmem:[#allocation3 + $0xff] sm:$0xff] }
 0x230   :  { %v2366_v45 = vpop.permute.xlu1 %2365  ;;  %2755 = vrot.lane.b32.xlu0 %v2112_v42, %s5220_s21  ;;  %v1690_v16 = vadd.f32 %v5815_v8, %v1498_v50  ;;  %v2651_v42 = vadd.f32 %v2556_v34, %v2459_v3  ;;  %v6028_v34 = vld [vmem:[%s7022_s2] ss:$0 sm:$0xff] }
 0x232   :  { %v6009_v63 = vpop.permute.xlu0 %1601  ;;  %2184 = vrot.lane.b32.xlu1 %v2113_v6, %s5217_s18  ;;  %v1883_v41 = vadd.f32 %v5891_v22, %v1690_v16 }
 0x233   :  { %v1029_v23 = vpop.f32.mrb[132].mxu0 }
 0x234   :  { %v2558_v53 = vpop.permute.xlu1 %2557  ;;  %1421 = vrot.lane.b32.xlu0 %v1347_v40, %s5215_s16  ;;  %v1031_v12 = vpop.f32.mrb[133].mxu0  ;;  %v2075_v8 = vadd.f32 %v5902_v37, %v1883_v41 }
 0x235   :  { %v1032_v27 = vpop.f32.mrb[134].mxu0  ;;  %v1348_v12 = vld [vmem:[#allocation3 + $0x108] sm:$0xff] }
 0x236   :  { %v2748_v31 = vpop.permute.xlu0 %2747  ;;  %1611 = vrot.lane.b32.xlu1 %v2113_v6, %s5219_s20  ;;  %1264 = vst.msk [vmem:[#allocation3 + $0x218] sm:$0xff] %vm1196_vm1, %v1032_v27  ;;  %v1034_v57 = vpop.f32.mrb[135].mxu0  ;;  %v2267_v22 = vadd.f32 %v5916_v10, %v2075_v8 }
 0x237   :  { %v2843_v14 = vadd.f32 %v2748_v31, %v2651_v42  ;;  %v6045_v57 = vld [vmem:[#allocation3 + $0x107] sm:$0xff] }
 0x238   :  { %v6020_v5 = vpop.permute.xlu1 %2176  ;;  %2375 = vrot.lane.b32.xlu0 %v6018_v61, %s5218_s19  ;;  %v2460_v23 = vadd.f32 %v2366_v45, %v2267_v22 }
 0x239   :  { %v2882_v2 = vadd.f32 %v6028_v34, %v2843_v14 }
 0x23a   :  { %v6031_v28 = vpop.permute.xlu0 %1461  ;;  %2757 = vrot.lane.b32.xlu1 %v2113_v6, %s5220_s21  ;;  %v2652_v6 = vadd.f32 %v2558_v53, %v2460_v23 }
 0x23b   :  { %7059 = vst [vmem:[#allocation44_spill] sm:$0xff] %v6031_v28  ;;  %v1037_v50 = vpop.f32.mrb[136].mxu0  ;;  %v4617_v42 = vmul.f32 -1.442695, %v2882_v2  ;;  %v1499_v28 = vadd.f32 %v5701_v38, %v5855_v43 }
 0x23c   :  { %v6035_v3 = vpop.permute.xlu1 %1603  ;;  %1802 = vrot.lane.b32.xlu0 %v6018_v61, %s5214_s15  ;;  %1265 = vst.msk [vmem:[#allocation3 + $0x220] sm:$0xff] %vm1196_vm1, %v1037_v50  ;;  %v1039_v37 = vpop.f32.mrb[137].mxu0 }
 0x23d   :  { %v1040_v16 = vpop.f32.mrb[138].mxu0  ;;  %4958 = vpow2.f32 %v4617_v42 }
 0x23e   :  { %v6040_v14 = vpop.permute.xlu0 %2415  ;;  %1423 = vrot.lane.b32.xlu1 %v1348_v12, %s5215_s16  ;;  %1266 = vst.msk [vmem:[#allocation3 + $0x228] sm:$0xff] %vm1196_vm1, %v1040_v16  ;;  %v1042_v10 = vpop.f32.mrb[139].mxu0  ;;  %v1539_v16 = vld [vmem:[#allocation3 + $0x101] sm:$0xff] }
 0x23f   :  { %7060 = vst [vmem:[#allocation45_spill] sm:$0xff] %v6040_v14 }
 0x240   :  { %v2750_v27 = vpop.permute.xlu1 %2749  ;;  %2567 = vrot.lane.b32.xlu0 %v1347_v40, %s5216_s17 }
 0x241   :  { %v2844_v31 = vadd.f32 %v2750_v27, %v2652_v6 }
 0x242   :  { %v6047_v41 = vpop.permute.xlu0 %1842  ;;  %2377 = vrot.lane.b32.xlu1 %v6045_v57, %s5218_s19 }
 0x243   :  { %7061 = vst [vmem:[#allocation46_spill] sm:$0xff] %v6047_v41  ;;  %v2883_v45 = vadd.f32 %v6028_v34, %v2844_v31  ;;  %v1045_v8 = vpop.f32.mrb[140].mxu0 }
 0x244   :  { %v6052_v2 = vpop.permute.xlu1 %1463  ;;  %1994 = vrot.lane.b32.xlu0 %v1347_v40, %s5213_s1  ;;  %1267 = vst.msk [vmem:[#allocation3 + $0x230] sm:$0xff] %vm1196_vm1, %v1045_v8  ;;  %v1047_v53 = vpop.f32.mrb[141].mxu0 }
 0x245   :  { %7062 = vst [vmem:[#allocation47_spill] sm:$0xff] %v6052_v2  ;;  %v4618_v22 = vmul.f32 -1.442695, %v2883_v45  ;;  %v1048_v50 = vpop.f32.mrb[142].mxu0 }
 0x246   :  { %v6056_v37 = vpop.permute.xlu0 %2607  ;;  %1804 = vrot.lane.b32.xlu1 %v6045_v57, %s5214_s15  ;;  %v1050_v23 = vpop.f32.mrb[143].mxu0 }
 0x247   :  { %7063 = vst [vmem:[#allocation48_spill] sm:$0xff] %v6056_v37  ;;  %4960 = vpow2.f32 %v4618_v22  ;;  %v4959_v6 = vpop.eup %4958 }
 0x248   :  { %v6060_v42 = vpop.permute.xlu1 %2417  ;;  %1613 = vrot.lane.b32.xlu0 %v1539_v16, %s5219_s20  ;;  %v3010_v22 = vadd.f32 1.0, %v4959_v6 }
 0x249   :  { %7064 = vst [vmem:[#allocation49_spill] sm:$0xff] %v6060_v42 }
 0x24a   :  { %v6063_v10 = vpop.permute.xlu0 %2034  ;;  %2569 = vrot.lane.b32.xlu1 %v1348_v12, %s5216_s17  ;;  %4962 = vrcp.f32 %v3010_v22 }
 0x24b   :  { %7065 = vst [vmem:[#allocation50_spill] sm:$0xff] %v6063_v10  ;;  %v1053_v40 = vpop.f32.mrb[144].mxu0 }
 0x24c   :  { %v6066_v27 = vpop.permute.xlu1 %1844  ;;  %2759 = vrot.lane.b32.xlu0 %v1539_v16, %s5220_s21  ;;  %v1055_v31 = vpop.f32.mrb[145].mxu0  ;;  %v1540_v40 = vld [vmem:[#allocation3 + $0x109] sm:$0xff] }
 0x24d   :  { %7066 = vst [vmem:[#allocation51_spill] sm:$0xff] %v6066_v27  ;;  %v1056_v45 = vpop.f32.mrb[146].mxu0  ;;  %v6079_v31 = vld [vmem:[#allocation3 + $0x12f] sm:$0xff] }
 0x24e   :  { %1270 = vst.msk [vmem:[#allocation3 + $0x248] sm:$0xff] %vm1196_vm1, %v1056_v45  ;;  %v6070_v8 = vpop.permute.xlu0 %1653  ;;  %1996 = vrot.lane.b32.xlu1 %v1348_v12, %s5213_s1  ;;  %v1058_v53 = vpop.f32.mrb[147].mxu0 }
 0x24f   :  { %7067 = vst [vmem:[#allocation52_spill] sm:$0xff] %v6070_v8 }
 0x250   :  { %v6073_v50 = vpop.permute.xlu1 %2609  ;;  %2186 = vrot.lane.b32.xlu0 %v1539_v16, %s5217_s18  ;;  %v1924_v16 = vld [vmem:[#allocation3 + $0x130] sm:$0xff] }
 0x251   :  { %7068 = vst [vmem:[#allocation53_spill] sm:$0xff] %v6073_v50  ;;  %v4961_v23 = vpop.eup %4960 }
 0x252   :  { %v3011_v2 = vadd.f32 1.0, %v4961_v23  ;;  %v6076_v27 = vpop.permute.xlu0 %2799  ;;  %1615 = vrot.lane.b32.xlu1 %v1540_v40, %s5219_s20  ;;  %v6097_v23 = vld [vmem:[#allocation3 + $0x137] sm:$0xff] }
 0x253   :  { %7069 = vst [vmem:[#allocation54_spill] sm:$0xff] %v6076_v27 }
 0x254   :  { %4964 = vrcp.f32 %v3011_v2  ;;  %v6081_v45 = vpop.permute.xlu1 %2036  ;;  %1806 = vrot.lane.b32.xlu0 %v6079_v31, %s5214_s15  ;;  %v4963_v2 = vpop.eup %4962 }
 0x255   :  { %7070 = vst [vmem:[#allocation55_spill] sm:$0xff] %v6081_v45 }
 0x256   :  { %v6085_v12 = vpop.permute.xlu0 %2226  ;;  %2761 = vrot.lane.b32.xlu1 %v1540_v40, %s5220_s21 }
 0x257   :  { %7071 = vst [vmem:[#allocation56_spill] sm:$0xff] %v6085_v12 }
 0x258   :  { %v6088_v6 = vpop.permute.xlu1 %1655  ;;  %1998 = vrot.lane.b32.xlu0 %v1924_v16, %s5213_s1 }
 0x259   :  { %7072 = vst [vmem:[#allocation57_spill] sm:$0xff] %v6088_v6 }
 0x25a   :  { %v6091_v53 = vpop.permute.xlu0 %1413  ;;  %2188 = vrot.lane.b32.xlu1 %v1540_v40, %s5217_s18  ;;  %v1925_v40 = vld [vmem:[#allocation3 + $0x138] sm:$0xff] }
 0x25c   :  { %v6094_v22 = vpop.permute.xlu1 %2801  ;;  %1425 = vrot.lane.b32.xlu0 %v1924_v16, %s5215_s16 }
 0x25d   :  { %7073 = vst [vmem:[#allocation58_spill] sm:$0xff] %v6094_v22  ;;  %v1351_v22 = vld [vmem:[#allocation3 + $0x160] sm:$0xff] }
 0x25e   :  { %v4965_v45 = vpop.eup %4964  ;;  %v2368_v12 = vpop.permute.xlu0 %2367  ;;  %1808 = vrot.lane.b32.xlu1 %v6097_v23, %s5214_s15 }
 0x25f   :  { %v3106_v6 = vpack.c.bf16 %v4965_v45, %v4963_v2  ;;  %v1691_v2 = vadd.f32 %v5888_v19, %v1499_v28  ;;  %v1500_v19 = vadd.f32 %v5713_v51, %v5884_v15 }
 0x260   :  { %v6101_v8 = vpop.permute.xlu1 %2228  ;;  %2379 = vrot.lane.b32.xlu0 %v6079_v31, %s5218_s19 }
 0x261   :  { %7074 = vst [vmem:[#allocation59_spill] sm:$0xff] %v6101_v8  ;;  %4759 = vmatprep.mubr.msk.bf16.mxu1 %vm3136_vm3, %v3106_v6  ;;  %v2116_v8 = vld [vmem:[#allocation3 + $0x131] sm:$0xff]  ;;  %v1884_v6 = vadd.f32 %v5965_v29, %v1691_v2  ;;  %v1692_v2 = vadd.f32 %v5909_v58, %v1500_v19 }
 0x262   :  { %v6106_v10 = vpop.permute.xlu0 %1794  ;;  %2000 = vrot.lane.b32.xlu1 %v1925_v40, %s5213_s1 }
 0x264   :  { %v6109_v41 = vpop.permute.xlu1 %1415  ;;  %2571 = vrot.lane.b32.xlu0 %v1924_v16, %s5216_s17  ;;  %v2076_v16 = vadd.f32 %v5973_v32, %v1884_v6  ;;  %v2117_v6 = vld [vmem:[#allocation3 + $0x139] sm:$0xff] }
 0x266   :  { %v2560_v45 = vpop.permute.xlu0 %2559  ;;  %1427 = vrot.lane.b32.xlu1 %v1925_v40, %s5215_s16  ;;  %v2268_v38 = vadd.f32 %v6003_v59, %v2076_v16  ;;  %v1885_v59 = vadd.f32 %v5985_v52, %v1692_v2 }
 0x268   :  { %v2370_v27 = vpop.permute.xlu1 %2369  ;;  %2190 = vrot.lane.b32.xlu0 %v2116_v8, %s5217_s18  ;;  %v2461_v29 = vadd.f32 %v2368_v12, %v2268_v38  ;;  %v2077_v51 = vadd.f32 %v5991_v25, %v1885_v59  ;;  %v6145_v12 = vld [vmem:[#allocation3 + $0x15f] sm:$0xff] }
 0x26a   :  { %v6118_v37 = vpop.permute.xlu0 %1986  ;;  %2381 = vrot.lane.b32.xlu1 %v6097_v23, %s5218_s19  ;;  %v2653_v32 = vadd.f32 %v2560_v45, %v2461_v29  ;;  %v2269_v58 = vadd.f32 %v6020_v5, %v2077_v51  ;;  %v1352_v5 = vld [vmem:[#allocation3 + $0x168] sm:$0xff] }
 0x26b   :  { %v1543_v51 = vld [vmem:[#allocation3 + $0x161] sm:$0xff] }
 0x26c   :  { %v6123_v14 = vpop.permute.xlu1 %1796  ;;  %1617 = vrot.lane.b32.xlu0 %v2116_v8, %s5219_s20  ;;  %v2462_v52 = vadd.f32 %v2370_v27, %v2269_v58 }
 0x26e   :  { %v6127_v43 = vpop.permute.xlu0 %1605  ;;  %2573 = vrot.lane.b32.xlu1 %v1925_v40, %s5216_s17 }
 0x270   :  { %v2562_v28 = vpop.permute.xlu1 %2561  ;;  %2763 = vrot.lane.b32.xlu0 %v2116_v8, %s5220_s21 }
 0x271   :  { %v2654_v25 = vadd.f32 %v2562_v28, %v2462_v52 }
 0x272   :  { %v2752_v50 = vpop.permute.xlu0 %2751  ;;  %2192 = vrot.lane.b32.xlu1 %v2117_v6, %s5217_s18 }
 0x273   :  { %v2845_v16 = vadd.f32 %v2752_v50, %v2653_v32 }
 0x274   :  { %v6136_v42 = vpop.permute.xlu1 %1988  ;;  %1429 = vrot.lane.b32.xlu0 %v1351_v22, %s5215_s16 }
 0x275   :  { %v2884_v15 = vadd.f32 %v6028_v34, %v2845_v16 }
 0x276   :  { %v6141_v8 = vpop.permute.xlu0 %2178  ;;  %1619 = vrot.lane.b32.xlu1 %v2117_v6, %s5219_s20 }
 0x277   :  { %v4619_v50 = vmul.f32 -1.442695, %v2884_v15 }
 0x278   :  { %v6147_v40 = vpop.permute.xlu1 %1607  ;;  %2383 = vrot.lane.b32.xlu0 %v6145_v12, %s5218_s19 }
 0x279   :  { %4966 = vpow2.f32 %v4619_v50 }
 0x27a   :  { %v6151_v45 = vpop.permute.xlu0 %1846  ;;  %2765 = vrot.lane.b32.xlu1 %v2117_v6, %s5220_s21  ;;  %v6163_v6 = vld [vmem:[#allocation3 + $0x167] sm:$0xff] }
 0x27b   :  { %7075 = vst [vmem:[#allocation60_spill] sm:$0xff] %v6151_v45 }
 0x27c   :  { %v2754_v38 = vpop.permute.xlu1 %2753  ;;  %1810 = vrot.lane.b32.xlu0 %v6145_v12, %s5214_s15 }
 0x27d   :  { %v2846_v19 = vadd.f32 %v2754_v38, %v2654_v25  ;;  %v1173_v25 = vpop.f32.mrb[56].mxu1 }
 0x27e   :  { %v6156_v29 = vpop.permute.xlu0 %2038  ;;  %1431 = vrot.lane.b32.xlu1 %v1352_v5, %s5215_s16 }
 0x27f   :  { %7076 = vst [vmem:[#allocation61_spill] sm:$0xff] %v6156_v29  ;;  %v2885_v2 = vadd.f32 %v6028_v34, %v2846_v19 }
 0x280   :  { %v6160_v27 = vpop.permute.xlu1 %2180  ;;  %2575 = vrot.lane.b32.xlu0 %v1351_v22, %s5216_s17 }
 0x281   :  { %v4620_v32 = vmul.f32 -1.442695, %v2885_v2 }
 0x282   :  { %v6165_v28 = vpop.permute.xlu0 %2230  ;;  %2385 = vrot.lane.b32.xlu1 %v6163_v6, %s5218_s19 }
 0x283   :  { %7077 = vst [vmem:[#allocation62_spill] sm:$0xff] %v6165_v28  ;;  %4968 = vpow2.f32 %v4620_v32  ;;  %v4967_v15 = vpop.eup %4966 }
 0x284   :  { %v6169_v59 = vpop.permute.xlu1 %1848  ;;  %2002 = vrot.lane.b32.xlu0 %v1351_v22, %s5213_s1  ;;  %v3012_v50 = vadd.f32 1.0, %v4967_v15  ;;  %v1175_v22 = vpop.f32.mrb[57].mxu1 }
 0x285   :  { %7078 = vst [vmem:[#allocation63_spill] sm:$0xff] %v6169_v59  ;;  %v1176_v2 = vpop.f32.mrb[58].mxu1  ;;  %v1544_v22 = vld [vmem:[#allocation3 + $0x169] sm:$0xff] }
 0x286   :  { %v6172_v16 = vpop.permute.xlu0 %1798  ;;  %1812 = vrot.lane.b32.xlu1 %v6163_v6, %s5214_s15  ;;  %1300 = vst.msk [vmem:[#allocation3 + $0x338] sm:$0xff] %vm1196_vm1, %v1176_v2  ;;  %4970 = vrcp.f32 %v3012_v50 }
 0x288   :  { %v6176_v58 = vpop.permute.xlu1 %2040  ;;  %1621 = vrot.lane.b32.xlu0 %v1543_v51, %s5219_s20 }
 0x289   :  { %7079 = vst [vmem:[#allocation64_spill] sm:$0xff] %v6176_v58  ;;  %v1178_v58 = vpop.f32.mrb[59].mxu1 }
 0x28a   :  { %v6179_v52 = vpop.permute.xlu0 %1990  ;;  %2577 = vrot.lane.b32.xlu1 %v1352_v5, %s5216_s17  ;;  %v1181_v59 = vpop.f32.mrb[60].mxu1  ;;  %v1501_v58 = vadd.f32 %v5747_v48, %v5982_v1 }
 0x28b   :  { %1301 = vst.msk [vmem:[#allocation3 + $0x340] sm:$0xff] %vm1196_vm1, %v1181_v59  ;;  %v1183_v25 = vpop.f32.mrb[61].mxu1 }
 0x28c   :  { %v6182_v38 = vpop.permute.xlu1 %2232  ;;  %2767 = vrot.lane.b32.xlu0 %v1543_v51, %s5220_s21  ;;  %v1184_v50 = vpop.f32.mrb[62].mxu1 }
 0x28d   :  { %7080 = vst [vmem:[#allocation65_spill] sm:$0xff] %v6182_v38  ;;  %v4969_v19 = vpop.eup %4968  ;;  %1302 = vst.msk [vmem:[#allocation3 + $0x348] sm:$0xff] %vm1196_vm1, %v1184_v50  ;;  %v1186_v59 = vpop.f32.mrb[63].mxu1 }
 0x28e   :  { %v3013_v32 = vadd.f32 1.0, %v4969_v19  ;;  %v6185_v28 = vpop.permute.xlu0 %1417  ;;  %2004 = vrot.lane.b32.xlu1 %v1352_v5, %s5213_s1  ;;  %v6194_v19 = vld [vmem:[#allocation3 + $0x18f] sm:$0xff]  ;;  %v1189_v25 = vpop.f32.mrb[64].mxu1 }
 0x28f   :  { %1303 = vst.msk [vmem:[#allocation3 + $0x350] sm:$0xff] %vm1196_vm1, %v1189_v25  ;;  %v1191_v45 = vpop.f32.mrb[65].mxu1  ;;  %v6217_v25 = vld [vmem:[#allocation3 + $0x197] sm:$0xff] }
 0x290   :  { %4972 = vrcp.f32 %v3013_v32  ;;  %v6189_v15 = vpop.permute.xlu1 %1800  ;;  %2194 = vrot.lane.b32.xlu0 %v1543_v51, %s5217_s18  ;;  %v1693_v51 = vadd.f32 %v6009_v63, %v1501_v58  ;;  %v1928_v32 = vld [vmem:[#allocation3 + $0x190] sm:$0xff]  ;;  %v4971_v21 = vpop.eup %4970 }
 0x292   :  { %v2372_v38 = vpop.permute.xlu0 %2371  ;;  %1623 = vrot.lane.b32.xlu1 %v1544_v22, %s5219_s20  ;;  %v1886_v48 = vadd.f32 %v6106_v10, %v1693_v51  ;;  %v1502_v10 = vadd.f32 %v5767_v39, %v5998_v35  ;;  %v1929_v51 = vld [vmem:[#allocation3 + $0x198] sm:$0xff] }
 0x294   :  { %v6196_v5 = vpop.permute.xlu1 %1992  ;;  %1814 = vrot.lane.b32.xlu0 %v6194_v19, %s5214_s15  ;;  %v2078_v50 = vadd.f32 %v6118_v37, %v1886_v48 }
 0x296   :  { %v2564_v2 = vpop.permute.xlu0 %2563  ;;  %2769 = vrot.lane.b32.xlu1 %v1544_v22, %s5220_s21  ;;  %v2270_v59 = vadd.f32 %v6141_v8, %v2078_v50 }
 0x298   :  { %v6205_v29 = vpop.permute.xlu1 %1419  ;;  %2006 = vrot.lane.b32.xlu0 %v1928_v32, %s5213_s1 }
 0x29a   :  { %v4973_v1 = vpop.eup %4972  ;;  %v6210_v49 = vpop.permute.xlu0 %2182  ;;  %2196 = vrot.lane.b32.xlu1 %v1544_v22, %s5217_s18  ;;  %v2463_v22 = vadd.f32 %v2372_v38, %v2270_v59 }
 0x29b   :  { %v3107_v63 = vpack.c.bf16 %v4973_v1, %v4971_v21  ;;  %v1694_v21 = vadd.f32 %v6035_v3, %v1502_v10 }
 0x29c   :  { %v2374_v58 = vpop.permute.xlu1 %2373  ;;  %1433 = vrot.lane.b32.xlu0 %v1928_v32, %s5215_s16  ;;  %v2655_v8 = vadd.f32 %v2564_v2, %v2463_v22  ;;  %v2120_v2 = vld [vmem:[#allocation3 + $0x191] sm:$0xff] }
 0x29d   :  { %4760 = vmatmul.mubr.msk.bf16.vlgmr.msra.gmra.mrb[68].mxu1 %vm3136_vm3, %v3107_v63  ;;  %v1887_v1 = vadd.f32 %v6123_v14, %v1694_v21 }
 0x29e   :  { %v6219_v45 = vpop.permute.xlu0 %1609  ;;  %1816 = vrot.lane.b32.xlu1 %v6217_v25, %s5214_s15 }
 0x29f   :  { %v2079_v39 = vadd.f32 %v6136_v42, %v1887_v1  ;;  %v1192_v42 = vpop.f32.mrb[66].mxu1 }
 0x2a0   :  { %v2566_v37 = vpop.permute.xlu1 %2565  ;;  %2387 = vrot.lane.b32.xlu0 %v6194_v19, %s5218_s19  ;;  %v1194_v21 = vpop.f32.mrb[67].mxu1 }
 0x2a1   :  { %v2271_v3 = vadd.f32 %v6160_v27, %v2079_v39  ;;  %v2121_v39 = vld [vmem:[#allocation3 + $0x199] sm:$0xff] }
 0x2a2   :  { %v2756_v48 = vpop.permute.xlu0 %2755  ;;  %2008 = vrot.lane.b32.xlu1 %v1929_v51, %s5213_s1 }
 0x2a3   :  { %v2847_v50 = vadd.f32 %v2756_v48, %v2655_v8  ;;  %v2464_v14 = vadd.f32 %v2374_v58, %v2271_v3 }
 0x2a4   :  { %v6230_v63 = vpop.permute.xlu1 %2184  ;;  %2579 = vrot.lane.b32.xlu0 %v1928_v32, %s5216_s17 }
 0x2a5   :  { %v2886_v35 = vadd.f32 %v6028_v34, %v2847_v50  ;;  %v2656_v32 = vadd.f32 %v2566_v37, %v2464_v14  ;;  %v1503_v50 = vadd.f32 %v5874_v4, %v6091_v53  ;;  %v6262_v53 = vld [vmem:[#allocation3 + $0x1bf] sm:$0xff] }
 0x2a6   :  { %v6235_v38 = vpop.permute.xlu0 %1421  ;;  %1435 = vrot.lane.b32.xlu1 %v1929_v51, %s5215_s16 }
 0x2a7   :  { %v4621_v10 = vmul.f32 -1.442695, %v2886_v35  ;;  %v1355_v35 = vld [vmem:[#allocation3 + $0x1c0] sm:$0xff]  ;;  %v1695_v14 = vadd.f32 %v6127_v43, %v1503_v50 }
 0x2a8   :  { %v6239_v59 = vpop.permute.xlu1 %1611  ;;  %2198 = vrot.lane.b32.xlu0 %v2120_v2, %s5217_s18 }
 0x2a9   :  { %4974 = vpow2.f32 %v4621_v10 }
 0x2aa   :  { %v2376_v22 = vpop.permute.xlu0 %2375  ;;  %2389 = vrot.lane.b32.xlu1 %v6217_v25, %s5218_s19 }
 0x2ac   :  { %v2758_v8 = vpop.permute.xlu1 %2757  ;;  %1625 = vrot.lane.b32.xlu0 %v2120_v2, %s5219_s20 }
 0x2ad   :  { %v2848_v48 = vadd.f32 %v2758_v8, %v2656_v32 }
 0x2ae   :  { %v6245_v27 = vpop.permute.xlu0 %1802  ;;  %2581 = vrot.lane.b32.xlu1 %v1929_v51, %s5216_s17  ;;  %v1888_v51 = vadd.f32 %v6172_v16, %v1695_v14  ;;  %v1504_v16 = vadd.f32 %v5895_v47, %v6109_v41  ;;  %v1356_v14 = vld [vmem:[#allocation3 + $0x1c8] sm:$0xff] }
 0x2af   :  { %v2887_v1 = vadd.f32 %v6028_v34, %v2848_v48 }
 0x2b0   :  { %v6249_v58 = vpop.permute.xlu1 %1423  ;;  %2771 = vrot.lane.b32.xlu0 %v2120_v2, %s5220_s21  ;;  %v2080_v4 = vadd.f32 %v6179_v52, %v1888_v51  ;;  %v1696_v50 = vadd.f32 %v6147_v40, %v1504_v16 }
 0x2b1   :  { %v4622_v37 = vmul.f32 -1.442695, %v2887_v1 }
 0x2b2   :  { %v2568_v3 = vpop.permute.xlu0 %2567  ;;  %2200 = vrot.lane.b32.xlu1 %v2121_v39, %s5217_s18  ;;  %v2272_v43 = vadd.f32 %v6210_v49, %v2080_v4 }
 0x2b3   :  { %4976 = vpow2.f32 %v4622_v37  ;;  %v4975_v2 = vpop.eup %4974 }
 0x2b4   :  { %v2378_v10 = vpop.permute.xlu1 %2377  ;;  %1437 = vrot.lane.b32.xlu0 %v1355_v35, %s5215_s16  ;;  %v3014_v8 = vadd.f32 1.0, %v4975_v2  ;;  %v2465_v48 = vadd.f32 %v2376_v22, %v2272_v43  ;;  %v6283_v22 = vld [vmem:[#allocation3 + $0x1c7] sm:$0xff] }
 0x2b6   :  { %v6258_v42 = vpop.permute.xlu0 %1994  ;;  %1627 = vrot.lane.b32.xlu1 %v2121_v39, %s5219_s20  ;;  %v2657_v37 = vadd.f32 %v2568_v3, %v2465_v48  ;;  %4978 = vrcp.f32 %v3014_v8  ;;  %v1547_v48 = vld [vmem:[#allocation3 + $0x1c1] sm:$0xff] }
 0x2b8   :  { %v6264_v32 = vpop.permute.xlu1 %1804  ;;  %2391 = vrot.lane.b32.xlu0 %v6262_v53, %s5218_s19 }
 0x2ba   :  { %v6269_v21 = vpop.permute.xlu0 %1613  ;;  %2773 = vrot.lane.b32.xlu1 %v2121_v39, %s5220_s21  ;;  %v1889_v39 = vadd.f32 %v6189_v15, %v1696_v50 }
 0x2bc   :  { %v2570_v52 = vpop.permute.xlu1 %2569  ;;  %1818 = vrot.lane.b32.xlu0 %v6262_v53, %s5214_s15  ;;  %v2081_v41 = vadd.f32 %v6196_v5, %v1889_v39 }
 0x2bd   :  { %v4977_v1 = vpop.eup %4976 }
 0x2be   :  { %v3015_v51 = vadd.f32 1.0, %v4977_v1  ;;  %v2760_v49 = vpop.permute.xlu0 %2759  ;;  %1439 = vrot.lane.b32.xlu1 %v1356_v14, %s5215_s16  ;;  %v2273_v2 = vadd.f32 %v6230_v63, %v2081_v41  ;;  %v1548_v41 = vld [vmem:[#allocation3 + $0x1c9] sm:$0xff] }
 0x2bf   :  { %v2849_v4 = vadd.f32 %v2760_v49, %v2657_v37 }
 0x2c0   :  { %4980 = vrcp.f32 %v3015_v51  ;;  %v6279_v47 = vpop.permute.xlu1 %1996  ;;  %2583 = vrot.lane.b32.xlu0 %v1355_v35, %s5216_s17  ;;  %v2466_v43 = vadd.f32 %v2378_v10, %v2273_v2  ;;  %v4979_v50 = vpop.eup %4978  ;;  %v6310_v2 = vld [vmem:[#allocation3 + $0x1ef] sm:$0xff] }
 0x2c1   :  { %v2888_v40 = vadd.f32 %v6028_v34, %v2849_v4  ;;  %7081 = vst [vmem:[#allocation66_spill] sm:$0xff] %v6310_v2 }
 0x2c2   :  { %v2187_v3 = vpop.permute.xlu0 %2186  ;;  %2393 = vrot.lane.b32.xlu1 %v6283_v22, %s5218_s19  ;;  %v2658_v5 = vadd.f32 %v2570_v52, %v2466_v43 }
 0x2c3   :  { %v4623_v16 = vmul.f32 -1.442695, %v2888_v40 }
 0x2c4   :  { %v6289_v15 = vpop.permute.xlu1 %1615  ;;  %2010 = vrot.lane.b32.xlu0 %v1355_v35, %s5213_s1 }
 0x2c5   :  { %4982 = vpow2.f32 %v4623_v16 }
 0x2c6   :  { %v6292_v8 = vpop.permute.xlu0 %1806  ;;  %1820 = vrot.lane.b32.xlu1 %v6283_v22, %s5214_s15 }
 0x2c8   :  { %v2762_v1 = vpop.permute.xlu1 %2761  ;;  %1629 = vrot.lane.b32.xlu0 %v1547_v48, %s5219_s20 }
 0x2c9   :  { %v2850_v37 = vadd.f32 %v2762_v1, %v2658_v5 }
 0x2ca   :  { %v4981_v51 = vpop.eup %4980  ;;  %v6297_v63 = vpop.permute.xlu0 %1998  ;;  %2585 = vrot.lane.b32.xlu1 %v1356_v14, %s5216_s17 }
 0x2cb   :  { %v2889_v35 = vadd.f32 %v6028_v34, %v2850_v37  ;;  %v3108_v10 = vpack.c.bf16 %v4981_v51, %v4979_v50  ;;  %v1932_v50 = vld [vmem:[#allocation3 + $0x1f0] sm:$0xff] }
 0x2cc   :  { %v2189_v49 = vpop.permute.xlu1 %2188  ;;  %2775 = vrot.lane.b32.xlu0 %v1547_v48, %s5220_s21 }
 0x2cd   :  { %v4624_v39 = vmul.f32 -1.442695, %v2889_v35  ;;  %4763 = vmatprep.mubr.msk.bf16.mxu1 %vm3136_vm3, %v3108_v10 }
 0x2ce   :  { %v6303_v52 = vpop.permute.xlu0 %1425  ;;  %2012 = vrot.lane.b32.xlu1 %v1356_v14, %s5213_s1  ;;  %v1505_v14 = vadd.f32 %v5949_v54, %v6185_v28 }
 0x2cf   :  { %4984 = vpow2.f32 %v4624_v39  ;;  %v4983_v43 = vpop.eup %4982 }
 0x2d0   :  { %v6306_v4 = vpop.permute.xlu1 %1808  ;;  %2202 = vrot.lane.b32.xlu0 %v1547_v48, %s5217_s18  ;;  %v1697_v48 = vadd.f32 %v6219_v45, %v1505_v14  ;;  %v3016_v1 = vadd.f32 1.0, %v4983_v43  ;;  %v6329_v43 = vld [vmem:[#allocation3 + $0x1f7] sm:$0xff] }
 0x2d2   :  { %v2380_v40 = vpop.permute.xlu0 %2379  ;;  %1631 = vrot.lane.b32.xlu1 %v1548_v41, %s5219_s20  ;;  %v1890_v35 = vadd.f32 %v6245_v27, %v1697_v48  ;;  %4986 = vrcp.f32 %v3016_v1  ;;  %v1506_v27 = vadd.f32 %v5971_v24, %v6205_v29 }
 0x2d4   :  { %v6312_v16 = vpop.permute.xlu1 %2000  ;;  %1822 = vrot.lane.b32.xlu0 %v6310_v2, %s5214_s15  ;;  %v2082_v54 = vadd.f32 %v6258_v42, %v1890_v35  ;;  %v1698_v42 = vadd.f32 %v6239_v59, %v1506_v27 }
 0x2d6   :  { %v2572_v5 = vpop.permute.xlu0 %2571  ;;  %2777 = vrot.lane.b32.xlu1 %v1548_v41, %s5220_s21  ;;  %v2274_v45 = vadd.f32 %v2187_v3, %v2082_v54  ;;  %v1891_v35 = vadd.f32 %v6264_v32, %v1698_v42 }
 0x2d8   :  { %v6320_v37 = vpop.permute.xlu1 %1427  ;;  %2014 = vrot.lane.b32.xlu0 %v1932_v50, %s5213_s1  ;;  %v2467_v48 = vadd.f32 %v2380_v40, %v2274_v45  ;;  %v2083_v29 = vadd.f32 %v6279_v47, %v1891_v35 }
 0x2d9   :  { %v4985_v51 = vpop.eup %4984 }
 0x2da   :  { %v3017_v10 = vadd.f32 1.0, %v4985_v51  ;;  %v6324_v39 = vpop.permute.xlu0 %2190  ;;  %2204 = vrot.lane.b32.xlu1 %v1548_v41, %s5217_s18  ;;  %v2659_v1 = vadd.f32 %v2572_v5, %v2467_v48  ;;  %v1933_v51 = vld [vmem:[#allocation3 + $0x1f8] sm:$0xff]  ;;  %v2275_v59 = vadd.f32 %v2189_v49, %v2083_v29  ;;  %v1359_v29 = vld [vmem:[#allocation3 + $0x220] sm:$0xff] }
 0x2db   :  { %v2124_v5 = vld [vmem:[#allocation3 + $0x1f1] sm:$0xff] }
 0x2dc   :  { %4988 = vrcp.f32 %v3017_v10  ;;  %v2382_v28 = vpop.permute.xlu1 %2381  ;;  %1441 = vrot.lane.b32.xlu0 %v1932_v50, %s5215_s16  ;;  %v4987_v24 = vpop.eup %4986 }
 0x2dd   :  { %v2468_v32 = vadd.f32 %v2382_v28, %v2275_v59 }
 0x2de   :  { %v6331_v14 = vpop.permute.xlu0 %1617  ;;  %1824 = vrot.lane.b32.xlu1 %v6329_v43, %s5214_s15 }
 0x2e0   :  { %v2574_v41 = vpop.permute.xlu1 %2573  ;;  %2395 = vrot.lane.b32.xlu0 %v6310_v2, %s5218_s19 }
 0x2e1   :  { %v2660_v47 = vadd.f32 %v2574_v41, %v2468_v32  ;;  %v2125_v41 = vld [vmem:[#allocation3 + $0x1f9] sm:$0xff] }
 0x2e2   :  { %v2764_v3 = vpop.permute.xlu0 %2763  ;;  %2016 = vrot.lane.b32.xlu1 %v1933_v51, %s5213_s1 }
 0x2e3   :  { %v2851_v10 = vadd.f32 %v2764_v3, %v2659_v1 }
 0x2e4   :  { %v6342_v54 = vpop.permute.xlu1 %2192  ;;  %2587 = vrot.lane.b32.xlu0 %v1932_v50, %s5216_s17 }
 0x2e5   :  { %v2890_v45 = vadd.f32 %v6028_v34, %v2851_v10  ;;  %v1507_v10 = vadd.f32 %v6018_v61, %v6235_v38  ;;  %v6374_v38 = vld [vmem:[#allocation3 + $0x21f] sm:$0xff] }
 0x2e6   :  { %v4989_v40 = vpop.eup %4988  ;;  %v6347_v2 = vpop.permute.xlu0 %1429  ;;  %1443 = vrot.lane.b32.xlu1 %v1933_v51, %s5215_s16 }
 0x2e7   :  { %v3109_v27 = vpack.c.bf16 %v4989_v40, %v4987_v24  ;;  %v4625_v50 = vmul.f32 -1.442695, %v2890_v45  ;;  %v1699_v45 = vadd.f32 %v6269_v21, %v1507_v10 }
 0x2e8   :  { %v6350_v48 = vpop.permute.xlu1 %1619  ;;  %2206 = vrot.lane.b32.xlu0 %v2124_v5, %s5217_s18 }
 0x2e9   :  { %4764 = vmatmul.mubr.msk.bf16.gmra.mrb[72].mxu1 %vm3136_vm3, %v3109_v27  ;;  %4990 = vpow2.f32 %v4625_v50 }
 0x2ea   :  { %v2384_v42 = vpop.permute.xlu0 %2383  ;;  %2397 = vrot.lane.b32.xlu1 %v6329_v43, %s5218_s19 }
 0x2ec   :  { %v2766_v1 = vpop.permute.xlu1 %2765  ;;  %1633 = vrot.lane.b32.xlu0 %v2124_v5, %s5219_s20 }
 0x2ed   :  { %v2852_v3 = vadd.f32 %v2766_v1, %v2660_v47 }
 0x2ee   :  { %v6357_v49 = vpop.permute.xlu0 %1810  ;;  %2589 = vrot.lane.b32.xlu1 %v1933_v51, %s5216_s17  ;;  %v1892_v51 = vadd.f32 %v6292_v8, %v1699_v45  ;;  %v1508_v8 = vadd.f32 %v6045_v57, %v6249_v58 }
 0x2ef   :  { %v2891_v35 = vadd.f32 %v6028_v34, %v2852_v3 }
 0x2f0   :  { %v6361_v28 = vpop.permute.xlu1 %1431  ;;  %2779 = vrot.lane.b32.xlu0 %v2124_v5, %s5220_s21  ;;  %v2084_v61 = vadd.f32 %v6297_v63, %v1892_v51 }
 0x2f1   :  { %v4626_v24 = vmul.f32 -1.442695, %v2891_v35  ;;  %v1700_v35 = vadd.f32 %v6289_v15, %v1508_v8 }
 0x2f2   :  { %v2576_v40 = vpop.permute.xlu0 %2575  ;;  %2208 = vrot.lane.b32.xlu1 %v2125_v41, %s5217_s18  ;;  %v2276_v21 = vadd.f32 %v6324_v39, %v2084_v61 }
 0x2f3   :  { %4992 = vpow2.f32 %v4626_v24  ;;  %v4991_v5 = vpop.eup %4990  ;;  %v1360_v24 = vld [vmem:[#allocation3 + $0x228] sm:$0xff] }
 0x2f4   :  { %v2386_v59 = vpop.permute.xlu1 %2385  ;;  %1445 = vrot.lane.b32.xlu0 %v1359_v29, %s5215_s16  ;;  %v3018_v47 = vadd.f32 1.0, %v4991_v5  ;;  %v2469_v1 = vadd.f32 %v2384_v42, %v2276_v21  ;;  %v6395_v42 = vld [vmem:[#allocation3 + $0x227] sm:$0xff] }
 0x2f6   :  { %v6370_v27 = vpop.permute.xlu0 %2002  ;;  %1635 = vrot.lane.b32.xlu1 %v2125_v41, %s5219_s20  ;;  %v2661_v10 = vadd.f32 %v2576_v40, %v2469_v1  ;;  %4994 = vrcp.f32 %v3018_v47  ;;  %v1551_v47 = vld [vmem:[#allocation3 + $0x221] sm:$0xff] }
 0x2f8   :  { %v6376_v32 = vpop.permute.xlu1 %1812  ;;  %2399 = vrot.lane.b32.xlu0 %v6374_v38, %s5218_s19 }
 0x2fa   :  { %v6381_v50 = vpop.permute.xlu0 %1621  ;;  %2781 = vrot.lane.b32.xlu1 %v2125_v41, %s5220_s21  ;;  %v1893_v41 = vadd.f32 %v6306_v4, %v1700_v35 }
 0x2fc   :  { %v2578_v63 = vpop.permute.xlu1 %2577  ;;  %1826 = vrot.lane.b32.xlu0 %v6374_v38, %s5214_s15  ;;  %v2085_v58 = vadd.f32 %v6312_v16, %v1893_v41 }
 0x2fd   :  { %v4993_v3 = vpop.eup %4992 }
 0x2fe   :  { %v3019_v45 = vadd.f32 1.0, %v4993_v3  ;;  %v2768_v39 = vpop.permute.xlu0 %2767  ;;  %1447 = vrot.lane.b32.xlu1 %v1360_v24, %s5215_s16  ;;  %v2277_v61 = vadd.f32 %v6342_v54, %v2085_v58 }
 0x2ff   :  { %v2853_v51 = vadd.f32 %v2768_v39, %v2661_v10 }
 0x300   :  { %4996 = vrcp.f32 %v3019_v45  ;;  %v6391_v57 = vpop.permute.xlu1 %2004  ;;  %2591 = vrot.lane.b32.xlu0 %v1359_v29, %s5216_s17  ;;  %v2470_v5 = vadd.f32 %v2386_v59, %v2277_v61  ;;  %v4995_v3 = vpop.eup %4994 }
 0x301   :  { %v2892_v15 = vadd.f32 %v6028_v34, %v2853_v51  ;;  %v1552_v51 = vld [vmem:[#allocation3 + $0x229] sm:$0xff] }
 0x302   :  { %v2195_v40 = vpop.permute.xlu0 %2194  ;;  %2401 = vrot.lane.b32.xlu1 %v6395_v42, %s5218_s19  ;;  %v2662_v16 = vadd.f32 %v2578_v63, %v2470_v5 }
 0x303   :  { %v4627_v21 = vmul.f32 -1.442695, %v2892_v15 }
 0x304   :  { %v6401_v4 = vpop.permute.xlu1 %1623  ;;  %2018 = vrot.lane.b32.xlu0 %v1359_v29, %s5213_s1 }
 0x305   :  { %4998 = vpow2.f32 %v4627_v21 }
 0x306   :  { %v6404_v8 = vpop.permute.xlu0 %1814  ;;  %1828 = vrot.lane.b32.xlu1 %v6395_v42, %s5214_s15 }
 0x308   :  { %v2770_v1 = vpop.permute.xlu1 %2769  ;;  %1637 = vrot.lane.b32.xlu0 %v1551_v47, %s5219_s20 }
 0x309   :  { %v2854_v35 = vadd.f32 %v2770_v1, %v2662_v16 }
 0x30a   :  { %v4997_v10 = vpop.eup %4996  ;;  %v6409_v54 = vpop.permute.xlu0 %2006  ;;  %2593 = vrot.lane.b32.xlu1 %v1360_v24, %s5216_s17 }
 0x30b   :  { %v2893_v29 = vadd.f32 %v6028_v34, %v2854_v35  ;;  %v3110_v59 = vpack.c.bf16 %v4997_v10, %v4995_v3  ;;  %v6422_v34 = vld [vmem:[#allocation3 + $0x24f] sm:$0xff] }
 0x30c   :  { %v2197_v45 = vpop.permute.xlu1 %2196  ;;  %2783 = vrot.lane.b32.xlu0 %v1551_v47, %s5220_s21 }
 0x30d   :  { %v4628_v39 = vmul.f32 -1.442695, %v2893_v29  ;;  %4767 = vmatprep.mubr.msk.bf16.mxu1 %vm3136_vm3, %v3110_v59 }
 0x30e   :  { %v6415_v63 = vpop.permute.xlu0 %1433  ;;  %2020 = vrot.lane.b32.xlu1 %v1360_v24, %s5213_s1  ;;  %v1509_v24 = vadd.f32 %v6079_v31, %v6303_v52  ;;  %v2327_v52 = vld [vmem:[#allocation3 + $0x30f] sm:$0xff] }
 0x30f   :  { %5000 = vpow2.f32 %v4628_v39  ;;  %v4999_v15 = vpop.eup %4998  ;;  %v2328_v39 = vld [vmem:[#allocation3 + $0x317] sm:$0xff] }
 0x310   :  { %v6418_v41 = vpop.permute.xlu1 %1816  ;;  %2210 = vrot.lane.b32.xlu0 %v1551_v47, %s5217_s18  ;;  %v1701_v21 = vadd.f32 %v6331_v14, %v1509_v24  ;;  %v3020_v16 = vadd.f32 1.0, %v4999_v15  ;;  %v2319_v47 = vld [vmem:[#allocation3 + $0x24f] sm:$0xff] }
 0x312   :  { %v2388_v58 = vpop.permute.xlu0 %2387  ;;  %1639 = vrot.lane.b32.xlu1 %v1552_v51, %s5219_s20  ;;  %v1894_v35 = vadd.f32 %v6357_v49, %v1701_v21  ;;  %5002 = vrcp.f32 %v3020_v16  ;;  %v1510_v49 = vadd.f32 %v6097_v23, %v6320_v37  ;;  %v2329_v21 = vld [vmem:[#allocation3 + $0x33f] sm:$0xff]  ;;  %s5224_s20 = smov 63  }
 0x314   :  { %v6424_v61 = vpop.permute.xlu1 %2008  ;;  %1830 = vrot.lane.b32.xlu0 %v6422_v34, %s5214_s15  ;;  %v2086_v31 = vadd.f32 %v6370_v27, %v1894_v35  ;;  %v1702_v27 = vadd.f32 %v6350_v48, %v1510_v49  ;;  %v6457_v48 = vld [vmem:[%s7022_s2] ss:$0 sm:$0xff]  ;;  %s4508_s2 = sshll.u32 %s5229_s26, 4  ;;  %s4509_s2 = int_to_ptr.vmem [resolvable:$true] %s4508_s2 }
 0x315   :  { %s5178_s27 = scalar_lea.vmem %s4509_s2, 16  ;;  %p5183_p3 = scmp.lt.s32.totalorder %s4509_s2, %s4509_s2 }
 0x316   :  { %v2580_v5 = vpop.permute.xlu0 %2579  ;;  %2785 = vrot.lane.b32.xlu1 %v1552_v51, %s5220_s21  ;;  %v2278_v59 = vadd.f32 %v2195_v40, %v2086_v31  ;;  %v1895_v40 = vadd.f32 %v6376_v32, %v1702_v27  ;;  %p5179_p2 = scmp.ne.s32.totalorder %s4509_s2, %s5178_s27 }
 0x318   :  { %v6432_v1 = vpop.permute.xlu1 %1435  ;;  %2403 = vrot.lane.b32.xlu0 %v2319_v47, %s5218_s19  ;;  %v2471_v24 = vadd.f32 %v2388_v58, %v2278_v59  ;;  %v2330_v47 = vld [vmem:[#allocation3 + $0x347] sm:$0xff]  ;;  %v2087_v37 = vadd.f32 %v6391_v57, %v1895_v40  ;;  %v2520_v58 = vld [vmem:[#allocation3 + $0x318] sm:$0xff] }
 0x319   :  { %v5001_v3 = vpop.eup %5000 }
 0x31a   :  { %v3021_v10 = vadd.f32 1.0, %v5001_v3  ;;  %v6436_v29 = vpop.permute.xlu0 %2198  ;;  %2212 = vrot.lane.b32.xlu1 %v1552_v51, %s5217_s18  ;;  %v2663_v16 = vadd.f32 %v2580_v5, %v2471_v24  ;;  %v2279_v32 = vadd.f32 %v2197_v45, %v2087_v37  ;;  %s5222_s18 = smov 102  }
 0x31c   :  { %5004 = vrcp.f32 %v3021_v10  ;;  %v2390_v14 = vpop.permute.xlu1 %2389  ;;  %2419 = vrot.lane.b32.xlu0 %v2327_v52, %s5218_s19  ;;  %v2519_v10 = vld [vmem:[#allocation3 + $0x310] sm:$0xff]  ;;  %v5003_v23 = vpop.eup %5002 }
 0x31d   :  { %v2472_v57 = vadd.f32 %v2390_v14, %v2279_v32 }
 0x31e   :  { %v6441_v15 = vpop.permute.xlu0 %1625  ;;  %2421 = vrot.lane.b32.xlu1 %v2328_v39, %s5218_s19  ;;  %v2521_v39 = vld [vmem:[#allocation3 + $0x340] sm:$0xff] }
 0x320   :  { %v2582_v51 = vpop.permute.xlu1 %2581  ;;  %2423 = vrot.lane.b32.xlu0 %v2329_v21, %s5218_s19  ;;  %v2522_v21 = vld [vmem:[#allocation3 + $0x348] sm:$0xff] }
 0x322   :  { %v2772_v3 = vpop.permute.xlu0 %2771  ;;  %2425 = vrot.lane.b32.xlu1 %v2330_v47, %s5218_s19  ;;  %v2664_v47 = vadd.f32 %v2582_v51, %v2472_v57  ;;  %v1511_v51 = vadd.f32 %v6145_v12, %v6347_v2  ;;  %v1512_v2 = vadd.f32 %v6163_v6, %v6361_v28  ;;  %s5223_s19 = smov 76  }
 0x323   :  { %v2855_v35 = vadd.f32 %v2772_v3, %v2663_v16  ;;  %v2711_v3 = vld [vmem:[#allocation3 + $0x311] sm:$0xff] }
 0x324   :  { %v6450_v31 = vpop.permute.xlu1 %2200  ;;  %2611 = vrot.lane.b32.xlu0 %v2519_v10, %s5216_s17  ;;  %v1703_v32 = vadd.f32 %v6381_v50, %v1511_v51 }
 0x325   :  { %v2894_v5 = vadd.f32 %v6457_v48, %v2855_v35  ;;  %v2712_v35 = vld [vmem:[#allocation3 + $0x319] sm:$0xff] }
 0x326   :  { %v5005_v52 = vpop.eup %5004  ;;  %v6460_v59 = vpop.permute.xlu0 %1437  ;;  %2613 = vrot.lane.b32.xlu1 %v2520_v58, %s5216_s17 }
 0x327   :  { %v3111_v49 = vpack.c.bf16 %v5005_v52, %v5003_v23  ;;  %v4629_v27 = vmul.f32 -1.442695, %v2894_v5  ;;  %v2713_v23 = vld [vmem:[#allocation3 + $0x341] sm:$0xff]  ;;  %v2714_v52 = vld [vmem:[#allocation3 + $0x349] sm:$0xff] }
 0x328   :  { %v6463_v24 = vpop.permute.xlu1 %1627  ;;  %2615 = vrot.lane.b32.xlu0 %v2521_v39, %s5216_s17 }
 0x329   :  { %4768 = vmatmul.mubr.msk.bf16.gmra.mrb[76].mxu1 %vm3136_vm3, %v3111_v49  ;;  %5006 = vpow2.f32 %v4629_v27  ;;  %v1896_v49 = vadd.f32 %v6404_v8, %v1703_v32 }
 0x32a   :  { %v2392_v16 = vpop.permute.xlu0 %2391  ;;  %2617 = vrot.lane.b32.xlu1 %v2522_v21, %s5216_s17 }
 0x32b   :  { %v2088_v21 = vadd.f32 %v6409_v54, %v1896_v49 }
 0x32c   :  { %v2774_v40 = vpop.permute.xlu1 %2773  ;;  %2803 = vrot.lane.b32.xlu0 %v2711_v3, %s5220_s21 }
 0x32d   :  { %v2856_v45 = vadd.f32 %v2774_v40, %v2664_v47  ;;  %v2280_v3 = vadd.f32 %v6436_v29, %v2088_v21 }
 0x32e   :  { %v6469_v10 = vpop.permute.xlu0 %1818  ;;  %2805 = vrot.lane.b32.xlu1 %v2712_v35, %s5220_s21 }
 0x32f   :  { %v2895_v14 = vadd.f32 %v6457_v48, %v2856_v45  ;;  %v2473_v45 = vadd.f32 %v2392_v16, %v2280_v3 }
 0x330   :  { %v6473_v37 = vpop.permute.xlu1 %1439  ;;  %2807 = vrot.lane.b32.xlu0 %v2713_v23, %s5220_s21 }
 0x331   :  { %v4630_v58 = vmul.f32 -1.442695, %v2895_v14  ;;  %v1704_v14 = vadd.f32 %v6401_v4, %v1512_v2 }
 0x332   :  { %v2584_v5 = vpop.permute.xlu0 %2583  ;;  %2809 = vrot.lane.b32.xlu1 %v2714_v52, %s5220_s21  ;;  %s5225_s21 = smov 89  }
 0x333   :  { %5008 = vpow2.f32 %v4630_v58  ;;  %v5007_v27 = vpop.eup %5006  ;;  %v2665_v8 = vadd.f32 %v2584_v5, %v2473_v45  ;;  %v1897_v54 = vadd.f32 %v6418_v41, %v1704_v14 }
 0x334   :  { %v2394_v39 = vpop.permute.xlu1 %2393  ;;  %v3022_v40 = vadd.f32 1.0, %v5007_v27 }
 0x335   :  { %v2089_v52 = vadd.f32 %v6424_v61, %v1897_v54 }
 0x336   :  { %v2011_v57 = vpop.permute.xlu0 %2010  ;;  %5010 = vrcp.f32 %v3022_v40 }
 0x337   :  { %v2281_v28 = vadd.f32 %v6450_v31, %v2089_v52 }
 0x338   :  { %v6482_v47 = vpop.permute.xlu1 %1820 }
 0x339   :  { %v2474_v49 = vadd.f32 %v2394_v39, %v2281_v28 }
 0x33a   :  { %v6485_v12 = vpop.permute.xlu0 %1629 }
 0x33c   :  { %v2586_v50 = vpop.permute.xlu1 %2585 }
 0x33d   :  { %v5009_v35 = vpop.eup %5008  ;;  %v2666_v21 = vadd.f32 %v2586_v50, %v2474_v49 }
 0x33e   :  { %v3023_v23 = vadd.f32 1.0, %v5009_v35  ;;  %v2776_v51 = vpop.permute.xlu0 %2775 }
 0x33f   :  { %v2857_v58 = vadd.f32 %v2776_v51, %v2665_v8  ;;  %v1513_v51 = vadd.f32 %v6194_v19, %v6415_v63  ;;  %v1514_v19 = vadd.f32 %v6217_v25, %v6432_v1  ;;  %v1521_v25 = vadd.f32 %v5753_v26, %v6422_v34  ;;  %v6538_v26 = vld [vmem:[%s7024_s4] ss:$0 sm:$0xff]  ;;  %s5182_s4 = scalar_lea.vmem %s4509_s2, 32 }
 0x340   :  { %5012 = vrcp.f32 %v3023_v23  ;;  %v2013_v29 = vpop.permute.xlu1 %2012  ;;  %v5011_v41 = vpop.eup %5010  ;;  %p5184_p4 = scmp.lt.s32.totalorder %s5182_s4, %s5178_s27 }
 0x341   :  { %v2896_v32 = vadd.f32 %v6457_v48, %v2857_v58  ;;  %v1705_v52 = vadd.f32 %v6441_v15, %v1513_v51 }
 0x342   :  { %v2203_v6 = vpop.permute.xlu0 %2202  ;;  %p5185_p5 = por %p5184_p4, %p5183_p3 }
 0x343   :  { %v4631_v4 = vmul.f32 -1.442695, %v2896_v32  ;;  %v1898_v49 = vadd.f32 %v6469_v10, %v1705_v52 }
 0x344   :  { %v6494_v16 = vpop.permute.xlu1 %1631  ;;  %p5186_p6 = pnand %p5185_p5, %p5179_p2 }
 0x345   :  { %5014 = vpow2.f32 %v4631_v4 }
 0x346   :  { %v6496_v5 = vpop.permute.xlu0 %1822 }
 0x348   :  { %v2778_v27 = vpop.permute.xlu1 %2777 }
 0x349   :  { %v2858_v3 = vadd.f32 %v2778_v27, %v2666_v21  ;;  %v2090_v27 = vadd.f32 %v2011_v57, %v1898_v49 }
 0x34a   :  { %v5013_v2 = vpop.eup %5012  ;;  %v6498_v40 = vpop.permute.xlu0 %2014 }
 0x34b   :  { %v2897_v61 = vadd.f32 %v6457_v48, %v2858_v3  ;;  %v3112_v45 = vpack.c.bf16 %v5013_v2, %v5011_v41  ;;  %v2282_v3 = vadd.f32 %v2203_v6, %v2090_v27 }
 0x34c   :  { %v2205_v35 = vpop.permute.xlu1 %2204 }
 0x34d   :  { %v4632_v14 = vmul.f32 -1.442695, %v2897_v61  ;;  %4771 = vmatprep.mubr.msk.bf16.mxu1 %vm3136_vm3, %v3112_v45  ;;  %v1706_v61 = vadd.f32 %v6463_v24, %v1514_v19 }
 0x34e   :  { %v6502_v31 = vpop.permute.xlu0 %1441 }
 0x34f   :  { %5016 = vpow2.f32 %v4632_v14  ;;  %v5015_v8 = vpop.eup %5014  ;;  %v1899_v10 = vadd.f32 %v6482_v47, %v1706_v61 }
 0x350   :  { %v6504_v39 = vpop.permute.xlu1 %1824  ;;  %v3024_v58 = vadd.f32 1.0, %v5015_v8 }
 0x352   :  { %v2396_v50 = vpop.permute.xlu0 %2395  ;;  %5018 = vrcp.f32 %v3024_v58  ;;  %v2091_v58 = vadd.f32 %v2013_v29, %v1899_v10  ;;  %v1713_v29 = vadd.f32 %v5780_v44, %v1521_v25  ;;  %v1515_v44 = vadd.f32 %v6262_v53, %v6460_v59 }
 0x353   :  { %v2475_v63 = vadd.f32 %v2396_v50, %v2282_v3 }
 0x354   :  { %v6506_v23 = vpop.permute.xlu1 %2016 }
 0x356   :  { %v2588_v54 = vpop.permute.xlu0 %2587 }
 0x357   :  { %v2667_v45 = vadd.f32 %v2588_v54, %v2475_v63  ;;  %v1906_v63 = vadd.f32 %v5831_v18, %v1713_v29  ;;  %v5126_v18 = vld [vmem:[#allocation3 + $0x257] sm:$0xff] }
 0x358   :  { %v6511_v32 = vpop.permute.xlu1 %1443 }
 0x359   :  { %v5017_v28 = vpop.eup %5016 }
 0x35a   :  { %v3025_v4 = vadd.f32 1.0, %v5017_v28  ;;  %v6514_v21 = vpop.permute.xlu0 %2206  ;;  %v2283_v28 = vadd.f32 %v2205_v35, %v2091_v58 }
 0x35c   :  { %5020 = vrcp.f32 %v3025_v4  ;;  %v2398_v41 = vpop.permute.xlu1 %2397  ;;  %v5019_v57 = vpop.eup %5018 }
 0x35d   :  { %v2476_v50 = vadd.f32 %v2398_v41, %v2283_v28  ;;  %v1522_v28 = vadd.f32 %v5126_v18, %v5764_v36  ;;  %v7082_v18 = vld [vmem:[#allocation66_spill] sm:$0xff] }
 0x35e   :  { %v6516_v2 = vpop.permute.xlu0 %1633 }
 0x360   :  { %v2590_v15 = vpop.permute.xlu1 %2589 }
 0x361   :  { %v2668_v54 = vadd.f32 %v2590_v15, %v2476_v50 }
 0x362   :  { %v2780_v14 = vpop.permute.xlu0 %2779 }
 0x363   :  { %v2859_v8 = vadd.f32 %v2780_v14, %v2667_v45 }
 0x364   :  { %v6522_v51 = vpop.permute.xlu1 %2208 }
 0x365   :  { %v2898_v1 = vadd.f32 %v6457_v48, %v2859_v8 }
 0x366   :  { %v5021_v52 = vpop.eup %5020  ;;  %v6524_v6 = vpop.permute.xlu0 %1445 }
 0x367   :  { %v3113_v49 = vpack.c.bf16 %v5021_v52, %v5019_v57  ;;  %v4633_v4 = vmul.f32 -1.442695, %v2898_v1  ;;  %v1707_v57 = vadd.f32 %v6485_v12, %v1515_v44  ;;  %v1714_v12 = vadd.f32 %v5799_v60, %v1522_v28 }
 0x368   :  { %v6529_v24 = vpop.permute.xlu1 %1635  ;;  %v1516_v60 = vadd.f32 %v6283_v22, %v6473_v37  ;;  %v1517_v28 = vadd.f32 %v7082_v18, %v6502_v31 }
 0x369   :  { %4772 = vmatmul.mubr.msk.bf16.gmra.mrb[80].mxu1 %vm3136_vm3, %v3113_v49  ;;  %5022 = vpow2.f32 %v4633_v4  ;;  %v2098_v49 = vadd.f32 %v5844_v30, %v1906_v63  ;;  %v1900_v25 = vadd.f32 %v6496_v5, %v1707_v57  ;;  %v1907_v50 = vadd.f32 %v5834_v20, %v1714_v12  ;;  %v5128_v57 = vld [vmem:[#allocation3 + $0x287] sm:$0xff]  ;;  %v7085_v12 = vld [vmem:[#allocation43_spill] sm:$0xff] }
 0x36a   :  { %v2400_v47 = vpop.permute.xlu0 %2399  ;;  %v1524_v22 = vadd.f32 %v5128_v57, %v5821_v11 }
 0x36b   :  { %v2092_v36 = vadd.f32 %v6498_v40, %v1900_v25  ;;  %v2290_v4 = vadd.f32 %v5865_v62, %v2098_v49  ;;  %v2099_v5 = vadd.f32 %v5847_v33, %v1907_v50  ;;  %v1708_v33 = vadd.f32 %v6494_v16, %v1516_v60  ;;  %v7088_v60 = vld [vmem:[#allocation40_spill] sm:$0xff] }
 0x36c   :  { %v2782_v27 = vpop.permute.xlu1 %2781  ;;  %v1716_v16 = vadd.f32 %v5861_v55, %v1524_v22  ;;  %v1709_v50 = vadd.f32 %v6516_v2, %v1517_v28 }
 0x36d   :  { %v2860_v3 = vadd.f32 %v2782_v27, %v2668_v54  ;;  %v2284_v30 = vadd.f32 %v6514_v21, %v2092_v36  ;;  %v2291_v40 = vadd.f32 %v5876_v7, %v2099_v5 }
 0x36e   :  { %v6533_v19 = vpop.permute.xlu0 %1826 }
 0x36f   :  { %v2899_v34 = vadd.f32 %v6457_v48, %v2860_v3  ;;  %v2484_v37 = vadd.f32 %v5943_v46, %v2291_v40 }
 0x370   :  { %v4761_v35 = vpop.f32.mrb[68].mxu1  ;;  %v6541_v41 = vpop.permute.xlu1 %1447 }
 0x371   :  { %v4634_v15 = vmul.f32 -1.442695, %v2899_v34  ;;  %v3232_v61 = vadd.f32 %v4761_v35, %v6538_v26  ;;  %v3223_v45 = vpop.f32.mrb[69].mxu1  ;;  %v2477_v34 = vadd.f32 %v2400_v47, %v2284_v30  ;;  %v1520_v31 = vadd.f32 %v6395_v42, %v6541_v41 }
 0x372   :  { %v3224_v14 = vadd.f32 %v6538_v26, %v3223_v45  ;;  %v4762_v10 = vpop.f32.mrb[70].mxu1  ;;  %v2592_v8 = vpop.permute.xlu0 %2591  ;;  %v1518_v42 = vadd.f32 %v6329_v43, %v6511_v32  ;;  %v7094_v32 = vld [vmem:[#allocation16_spill] sm:$0xff] }
 0x373   :  { %5024 = vpow2.f32 %v4634_v15  ;;  %3353 = vst.msk [vmem:[#allocation4 + $0x10] sm:$0xff] %vm3350_vm4, %v3232_v61  ;;  %v3235_v58 = vadd.f32 %v4762_v10, %v6538_v26  ;;  %v3226_v52 = vpop.f32.mrb[71].mxu1  ;;  %v5023_v27 = vpop.eup %5022  ;;  %v2483_v15 = vadd.f32 %v5925_v56, %v2290_v4  ;;  %v5127_v61 = vld [vmem:[#allocation3 + $0x27f] sm:$0xff] }
 0x374   :  { %3351 = vst.msk [vmem:[#allocation4] sm:$0xff] %vm3350_vm4, %v3224_v14  ;;  %v3227_v53 = vadd.f32 %v6538_v26, %v3226_v52  ;;  %v6554_v59 = vpop.permute.xlu1 %2401  ;;  %v1523_v21 = vadd.f32 %v5127_v61, %v5818_v9  ;;  %v3026_v45 = vadd.f32 1.0, %v5023_v27  ;;  %v2669_v14 = vadd.f32 %v2592_v8, %v2477_v34  ;;  %v7087_v27 = vld [vmem:[#allocation36_spill] sm:$0xff]  ;;  %v7090_v61 = vld [vmem:[#allocation17_spill] sm:$0xff] }
 0x375   :  { %3354 = vst.msk [vmem:[#allocation4 + $0x18] sm:$0xff] %vm3350_vm4, %v3235_v58  ;;  %v1901_v52 = vadd.f32 %v6504_v39, %v1708_v33  ;;  %v2676_v8 = vadd.f32 %v5951_v13, %v2484_v37  ;;  %v2675_v46 = vadd.f32 %v5932_v17, %v2483_v15  ;;  %v7084_v39 = vld [vmem:[#allocation35_spill] sm:$0xff]  ;;  %v1519_v17 = vadd.f32 %v6374_v38, %v6524_v6  ;;  %v7093_v37 = vld [vmem:[#allocation18_spill] sm:$0xff] }
 0x376   :  { %3352 = vst.msk [vmem:[#allocation4 + $0x8] sm:$0xff] %vm3350_vm4, %v3227_v53  ;;  %v6561_v1 = vpop.permute.xlu0 %2018  ;;  %v1715_v56 = vadd.f32 %v5851_v0, %v1523_v21  ;;  %v7083_v0 = vld [vmem:[#allocation32_spill] sm:$0xff]  ;;  %v1909_v25 = vadd.f32 %v7084_v39, %v1716_v16 }
 0x377   :  { %v2093_v53 = vadd.f32 %v6506_v23, %v1901_v52  ;;  %v2868_v55 = vadd.f32 %v7085_v12, %v2676_v8  ;;  %v7086_v23 = vld [vmem:[#allocation33_spill] sm:$0xff]  ;;  %v2867_v34 = vadd.f32 %v7088_v60, %v2675_v46  ;;  %v7096_v8 = vld [vmem:[#allocation24_spill] sm:$0xff] }
 0x378   :  { %v6565_v54 = vpop.permute.xlu1 %1828  ;;  %v1908_v49 = vadd.f32 %v7083_v0, %v1715_v56  ;;  %v2101_v5 = vadd.f32 %v7087_v27, %v1909_v25  ;;  %v7097_v46 = vld [vmem:[#allocation20_spill] sm:$0xff]  ;;  %v7098_v0 = vld [vmem:[#allocation58_spill] sm:$0xff] }
 0x379   :  { %v2285_v4 = vadd.f32 %v6522_v51, %v2093_v53  ;;  %v7089_v51 = vld [vmem:[#allocation41_spill] sm:$0xff]  ;;  %v2907_v38 = vadd.f32 %v6457_v48, %v2868_v55  ;;  %v2906_v57 = vadd.f32 %v6457_v48, %v2867_v34  ;;  %v7104_v60 = vld [vmem:[#allocation28_spill] sm:$0xff] }
 0x37a   :  { %v3400_v29 = vld [vmem:[#allocation4 + $0x10] sm:$0xff]  ;;  %v1638_v3 = vpop.permute.xlu0 %1637  ;;  %v2100_v30 = vadd.f32 %v7086_v23, %v1908_v49 }
 0x37b   :  { %v3383_v35 = vld [vmem:[#allocation4] sm:$0xff]  ;;  %v2478_v40 = vadd.f32 %v6554_v59, %v2285_v4  ;;  %v1711_v2 = vadd.f32 %v1638_v3, %v1519_v17  ;;  %v7092_v59 = vld [vmem:[#allocation49_spill] sm:$0xff]  ;;  %v4641_v55 = vmul.f32 -1.442695, %v2906_v57  ;;  %v7113_v57 = vld [vmem:[#allocation54_spill] sm:$0xff] }
 0x37c   :  { %v3416_v63 = vmax.f32 %v3383_v35, %v3400_v29  ;;  %v3401_v20 = vld [vmem:[#allocation4 + $0x18] sm:$0xff]  ;;  %v2594_v44 = vpop.permute.xlu1 %2593  ;;  %v1902_v35 = vadd.f32 %v6533_v19, %v1709_v50  ;;  %v7102_v23 = vld [vmem:[#allocation45_spill] sm:$0xff] }
 0x37d   :  { %v5025_v62 = vpop.eup %5024  ;;  %v3384_v10 = vld [vmem:[#allocation4 + $0x8] sm:$0xff]  ;;  %v7091_v19 = vld [vmem:[#allocation38_spill] sm:$0xff]  ;;  %v7101_v17 = vld [vmem:[#allocation19_spill] sm:$0xff] }
 0x37e   :  { %v3027_v7 = vadd.f32 1.0, %v5025_v62  ;;  %3432 = vst.msk [vmem:[#allocation4] sm:$0xff] %vm3350_vm4, %v3416_v63  ;;  %v3417_v47 = vmax.f32 %v3384_v10, %v3401_v20  ;;  %v2784_v58 = vpop.permute.xlu0 %2783  ;;  %v2293_v20 = vadd.f32 %v7089_v51, %v2101_v5  ;;  %v2094_v15 = vadd.f32 %v6561_v1, %v1902_v35  ;;  %v7100_v50 = vld [vmem:[#allocation26_spill] sm:$0xff]  ;;  %v7105_v35 = vld [vmem:[#allocation23_spill] sm:$0xff] }
 0x37f   :  { %v2861_v9 = vadd.f32 %v2784_v58, %v2669_v14  ;;  %v2670_v62 = vadd.f32 %v2594_v44, %v2478_v40  ;;  %v1710_v14 = vadd.f32 %v6529_v24, %v1518_v42  ;;  %v4642_v44 = vmul.f32 -1.442695, %v2907_v38  ;;  %v7095_v58 = vld [vmem:[#allocation53_spill] sm:$0xff] }
 0x380   :  { %5026 = vrcp.f32 %v3027_v7  ;;  %3433 = vst.msk [vmem:[#allocation4 + $0x8] sm:$0xff] %vm3350_vm4, %v3417_v47  ;;  %v2021_v11 = vpop.permute.xlu1 %2020  ;;  %v2486_v3 = vadd.f32 %v7092_v59, %v2293_v20  ;;  %v7107_v20 = vld [vmem:[#allocation48_spill] sm:$0xff]  ;;  %v7108_v42 = vld [vmem:[#allocation21_spill] sm:$0xff] }
 0x381   :  { %5028 = vrcp.f32 %v3026_v45  ;;  %v2900_v13 = vadd.f32 %v6457_v48, %v2861_v9  ;;  %v2292_v45 = vadd.f32 %v7091_v19, %v2100_v30  ;;  %v1903_v52 = vadd.f32 %v6565_v54, %v1710_v14  ;;  %v7111_v59 = vld [vmem:[#allocation37_spill] sm:$0xff]  ;;  %v7112_v14 = vld [vmem:[#allocation39_spill] sm:$0xff] }
 0x382   :  { %v2211_v36 = vpop.permute.xlu0 %2210  ;;  %v2678_v56 = vadd.f32 %v7095_v58, %v2486_v3  ;;  %v7115_v58 = vld [vmem:[#allocation42_spill] sm:$0xff] }
 0x383   :  { %v4635_v6 = vmul.f32 -1.442695, %v2900_v13  ;;  %v2286_v22 = vadd.f32 %v2211_v36, %v2094_v15  ;;  %v2095_v39 = vadd.f32 %v2021_v11, %v1903_v52  ;;  %v7099_v13 = vld [vmem:[#allocation27_spill] sm:$0xff]  ;;  %v2485_v30 = vadd.f32 %v7102_v23, %v2292_v45  ;;  %v5132_v23 = vld [vmem:[#allocation3 + $0x2e7] sm:$0xff] }
 0x384   :  { %v1640_v29 = vpop.permute.xlu1 %1639  ;;  %v2870_v49 = vadd.f32 %v7098_v0, %v2678_v56  ;;  %v5130_v45 = vld [vmem:[#allocation3 + $0x2b7] sm:$0xff]  ;;  %v5131_v52 = vld [vmem:[#allocation3 + $0x2df] sm:$0xff] }
 0x385   :  { %v1712_v63 = vadd.f32 %v1640_v29, %v1520_v31  ;;  %5030 = vpow2.f32 %v4635_v6  ;;  %v7103_v29 = vld [vmem:[#allocation29_spill] sm:$0xff]  ;;  %v2677_v38 = vadd.f32 %v7107_v20, %v2485_v30  ;;  %v1526_v3 = vadd.f32 %v5130_v45, %v7111_v59  ;;  %v7122_v30 = vld [vmem:[#allocation47_spill] sm:$0xff] }
 0x386   :  { %v1831_v41 = vpop.permute.xlu0 %1830  ;;  %5032 = vpow2.f32 %v4642_v44  ;;  %v2909_v15 = vadd.f32 %v6457_v48, %v2870_v49 }
 0x387   :  { %v1905_v21 = vadd.f32 %v7090_v61, %v1712_v63  ;;  %v1904_v33 = vadd.f32 %v1831_v41, %v1711_v2  ;;  %v5129_v2 = vld [vmem:[#allocation3 + $0x2af] sm:$0xff]  ;;  %v1718_v56 = vadd.f32 %v7115_v58, %v1526_v3  ;;  %v7129_v3 = vld [vmem:[#allocation63_spill] sm:$0xff] }
 0x388   :  { %v2786_v10 = vpop.permute.xlu1 %2785  ;;  %v7106_v63 = vld [vmem:[#allocation34_spill] sm:$0xff] }
 0x389   :  { %v2097_v43 = vadd.f32 %v7093_v37, %v1905_v21  ;;  %v2096_v7 = vadd.f32 %v7094_v32, %v1904_v33  ;;  %v2862_v47 = vadd.f32 %v2786_v10, %v2670_v62  ;;  %v1525_v51 = vadd.f32 %v5129_v2, %v7106_v63  ;;  %v7109_v62 = vld [vmem:[#allocation31_spill] sm:$0xff]  ;;  %v7110_v21 = vld [vmem:[#allocation30_spill] sm:$0xff]  ;;  %v7125_v63 = vld [vmem:[#allocation60_spill] sm:$0xff] }
 0x38a   :  { %v5027_v1 = vpop.eup %5026  ;;  %v2404_v9 = vpop.permute.xlu0 %2403  ;;  %v7114_v37 = vld [vmem:[#allocation22_spill] sm:$0xff] }
 0x38b   :  { %v5029_v16 = vpop.eup %5028  ;;  %v2289_v24 = vadd.f32 %v7096_v8, %v2097_v43  ;;  %v2288_v18 = vadd.f32 %v7097_v46, %v2096_v7  ;;  %v2901_v28 = vadd.f32 %v6457_v48, %v2862_v47  ;;  %v2479_v53 = vadd.f32 %v2404_v9, %v2286_v22  ;;  %v7116_v9 = vld [vmem:[#allocation44_spill] sm:$0xff]  ;;  %v7117_v8 = vld [vmem:[#allocation46_spill] sm:$0xff]  ;;  %v7118_v46 = vld [vmem:[#allocation25_spill] sm:$0xff] }
 0x38c   :  { %v2213_v25 = vpop.permute.xlu1 %2212  ;;  %v3114_v12 = vpack.c.bf16 %v5027_v1, %v5029_v16  ;;  %v1717_v10 = vadd.f32 %v7112_v14, %v1525_v51  ;;  %v2869_v22 = vadd.f32 %v7113_v57, %v2677_v38  ;;  %v1527_v16 = vadd.f32 %v5131_v52, %v7116_v9  ;;  %v7130_v57 = vld [vmem:[#allocation62_spill] sm:$0xff] }
 0x38d   :  { %v2482_v36 = vadd.f32 %v7099_v13, %v2289_v24  ;;  %v2481_v54 = vadd.f32 %v7100_v50, %v2288_v18  ;;  %v4636_v4 = vmul.f32 -1.442695, %v2901_v28  ;;  %v2671_v31 = vadd.f32 %v7101_v17, %v2479_v53 }
 0x38e   :  { %v2287_v27 = vadd.f32 %v2213_v25, %v2095_v39  ;;  %4775 = vmatprep.mubr.msk.bf16.mxu1 %vm3136_vm3, %v3114_v12  ;;  %v6626_v5 = vpop.permute.xlu0 %2419  ;;  %v1910_v24 = vadd.f32 %v7117_v8, %v1717_v10  ;;  %v4644_v53 = vmul.f32 -1.442695, %v2909_v15  ;;  %v7119_v39 = vld [vmem:[#allocation50_spill] sm:$0xff]  ;;  %v2908_v12 = vadd.f32 %v6457_v48, %v2869_v22 }
 0x38f   :  { %v2674_v11 = vadd.f32 %v7103_v29, %v2482_v36  ;;  %v2673_v34 = vadd.f32 %v7104_v60, %v2481_v54  ;;  %5034 = vpow2.f32 %v4636_v4  ;;  %v2863_v40 = vadd.f32 %v7105_v35, %v2671_v31  ;;  %v5031_v44 = vpop.eup %5030  ;;  %v7120_v36 = vld [vmem:[#allocation51_spill] sm:$0xff]  ;;  %v7121_v54 = vld [vmem:[#allocation52_spill] sm:$0xff] }
 0x390   :  { %v2480_v6 = vadd.f32 %v7108_v42, %v2287_v27  ;;  %v2422_v41 = vpop.permute.xlu1 %2421  ;;  %5036 = vpow2.f32 %v4641_v55  ;;  %v2102_v25 = vadd.f32 %v7119_v39, %v1910_v24  ;;  %v1911_v50 = vadd.f32 %v7120_v36, %v1718_v56  ;;  %v5033_v31 = vpop.eup %5032  ;;  %v7126_v42 = vld [vmem:[#allocation57_spill] sm:$0xff] }
 0x391   :  { %v2866_v61 = vadd.f32 %v7109_v62, %v2674_v11  ;;  %v2865_v33 = vadd.f32 %v7110_v21, %v2673_v34  ;;  %v2902_v19 = vadd.f32 %v6457_v48, %v2863_v40  ;;  %v1719_v4 = vadd.f32 %v7121_v54, %v1527_v16  ;;  %v7123_v34 = vld [vmem:[#allocation55_spill] sm:$0xff]  ;;  %v7124_v40 = vld [vmem:[#allocation56_spill] sm:$0xff] }
 0x392   :  { %v2672_v43 = vadd.f32 %v7114_v37, %v2480_v6  ;;  %v2424_v32 = vpop.permute.xlu0 %2423  ;;  %v3028_v17 = vadd.f32 1.0, %v5031_v44  ;;  %v1528_v27 = vadd.f32 %v5132_v23, %v7122_v30  ;;  %v2103_v35 = vadd.f32 %v7123_v34, %v1911_v50 }
 0x393   :  { %v2905_v7 = vadd.f32 %v6457_v48, %v2866_v61  ;;  %v2904_v47 = vadd.f32 %v6457_v48, %v2865_v33  ;;  %v4637_v1 = vmul.f32 -1.442695, %v2902_v19  ;;  %v2294_v2 = vadd.f32 %v7124_v40, %v2102_v25  ;;  %v7127_v61 = vld [vmem:[#allocation59_spill] sm:$0xff]  ;;  %v7128_v33 = vld [vmem:[#allocation61_spill] sm:$0xff] }
 0x394   :  { %v2864_v18 = vadd.f32 %v7118_v46, %v2672_v43  ;;  %v2426_v28 = vpop.permute.xlu1 %2425  ;;  %v1912_v51 = vadd.f32 %v7125_v63, %v1719_v4  ;;  %v4643_v38 = vmul.f32 -1.442695, %v2908_v12  ;;  %v1720_v6 = vadd.f32 %v7126_v42, %v1528_v27 }
 0x395   :  { %v4640_v0 = vmul.f32 -1.442695, %v2905_v7  ;;  %v4639_v49 = vmul.f32 -1.442695, %v2904_v47  ;;  %5038 = vpow2.f32 %v4637_v1  ;;  %v2295_v21 = vadd.f32 %v7127_v61, %v2103_v35  ;;  %v7131_v47 = vld [vmem:[#allocation64_spill] sm:$0xff] }
 0x396   :  { %v2903_v55 = vadd.f32 %v6457_v48, %v2864_v18  ;;  %v2612_v13 = vpop.permute.xlu0 %2611  ;;  %v2104_v19 = vadd.f32 %v7128_v33, %v1912_v51  ;;  %v2487_v45 = vadd.f32 %v6626_v5, %v2294_v2  ;;  %v3035_v59 = vadd.f32 1.0, %v5033_v31  ;;  %v7132_v5 = vld [vmem:[#allocation65_spill] sm:$0xff] }
 0x397   :  { %5040 = vpow2.f32 %v4640_v0  ;;  %v1913_v14 = vadd.f32 %v7129_v3, %v1720_v6  ;;  %v2488_v37 = vadd.f32 %v2422_v41, %v2295_v21 }
 0x398   :  { %5042 = vpow2.f32 %v4639_v49  ;;  %v4638_v29 = vmul.f32 -1.442695, %v2903_v55  ;;  %v2614_v11 = vpop.permute.xlu1 %2613  ;;  %v2296_v22 = vadd.f32 %v7130_v57, %v2104_v19  ;;  %v2679_v43 = vadd.f32 %v2612_v13, %v2487_v45 }
 0x399   :  { %v5035_v60 = vpop.eup %5034  ;;  %5044 = vpow2.f32 %v4644_v53  ;;  %v2105_v1 = vadd.f32 %v7131_v47, %v1913_v14  ;;  %v2680_v52 = vadd.f32 %v2614_v11, %v2488_v37 }
 0x39a   :  { %v5037_v20 = vpop.eup %5036  ;;  %v3029_v15 = vadd.f32 1.0, %v5035_v60  ;;  %5046 = vpow2.f32 %v4638_v29  ;;  %v2616_v62 = vpop.permute.xlu0 %2615  ;;  %v2489_v56 = vadd.f32 %v2424_v32, %v2296_v22 }
 0x39b   :  { %5048 = vrcp.f32 %v3028_v17  ;;  %v3034_v7 = vadd.f32 1.0, %v5037_v20  ;;  %v2297_v16 = vadd.f32 %v7132_v5, %v2105_v1 }
 0x39c   :  { %5050 = vrcp.f32 %v3029_v15  ;;  %v2618_v10 = vpop.permute.xlu1 %2617  ;;  %v2681_v18 = vadd.f32 %v2616_v62, %v2489_v56 }
 0x39d   :  { %5052 = vpow2.f32 %v4643_v38  ;;  %v2490_v39 = vadd.f32 %v2426_v28, %v2297_v16 }
 0x39e   :  { %v2804_v44 = vpop.permute.xlu0 %2803  ;;  %5054 = vrcp.f32 %v3035_v59 }
 0x39f   :  { %v5039_v58 = vpop.eup %5038  ;;  %v2871_v9 = vadd.f32 %v2804_v44, %v2679_v43  ;;  %5056 = vrcp.f32 %v3034_v7  ;;  %v2682_v54 = vadd.f32 %v2618_v10, %v2490_v39  ;;  %v4951_v39 = vld [vmem:[%s7025_s5] sm:$0xff]  }
 0x3a0   :  { %v3030_v8 = vadd.f32 1.0, %v5039_v58  ;;  %v2806_v24 = vpop.permute.xlu1 %2805  ;;  %4791 = vmatprep.subr.bf16.mxu1 %v4951_v39 }
 0x3a1   :  { %v5041_v46 = vpop.eup %5040  ;;  %v2910_v53 = vadd.f32 %v6457_v48, %v2871_v9  ;;  %v2872_v41 = vadd.f32 %v2806_v24, %v2680_v52  ;;  %4792 = vmatpush3.bf16.msra.mxu1 %v4951_v39 }
 0x3a2   :  { %v5043_v0 = vpop.eup %5042  ;;  %v3033_v49 = vadd.f32 1.0, %v5041_v46  ;;  %5058 = vrcp.f32 %v3030_v8  ;;  %v2808_v25 = vpop.permute.xlu0 %2807 }
 0x3a3   :  { %v5045_v12 = vpop.eup %5044  ;;  %v3032_v32 = vadd.f32 1.0, %v5043_v0  ;;  %v4645_v55 = vmul.f32 -1.442695, %v2910_v53  ;;  %v2911_v13 = vadd.f32 %v6457_v48, %v2872_v41  ;;  %v2873_v36 = vadd.f32 %v2808_v25, %v2681_v18  ;;  %v4952_v25 = vld [vmem:[%s7025_s5 + $0x8] sm:$0xff]  }
 0x3a4   :  { %v5047_v50 = vpop.eup %5046  ;;  %v2810_v4 = vpop.permute.xlu1 %2809  ;;  %5060 = vrcp.f32 %v3033_v49  ;;  %v3037_v40 = vadd.f32 1.0, %v5045_v12  ;;  %v3448_v12 = vld [vmem:[#allocation4] ss:$2 sm:$0xff]  ;;  %4793 = vmatprep.subr.bf16.mxu1 %v4952_v25 }
 0x3a5   :  { %v5049_v17 = vpop.eup %5048  ;;  %5062 = vrcp.f32 %v3032_v32  ;;  %v3031_v31 = vadd.f32 1.0, %v5047_v50  ;;  %v4646_v23 = vmul.f32 -1.442695, %v2911_v13  ;;  %v2912_v30 = vadd.f32 %v6457_v48, %v2873_v36  ;;  %v3464_v32 = vld [vmem:[#allocation4 + $0x1] ss:$2 sm:$0xff]  ;;  %v4953_v13 = vld [vmem:[%s7025_s5 + $0x10] sm:$0xff]   ;;  %4794 = vmatpush3.bf16.msra.mxu1 %v4952_v25 }
 0x3a6   :  { %v5051_v27 = vpop.eup %5050  ;;  %5064 = vpow2.f32 %v4645_v55  ;;  %v2874_v28 = vadd.f32 %v2810_v4, %v2682_v54  ;;  %v3479_v55 = vmax.f32 %v3448_v12, %v3464_v32  ;;  %4795 = vmatprep.subr.bf16.mxu1 %v4953_v13 }
 0x3a7   :  { %5066 = vrcp.f32 %v3031_v31  ;;  %v4647_v29 = vmul.f32 -1.442695, %v2912_v30  ;;  %v3115_v11 = vpack.c.bf16 %v5051_v27, %v5049_v17  ;;  %v5053_v34 = vpop.eup %5052  ;;  %v4954_v17 = vld [vmem:[%s7025_s5 + $0x18] sm:$0x3f]  }
 0x3a8   :  { %5068 = vpow2.f32 %v4646_v23  ;;  %v2913_v60 = vadd.f32 %v6457_v48, %v2874_v28  ;;  %v5055_v35 = vpop.eup %5054  ;;  %v3036_v20 = vadd.f32 1.0, %v5053_v34  ;;  %v3487_v4 = vmul.f32 %v3479_v55, %v3479_v55 }
 0x3a9   :  { %5070 = vpow2.f32 %v4647_v29  ;;  %4776 = vmatmul.mubr.msk.bf16.gmra.mrb[84].mxu1 %vm3136_vm3, %v3115_v11  ;;  %v5057_v63 = vpop.eup %5056  ;;  %v3559_v27 = vsel %vm3557_vm5, %v4954_v17, 0 }
 0x3aa   :  { %v4648_v2 = vmul.f32 -1.442695, %v2913_v60  ;;  %v3118_v59 = vpack.c.bf16 %v5055_v35, %v5057_v63  ;;  %4796 = vmatpush3.bf16.msra.mxu1 %v4953_v13  ;;  %v3495_v23 = vadd.f32 %v3487_v4, %v3479_v55 }
 0x3ab   :  { %4878 = vmatprep.subr.msk.bf16.mxu1 %vm3557_vm5, %v4954_v17 }
 0x3ac   :  { %v5059_v51 = vpop.eup %5058  ;;  %5072 = vpow2.f32 %v4648_v2 }
 0x3ad   :  { %5074 = vrcp.f32 %v3037_v40 }
 0x3ae   :  { %v5061_v38 = vpop.eup %5060  ;;  %5076 = vrcp.f32 %v3036_v20  ;;  %4798 = vmatpush3.bf16.msra.mxu1 %v3559_v27 }
 0x3af   :  { %v5063_v42 = vpop.eup %5062 }
 0x3b0   :  { %v5065_v6 = vpop.eup %5064  ;;  %v3117_v19 = vpack.c.bf16 %v5061_v38, %v5063_v42 }
 0x3b1   :  { %v5067_v15 = vpop.eup %5066  ;;  %v3038_v62 = vadd.f32 1.0, %v5065_v6 }
 0x3b2   :  { %v5069_v61 = vpop.eup %5068  ;;  %v3116_v48 = vpack.c.bf16 %v5067_v15, %v5059_v51 }
 0x3b3   :  { %v5071_v21 = vpop.eup %5070  ;;  %v3039_v33 = vadd.f32 1.0, %v5069_v61  ;;  %5078 = vrcp.f32 %v3038_v62  ;;  %v4955_v62 = vld [vmem:[%s7027_s7] sm:$0xff]  }
 0x3b4   :  { %v3040_v45 = vadd.f32 1.0, %v5071_v21  ;;  %4779 = vmatprep.mubr.msk.bf16.mxu1 %vm3136_vm3, %v3116_v48  ;;  %v6714_v61 = vld [vmem:[#allocation2] sm:$0xff]  ;;  %4807 = vmatprep.subr.bf16.mxu1 %v4955_v62 }
 0x3b5   :  { %5080 = vrcp.f32 %v3039_v33  ;;  %4780 = vmatmul.mubr.msk.bf16.gmra.mrb[88].mxu1 %vm3136_vm3, %v3117_v19  ;;  %3675 = vst.msk [vmem:[#allocation5] sm:$0xff] %vm3674_vm6, %v6714_v61  ;;  %3676 = vst.msk [vmem:[#allocation5 + $0x8] sm:$0xff] %vm3674_vm6, %v6714_v61 }
 0x3b6   :  { %v5073_v3 = vpop.eup %5072  ;;  %4783 = vmatprep.mubr.msk.bf16.mxu1 %vm3136_vm3, %v3118_v59  ;;  %5082 = vrcp.f32 %v3040_v45  ;;  %3678 = vst.msk [vmem:[#allocation5 + $0x90] sm:$0xff] %vm3674_vm6, %v6714_v61  ;;  %3679 = vst.msk [vmem:[#allocation5 + $0x98] sm:$0xff] %vm3674_vm6, %v6714_v61 }
 0x3b7   :  { %v3041_v14 = vadd.f32 1.0, %v5073_v3  ;;  %v5075_v10 = vpop.eup %5074  ;;  %3681 = vst.msk [vmem:[#allocation5 + $0x10] sm:$0xff] %vm3674_vm6, %v6714_v61  ;;  %3682 = vst.msk [vmem:[#allocation5 + $0x20] sm:$0xff] %vm3674_vm6, %v6714_v61 }
 0x3b8   :  { %v5077_v57 = vpop.eup %5076  ;;  %3683 = vst.msk [vmem:[#allocation5 + $0x30] sm:$0xff] %vm3674_vm6, %v6714_v61  ;;  %3684 = vst.msk [vmem:[#allocation5 + $0x40] sm:$0xff] %vm3674_vm6, %v6714_v61 }
 0x3b9   :  { %5084 = vrcp.f32 %v3041_v14  ;;  %v3119_v22 = vpack.c.bf16 %v5075_v10, %v5077_v57  ;;  %3685 = vst.msk [vmem:[#allocation5 + $0x50] sm:$0xff] %vm3674_vm6, %v6714_v61  ;;  %3686 = vst.msk [vmem:[#allocation5 + $0x60] sm:$0xff] %vm3674_vm6, %v6714_v61 }
 0x3ba   :  { %3687 = vst.msk [vmem:[#allocation5 + $0x70] sm:$0xff] %vm3674_vm6, %v6714_v61  ;;  %3688 = vst.msk [vmem:[#allocation5 + $0x80] sm:$0xff] %vm3674_vm6, %v6714_v61 }
 0x3bb   :  { %3690 = vst.msk [vmem:[#allocation5 + $0x18] sm:$0xf0] %vm3689_vm7, %v6714_v61  ;;  %3691 = vst.msk [vmem:[#allocation5 + $0x28] sm:$0xf0] %vm3689_vm7, %v6714_v61 }
 0x3bc   :  { %v4765_v37 = vpop.f32.mrb[72].mxu1  ;;  %3692 = vst.msk [vmem:[#allocation5 + $0x38] sm:$0xf0] %vm3689_vm7, %v6714_v61  ;;  %3693 = vst.msk [vmem:[#allocation5 + $0x48] sm:$0xf0] %vm3689_vm7, %v6714_v61 }
 0x3bd   :  { %v3248_v43 = vadd.f32 %v4765_v37, %v6538_v26  ;;  %4784 = vmatmul.mubr.msk.bf16.gmra.mrb[92].mxu1 %vm3136_vm3, %v3119_v22  ;;  %v3239_v7 = vpop.f32.mrb[73].mxu1  ;;  %v5079_v47 = vpop.eup %5078  ;;  %3694 = vst.msk [vmem:[#allocation5 + $0x58] sm:$0xf0] %vm3689_vm7, %v6714_v61  ;;  %3695 = vst.msk [vmem:[#allocation5 + $0x68] sm:$0xf0] %vm3689_vm7, %v6714_v61 }
 0x3be   :  { %v3240_v1 = vadd.f32 %v6538_v26, %v3239_v7  ;;  %v4766_v44 = vpop.f32.mrb[74].mxu1  ;;  %3696 = vst.msk [vmem:[#allocation5 + $0x78] sm:$0xf0] %vm3689_vm7, %v6714_v61  ;;  %3697 = vst.msk [vmem:[#allocation5 + $0x88] sm:$0xf0] %vm3689_vm7, %v6714_v61 }
 0x3bf   :  { %v5081_v58 = vpop.eup %5080  ;;  %3357 = vst.msk [vmem:[#allocation4 + $0x30] sm:$0xff] %vm3350_vm4, %v3248_v43  ;;  %v3251_v56 = vadd.f32 %v4766_v44, %v6538_v26  ;;  %v3242_v52 = vpop.f32.mrb[75].mxu1 }
 0x3c0   :  { %3355 = vst.msk [vmem:[#allocation4 + $0x20] sm:$0xff] %vm3350_vm4, %v3240_v1  ;;  %v3243_v9 = vadd.f32 %v6538_v26, %v3242_v52  ;;  %v3120_v5 = vpack.c.bf16 %v5081_v58, %v5079_v47  ;;  %v5083_v16 = vpop.eup %5082 }
 0x3c1   :  { %3358 = vst.msk [vmem:[#allocation4 + $0x38] sm:$0xff] %vm3350_vm4, %v3251_v56 }
 0x3c2   :  { %3356 = vst.msk [vmem:[#allocation4 + $0x28] sm:$0xff] %vm3350_vm4, %v3243_v9  ;;  %4787 = vmatprep.mubr.msk.bf16.mxu1 %vm3136_vm3, %v3120_v5 }
 0x3c3   :  { %v5085_v8 = vpop.eup %5084 }
 0x3c4   :  { %v3121_v24 = vpack.c.bf16 %v5085_v8, %v5083_v16 }
 0x3c6   :  { %v3402_v46 = vld [vmem:[#allocation4 + $0x30] sm:$0xff]  ;;  %4788 = vmatmul.mubr.msk.bf16.gmra.mrb[96].mxu1 %vm3136_vm3, %v3121_v24 }
 0x3c7   :  { %v3385_v18 = vld [vmem:[#allocation4 + $0x20] sm:$0xff] }
 0x3c8   :  { %v3418_v53 = vmax.f32 %v3385_v18, %v3402_v46  ;;  %v3403_v41 = vld [vmem:[#allocation4 + $0x38] sm:$0xff]  ;;  %v4956_v46 = vld [vmem:[%s7027_s7 + $0x8] sm:$0xff]   ;;  %v4957_v18 = vld [vmem:[%s7027_s7 + $0x10] sm:$0x3f]  }
 0x3c9   :  { %v3386_v0 = vld [vmem:[#allocation4 + $0x28] sm:$0xff] }
 0x3ca   :  { %3434 = vst.msk [vmem:[#allocation4 + $0x10] sm:$0xff] %vm3350_vm4, %v3418_v53  ;;  %v3419_v49 = vmax.f32 %v3386_v0, %v3403_v41  ;;  %v3819_v53 = vsel %vm3557_vm5, %v4957_v18, 0 }
 0x3cc   :  { %3435 = vst.msk [vmem:[#allocation4 + $0x18] sm:$0xff] %vm3350_vm4, %v3419_v49 }
 0x3d3   :  { %v3450_v36 = vld [vmem:[#allocation4 + $0x10] ss:$2 sm:$0xff]  ;;  %v3466_v50 = vld [vmem:[#allocation4 + $0x11] ss:$2 sm:$0xff] }
 0x3d4   :  { %v3480_v54 = vmax.f32 %v3450_v36, %v3466_v50 }
 0x3d6   :  { %v3488_v31 = vmul.f32 %v3480_v54, %v3480_v54 }
 0x3d8   :  { %v3496_v30 = vadd.f32 %v3488_v31, %v3480_v54 }
 0x3da   :  { %v3503_v28 = vpack.c.bf16 %v3496_v30, %v3495_v23 }
 0x3dc   :  { %4799 = vmatprep.mubr.msk.bf16.mxu1 %vm3350_vm4, %v3503_v28 }
 0x3fc   :  { %v4769_v29 = vpop.f32.mrb[76].mxu1 }
 0x3fd   :  { %v3264_v11 = vadd.f32 %v4769_v29, %v6538_v26  ;;  %v3255_v60 = vpop.f32.mrb[77].mxu1 }
 0x3fe   :  { %v3256_v34 = vadd.f32 %v6538_v26, %v3255_v60  ;;  %v4770_v35 = vpop.f32.mrb[78].mxu1 }
 0x3ff   :  { %3361 = vst.msk [vmem:[#allocation4 + $0x50] sm:$0xff] %vm3350_vm4, %v3264_v11  ;;  %v3267_v40 = vadd.f32 %v4770_v35, %v6538_v26  ;;  %v3258_v2 = vpop.f32.mrb[79].mxu1 }
 0x400   :  { %3359 = vst.msk [vmem:[#allocation4 + $0x40] sm:$0xff] %vm3350_vm4, %v3256_v34  ;;  %v3259_v63 = vadd.f32 %v6538_v26, %v3258_v2 }
 0x401   :  { %3362 = vst.msk [vmem:[#allocation4 + $0x58] sm:$0xff] %vm3350_vm4, %v3267_v40 }
 0x402   :  { %3360 = vst.msk [vmem:[#allocation4 + $0x48] sm:$0xff] %vm3350_vm4, %v3259_v63 }
 0x406   :  { %v3404_v51 = vld [vmem:[#allocation4 + $0x50] sm:$0xff] }
 0x407   :  { %v3387_v20 = vld [vmem:[#allocation4 + $0x40] sm:$0xff] }
 0x408   :  { %v3420_v38 = vmax.f32 %v3387_v20, %v3404_v51  ;;  %v3405_v42 = vld [vmem:[#allocation4 + $0x58] sm:$0xff] }
 0x409   :  { %v3388_v6 = vld [vmem:[#allocation4 + $0x48] sm:$0xff] }
 0x40a   :  { %3436 = vst.msk [vmem:[#allocation4 + $0x20] sm:$0xff] %vm3350_vm4, %v3420_v38  ;;  %v3421_v15 = vmax.f32 %v3388_v6, %v3405_v42 }
 0x40c   :  { %3437 = vst.msk [vmem:[#allocation4 + $0x28] sm:$0xff] %vm3350_vm4, %v3421_v15 }
 0x413   :  { %v3452_v47 = vld [vmem:[#allocation4 + $0x20] ss:$2 sm:$0xff]  ;;  %v3468_v1 = vld [vmem:[#allocation4 + $0x21] ss:$2 sm:$0xff] }
 0x414   :  { %v3481_v44 = vmax.f32 %v3452_v47, %v3468_v1 }
 0x416   :  { %v3489_v9 = vmul.f32 %v3481_v44, %v3481_v44 }
 0x418   :  { %v3497_v16 = vadd.f32 %v3489_v9, %v3481_v44 }
 0x43c   :  { %v4773_v48 = vpop.f32.mrb[80].mxu1 }
 0x43d   :  { %v3280_v21 = vadd.f32 %v4773_v48, %v6538_v26  ;;  %v3271_v33 = vpop.f32.mrb[81].mxu1 }
 0x43e   :  { %v3272_v19 = vadd.f32 %v6538_v26, %v3271_v33  ;;  %v4774_v45 = vpop.f32.mrb[82].mxu1 }
 0x43f   :  { %3365 = vst.msk [vmem:[#allocation4 + $0x70] sm:$0xff] %vm3350_vm4, %v3280_v21  ;;  %v3283_v59 = vadd.f32 %v4774_v45, %v6538_v26  ;;  %v3274_v3 = vpop.f32.mrb[83].mxu1 }
 0x440   :  { %3363 = vst.msk [vmem:[#allocation4 + $0x60] sm:$0xff] %vm3350_vm4, %v3272_v19  ;;  %v3275_v14 = vadd.f32 %v6538_v26, %v3274_v3 }
 0x441   :  { %3366 = vst.msk [vmem:[#allocation4 + $0x78] sm:$0xff] %vm3350_vm4, %v3283_v59 }
 0x442   :  { %3364 = vst.msk [vmem:[#allocation4 + $0x68] sm:$0xff] %vm3350_vm4, %v3275_v14 }
 0x446   :  { %v3406_v10 = vld [vmem:[#allocation4 + $0x70] sm:$0xff] }
 0x447   :  { %v3389_v57 = vld [vmem:[#allocation4 + $0x60] sm:$0xff] }
 0x448   :  { %v3422_v22 = vmax.f32 %v3389_v57, %v3406_v10  ;;  %v3407_v37 = vld [vmem:[#allocation4 + $0x78] sm:$0xff] }
 0x449   :  { %v3390_v43 = vld [vmem:[#allocation4 + $0x68] sm:$0xff] }
 0x44a   :  { %3438 = vst.msk [vmem:[#allocation4 + $0x30] sm:$0xff] %vm3350_vm4, %v3422_v22  ;;  %v3423_v7 = vmax.f32 %v3390_v43, %v3407_v37 }
 0x44c   :  { %3439 = vst.msk [vmem:[#allocation4 + $0x38] sm:$0xff] %vm3350_vm4, %v3423_v7 }
 0x453   :  { %v3454_v58 = vld [vmem:[#allocation4 + $0x30] ss:$2 sm:$0xff]  ;;  %v3470_v56 = vld [vmem:[#allocation4 + $0x31] ss:$2 sm:$0xff] }
 0x454   :  { %v3482_v52 = vmax.f32 %v3454_v58, %v3470_v56 }
 0x456   :  { %v3490_v5 = vmul.f32 %v3482_v52, %v3482_v52 }
 0x458   :  { %v3498_v8 = vadd.f32 %v3490_v5, %v3482_v52 }
 0x45a   :  { %v3504_v24 = vpack.c.bf16 %v3498_v8, %v3497_v16 }
 0x45c   :  { %4800 = vmatmul.mubr.msk.bf16.vlgmr.msra.gmra.mrb[100].mxu1 %vm3350_vm4, %v3504_v24 }
 0x45d   :  { %4808 = vmatpush3.bf16.msra.mxu1 %v4955_v62 }
 0x45e   :  { %4809 = vmatprep.subr.bf16.mxu1 %v4956_v46 }
 0x461   :  { %4810 = vmatpush3.bf16.msra.mxu1 %v4956_v46 }
 0x462   :  { %4879 = vmatprep.subr.msk.bf16.mxu1 %vm3557_vm5, %v4957_v18 }
 0x465   :  { %4812 = vmatpush3.bf16.msra.mxu1 %v3819_v53 }
 0x47c   :  { %v4777_v41 = vpop.f32.mrb[84].mxu1 }
 0x47d   :  { %v3296_v0 = vadd.f32 %v4777_v41, %v6538_v26  ;;  %v3287_v49 = vpop.f32.mrb[85].mxu1 }
 0x47e   :  { %v3288_v39 = vadd.f32 %v6538_v26, %v3287_v49  ;;  %v4778_v25 = vpop.f32.mrb[86].mxu1 }
 0x47f   :  { %3369 = vst.msk [vmem:[#allocation4 + $0x90] sm:$0xff] %vm3350_vm4, %v3296_v0  ;;  %v3299_v12 = vadd.f32 %v4778_v25, %v6538_v26  ;;  %v3290_v32 = vpop.f32.mrb[87].mxu1 }
 0x480   :  { %3367 = vst.msk [vmem:[#allocation4 + $0x80] sm:$0xff] %vm3350_vm4, %v3288_v39  ;;  %v3291_v55 = vadd.f32 %v6538_v26, %v3290_v32 }
 0x481   :  { %3370 = vst.msk [vmem:[#allocation4 + $0x98] sm:$0xff] %vm3350_vm4, %v3299_v12 }
 0x482   :  { %3368 = vst.msk [vmem:[#allocation4 + $0x88] sm:$0xff] %vm3350_vm4, %v3291_v55 }
 0x486   :  { %v3408_v13 = vld [vmem:[#allocation4 + $0x90] sm:$0xff] }
 0x487   :  { %v3391_v36 = vld [vmem:[#allocation4 + $0x80] sm:$0xff] }
 0x488   :  { %v3424_v50 = vmax.f32 %v3391_v36, %v3408_v13  ;;  %v3409_v54 = vld [vmem:[#allocation4 + $0x98] sm:$0xff]  ;;  %v4781_v4 = vpop.f32.mrb[88].mxu1 }
 0x489   :  { %v3392_v17 = vld [vmem:[#allocation4 + $0x88] sm:$0xff]  ;;  %v3312_v31 = vadd.f32 %v4781_v4, %v6538_v26  ;;  %v3303_v23 = vpop.f32.mrb[89].mxu1 }
 0x48a   :  { %3440 = vst.msk [vmem:[#allocation4 + $0x40] sm:$0xff] %vm3350_vm4, %v3424_v50  ;;  %v3425_v30 = vmax.f32 %v3392_v17, %v3409_v54  ;;  %v3304_v27 = vadd.f32 %v6538_v26, %v3303_v23  ;;  %v4782_v28 = vpop.f32.mrb[90].mxu1  ;;  %v3715_v23 = vld [vmem:[#allocation5] sm:$0xff] }
 0x48b   :  { %3373 = vst.msk [vmem:[#allocation4 + $0xb0] sm:$0xff] %vm3350_vm4, %v3312_v31  ;;  %v3315_v29 = vadd.f32 %v4782_v28, %v6538_v26  ;;  %v3306_v11 = vpop.f32.mrb[91].mxu1  ;;  %v6815_v28 = vld [vmem:[%s7026_s6] ss:$0 sm:$0xff]  ;;  %s5221_s6 = smov 115  }
 0x48c   :  { %3441 = vst.msk [vmem:[#allocation4 + $0x48] sm:$0xff] %vm3350_vm4, %v3425_v30  ;;  %3371 = vst.msk [vmem:[#allocation4 + $0xa0] sm:$0xff] %vm3350_vm4, %v3304_v27  ;;  %v3307_v60 = vadd.f32 %v6538_v26, %v3306_v11  ;;  %v3716_v30 = vld [vmem:[#allocation5 + $0x8] sm:$0xff]  ;;  %v3717_v27 = vld [vmem:[#allocation5 + $0x10] sm:$0xff] }
 0x48d   :  { %3374 = vst.msk [vmem:[#allocation4 + $0xb8] sm:$0xff] %vm3350_vm4, %v3315_v29 }
 0x48e   :  { %3372 = vst.msk [vmem:[#allocation4 + $0xa8] sm:$0xff] %vm3350_vm4, %v3307_v60 }
 0x490   :  { %v4785_v34 = vpop.f32.mrb[92].mxu1 }
 0x491   :  { %v3328_v35 = vadd.f32 %v4785_v34, %v6538_v26  ;;  %v3319_v40 = vpop.f32.mrb[93].mxu1 }
 0x492   :  { %v3410_v2 = vld [vmem:[#allocation4 + $0xb0] sm:$0xff]  ;;  %v3320_v63 = vadd.f32 %v6538_v26, %v3319_v40  ;;  %v4786_v51 = vpop.f32.mrb[94].mxu1 }
 0x493   :  { %v3393_v20 = vld [vmem:[#allocation4 + $0xa0] sm:$0xff]  ;;  %3377 = vst.msk [vmem:[#allocation4 + $0xd0] sm:$0xff] %vm3350_vm4, %v3328_v35  ;;  %v3331_v38 = vadd.f32 %v4786_v51, %v6538_v26  ;;  %v3322_v42 = vpop.f32.mrb[95].mxu1 }
 0x494   :  { %v3426_v6 = vmax.f32 %v3393_v20, %v3410_v2  ;;  %v3411_v15 = vld [vmem:[#allocation4 + $0xb8] sm:$0xff]  ;;  %3375 = vst.msk [vmem:[#allocation4 + $0xc0] sm:$0xff] %vm3350_vm4, %v3320_v63  ;;  %v3323_v62 = vadd.f32 %v6538_v26, %v3322_v42  ;;  %v3456_v19 = vld [vmem:[#allocation4 + $0x40] ss:$2 sm:$0xff]  ;;  %v3472_v45 = vld [vmem:[#allocation4 + $0x41] ss:$2 sm:$0xff] }
 0x495   :  { %v3394_v48 = vld [vmem:[#allocation4 + $0xa8] sm:$0xff]  ;;  %3378 = vst.msk [vmem:[#allocation4 + $0xd8] sm:$0xff] %vm3350_vm4, %v3331_v38  ;;  %v3483_v1 = vmax.f32 %v3456_v19, %v3472_v45 }
 0x496   :  { %3442 = vst.msk [vmem:[#allocation4 + $0x50] sm:$0xff] %vm3350_vm4, %v3426_v6  ;;  %v3427_v21 = vmax.f32 %v3394_v48, %v3411_v15  ;;  %3376 = vst.msk [vmem:[#allocation4 + $0xc8] sm:$0xff] %vm3350_vm4, %v3323_v62 }
 0x497   :  { %v3491_v16 = vmul.f32 %v3483_v1, %v3483_v1 }
 0x498   :  { %3443 = vst.msk [vmem:[#allocation4 + $0x58] sm:$0xff] %vm3350_vm4, %v3427_v21 }
 0x499   :  { %v4789_v33 = vpop.f32.mrb[96].mxu1  ;;  %v3499_v18 = vadd.f32 %v3491_v16, %v3483_v1 }
 0x49a   :  { %v3412_v59 = vld [vmem:[#allocation4 + $0xd0] sm:$0xff]  ;;  %v3344_v3 = vadd.f32 %v4789_v33, %v6538_v26  ;;  %v3335_v14 = vpop.f32.mrb[97].mxu1 }
 0x49b   :  { %v3395_v10 = vld [vmem:[#allocation4 + $0xc0] sm:$0xff]  ;;  %v3336_v57 = vadd.f32 %v6538_v26, %v3335_v14  ;;  %v4790_v22 = vpop.f32.mrb[98].mxu1 }
 0x49c   :  { %v3428_v37 = vmax.f32 %v3395_v10, %v3412_v59  ;;  %v3413_v43 = vld [vmem:[#allocation4 + $0xd8] sm:$0xff]  ;;  %3381 = vst.msk [vmem:[#allocation4 + $0xf0] sm:$0xff] %vm3350_vm4, %v3344_v3  ;;  %v3347_v7 = vadd.f32 %v4790_v22, %v6538_v26  ;;  %v3338_v47 = vpop.f32.mrb[99].mxu1 }
 0x49d   :  { %v3396_v44 = vld [vmem:[#allocation4 + $0xc8] sm:$0xff]  ;;  %3379 = vst.msk [vmem:[#allocation4 + $0xe0] sm:$0xff] %vm3350_vm4, %v3336_v57  ;;  %v3339_v58 = vadd.f32 %v6538_v26, %v3338_v47  ;;  %v3721_v47 = vld [vmem:[#allocation5 + $0x30] sm:$0xff] }
 0x49e   :  { %3444 = vst.msk [vmem:[#allocation4 + $0x60] sm:$0xff] %vm3350_vm4, %v3428_v37  ;;  %v3429_v56 = vmax.f32 %v3396_v44, %v3413_v43  ;;  %3382 = vst.msk [vmem:[#allocation4 + $0xf8] sm:$0xff] %vm3350_vm4, %v3347_v7  ;;  %v3719_v43 = vld [vmem:[#allocation5 + $0x20] sm:$0xff] }
 0x49f   :  { %3380 = vst.msk [vmem:[#allocation4 + $0xe8] sm:$0xff] %vm3350_vm4, %v3339_v58  ;;  %v3458_v52 = vld [vmem:[#allocation4 + $0x50] ss:$2 sm:$0xff]  ;;  %v3474_v9 = vld [vmem:[#allocation4 + $0x51] ss:$2 sm:$0xff]  ;;  %v3723_v44 = vld [vmem:[#allocation5 + $0x40] sm:$0xff] }
 0x4a0   :  { %3445 = vst.msk [vmem:[#allocation4 + $0x68] sm:$0xff] %vm3350_vm4, %v3429_v56  ;;  %v3484_v5 = vmax.f32 %v3458_v52, %v3474_v9  ;;  %v3725_v56 = vld [vmem:[#allocation5 + $0x50] sm:$0xff] }
 0x4a2   :  { %v3492_v8 = vmul.f32 %v3484_v5, %v3484_v5 }
 0x4a3   :  { %v3414_v24 = vld [vmem:[#allocation4 + $0xf0] sm:$0xff] }
 0x4a4   :  { %v3397_v46 = vld [vmem:[#allocation4 + $0xe0] sm:$0xff]  ;;  %v3500_v53 = vadd.f32 %v3492_v8, %v3484_v5 }
 0x4a5   :  { %v3430_v41 = vmax.f32 %v3397_v46, %v3414_v24  ;;  %v3415_v26 = vld [vmem:[#allocation4 + $0xf8] sm:$0xff] }
 0x4a6   :  { %v3398_v0 = vld [vmem:[#allocation4 + $0xe8] sm:$0xff]  ;;  %v3505_v49 = vpack.c.bf16 %v3500_v53, %v3499_v18 }
 0x4a7   :  { %3446 = vst.msk [vmem:[#allocation4 + $0x70] sm:$0xff] %vm3350_vm4, %v3430_v41  ;;  %v3431_v39 = vmax.f32 %v3398_v0, %v3415_v26  ;;  %v3460_v25 = vld [vmem:[#allocation4 + $0x60] ss:$2 sm:$0xff]  ;;  %v3476_v12 = vld [vmem:[#allocation4 + $0x61] ss:$2 sm:$0xff] }
 0x4a8   :  { %4803 = vmatprep.mubr.msk.bf16.mxu1 %vm3350_vm4, %v3505_v49  ;;  %v3485_v32 = vmax.f32 %v3460_v25, %v3476_v12 }
 0x4a9   :  { %3447 = vst.msk [vmem:[#allocation4 + $0x78] sm:$0xff] %vm3350_vm4, %v3431_v39 }
 0x4aa   :  { %v3493_v50 = vmul.f32 %v3485_v32, %v3485_v32 }
 0x4ac   :  { %v3501_v4 = vadd.f32 %v3493_v50, %v3485_v32 }
 0x4b0   :  { %v3462_v55 = vld [vmem:[#allocation4 + $0x70] ss:$2 sm:$0xff]  ;;  %v3478_v13 = vld [vmem:[#allocation4 + $0x71] ss:$2 sm:$0xff] }
 0x4b1   :  { %v3486_v36 = vmax.f32 %v3462_v55, %v3478_v13 }
 0x4b3   :  { %v3494_v54 = vmul.f32 %v3486_v36, %v3486_v36 }
 0x4b5   :  { %v3502_v17 = vadd.f32 %v3494_v54, %v3486_v36 }
 0x4b7   :  { %v3506_v31 = vpack.c.bf16 %v3502_v17, %v3501_v4 }
 0x4b9   :  { %4804 = vmatmul.mubr.msk.bf16.gmra.mrb[104].mxu1 %vm3350_vm4, %v3506_v31 }
 0x4ba   :  { %4813 = vmatprep.mubr.msk.bf16.mxu1 %vm3674_vm6, %v3715_v23 }
 0x4c1   :  { %4814 = vmatmul.mubr.msk.bf16.vlgmr.msra.gmra.mrb[108].mxu1 %vm3674_vm6, %v3716_v30 }
 0x4c2   :  { %4817 = vmatprep.mubr.msk.bf16.mxu1 %vm3674_vm6, %v3717_v27 }
 0x52f   :  { %v4801_v29 = vpop.f32.mrb[100].mxu1 }
 0x530   :  { %v3604_v11 = vadd.f32 %v4801_v29, %v6815_v28  ;;  %v3595_v60 = vpop.f32.mrb[101].mxu1 }
 0x531   :  { %v3596_v34 = vadd.f32 %v6815_v28, %v3595_v60  ;;  %v4802_v35 = vpop.f32.mrb[102].mxu1 }
 0x532   :  { %v4678_v40 = vmul.f32 -1.442695, %v3604_v11  ;;  %v3607_v2 = vadd.f32 %v4802_v35, %v6815_v28  ;;  %v3598_v63 = vpop.f32.mrb[103].mxu1 }
 0x533   :  { %v4676_v61 = vmul.f32 -1.442695, %v3596_v34  ;;  %v3599_v51 = vadd.f32 %v6815_v28, %v3598_v63 }
 0x534   :  { %5086 = vpow2.f32 %v4678_v40  ;;  %v4679_v20 = vmul.f32 -1.442695, %v3607_v2  ;;  %v3727_v2 = vld [vmem:[#allocation5 + $0x60] sm:$0xff] }
 0x535   :  { %5088 = vpow2.f32 %v4676_v61  ;;  %v4677_v38 = vmul.f32 -1.442695, %v3599_v51  ;;  %v3729_v61 = vld [vmem:[#allocation5 + $0x70] sm:$0xff] }
 0x536   :  { %5090 = vpow2.f32 %v4679_v20  ;;  %v3731_v20 = vld [vmem:[#allocation5 + $0x80] sm:$0xff] }
 0x537   :  { %5092 = vpow2.f32 %v4677_v38 }
 0x53e   :  { %v5087_v42 = vpop.eup %5086 }
 0x53f   :  { %v5089_v6 = vpop.eup %5088  ;;  %v3652_v15 = vadd.f32 1.0, %v5087_v42  ;;  %v3733_v42 = vld [vmem:[#allocation5 + $0x90] sm:$0xff] }
 0x540   :  { %v5091_v62 = vpop.eup %5090  ;;  %v3650_v48 = vadd.f32 1.0, %v5089_v6 }
 0x541   :  { %v5093_v21 = vpop.eup %5092  ;;  %5094 = vrcp.f32 %v3652_v15  ;;  %v3653_v33 = vadd.f32 1.0, %v5091_v62  ;;  %v3734_v15 = vld [vmem:[#allocation5 + $0x98] sm:$0xff] }
 0x542   :  { %5096 = vrcp.f32 %v3650_v48  ;;  %v3651_v19 = vadd.f32 1.0, %v5093_v21 }
 0x543   :  { %5098 = vrcp.f32 %v3653_v33 }
 0x544   :  { %5100 = vrcp.f32 %v3651_v19 }
 0x54b   :  { %v5095_v45 = vpop.eup %5094 }
 0x54c   :  { %v5097_v59 = vpop.eup %5096  ;;  %v3700_v3 = vpack.c.bf16 %v5095_v45, %v5095_v45 }
 0x54d   :  { %v5099_v14 = vpop.eup %5098  ;;  %v3698_v10 = vpack.c.bf16 %v5097_v59, %v5097_v59 }
 0x54e   :  { %v5101_v57 = vpop.eup %5100  ;;  %3709 = vst.msk [vmem:[#allocation5 + $0x38] sm:$0xf] %vm3706_vm8, %v3700_v3  ;;  %v3701_v22 = vpack.c.bf16 %v5099_v14, %v5099_v14 }
 0x54f   :  { %3707 = vst.msk [vmem:[#allocation5 + $0x18] sm:$0xf] %vm3706_vm8, %v3698_v10  ;;  %v3699_v37 = vpack.c.bf16 %v5101_v57, %v5101_v57 }
 0x550   :  { %3710 = vst.msk [vmem:[#allocation5 + $0x48] sm:$0xf] %vm3706_vm8, %v3701_v22 }
 0x551   :  { %3708 = vst.msk [vmem:[#allocation5 + $0x28] sm:$0xf] %vm3706_vm8, %v3699_v37 }
 0x555   :  { %v3722_v58 = vld [vmem:[#allocation5 + $0x38] sm:$0xff] }
 0x556   :  { %v3718_v7 = vld [vmem:[#allocation5 + $0x18] sm:$0xff] }
 0x557   :  { %4818 = vmatmul.mubr.msk.bf16.gmra.mrb[112].mxu1 %vm3674_vm6, %v3718_v7  ;;  %v3724_v52 = vld [vmem:[#allocation5 + $0x48] sm:$0xff] }
 0x558   :  { %4821 = vmatprep.mubr.msk.bf16.mxu1 %vm3674_vm6, %v3719_v43  ;;  %v3720_v1 = vld [vmem:[#allocation5 + $0x28] sm:$0xff] }
 0x55f   :  { %4822 = vmatmul.mubr.msk.bf16.gmra.mrb[116].mxu1 %vm3674_vm6, %v3720_v1 }
 0x560   :  { %4825 = vmatprep.mubr.msk.bf16.mxu1 %vm3674_vm6, %v3721_v47 }
 0x567   :  { %4826 = vmatmul.mubr.msk.bf16.gmra.mrb[120].mxu1 %vm3674_vm6, %v3722_v58 }
 0x568   :  { %4829 = vmatprep.mubr.msk.bf16.mxu1 %vm3674_vm6, %v3723_v44 }
 0x56f   :  { %4830 = vmatmul.mubr.msk.bf16.gmra.mrb[124].mxu1 %vm3674_vm6, %v3724_v52 }
 0x570   :  { %4833 = vmatprep.mubr.msk.bf16.mxu1 %vm3674_vm6, %v3725_v56 }
 0x58c   :  { %v4805_v9 = vpop.f32.mrb[104].mxu1 }
 0x58d   :  { %v3620_v5 = vadd.f32 %v4805_v9, %v6815_v28  ;;  %v3611_v16 = vpop.f32.mrb[105].mxu1 }
 0x58e   :  { %v3612_v8 = vadd.f32 %v6815_v28, %v3611_v16  ;;  %v4806_v24 = vpop.f32.mrb[106].mxu1 }
 0x58f   :  { %v4682_v46 = vmul.f32 -1.442695, %v3620_v5  ;;  %v3623_v18 = vadd.f32 %v4806_v24, %v6815_v28  ;;  %v3614_v53 = vpop.f32.mrb[107].mxu1 }
 0x590   :  { %v4680_v41 = vmul.f32 -1.442695, %v3612_v8  ;;  %v3615_v26 = vadd.f32 %v6815_v28, %v3614_v53 }
 0x591   :  { %5102 = vpow2.f32 %v4682_v46  ;;  %v4683_v0 = vmul.f32 -1.442695, %v3623_v18 }
 0x592   :  { %5104 = vpow2.f32 %v4680_v41  ;;  %v4681_v49 = vmul.f32 -1.442695, %v3615_v26 }
 0x593   :  { %5106 = vpow2.f32 %v4683_v0 }
 0x594   :  { %5108 = vpow2.f32 %v4681_v49  ;;  %v4815_v39 = vpop.f32.mrb[108].mxu1 }
 0x595   :  { %4017 = vst.msk [vmem:[#allocation6 + $0x10] sm:$0xff] %vm4014_vm9, %v4815_v39  ;;  %v3855_v25 = vpop.f32.mrb[109].mxu1 }
 0x596   :  { %v4816_v12 = vpop.f32.mrb[110].mxu1 }
 0x597   :  { %4018 = vst.msk [vmem:[#allocation6 + $0x18] sm:$0xff] %vm4014_vm9, %v4816_v12  ;;  %v3858_v32 = vpop.f32.mrb[111].mxu1 }
 0x598   :  { %4016 = vst.msk [vmem:[#allocation6 + $0x8] sm:$0xff] %vm4014_vm9, %v3858_v32 }
 0x59b   :  { %v5103_v55 = vpop.eup %5102 }
 0x59c   :  { %v5105_v13 = vpop.eup %5104  ;;  %v3656_v36 = vadd.f32 1.0, %v5103_v55  ;;  %v4063_v50 = vld [vmem:[#allocation6 + $0x10] sm:$0xff] }
 0x59d   :  { %v5107_v54 = vpop.eup %5106  ;;  %v3654_v4 = vadd.f32 1.0, %v5105_v13  ;;  %4079 = vrot.lane.b32.xlu0 %v4063_v50, %s5221_s6 }
 0x59e   :  { %v5109_v17 = vpop.eup %5108  ;;  %5110 = vrcp.f32 %v3656_v36  ;;  %v3657_v31 = vadd.f32 1.0, %v5107_v54  ;;  %v4111_v23 = vld [vmem:[#allocation6 + $0x11] sm:$0xff] }
 0x59f   :  { %5112 = vrcp.f32 %v3654_v4  ;;  %v3655_v30 = vadd.f32 1.0, %v5109_v17 }
 0x5a0   :  { %5114 = vrcp.f32 %v3657_v31 }
 0x5a1   :  { %5116 = vrcp.f32 %v3655_v30  ;;  %4127 = vrot.lane.b32.xlu0 %v4111_v23, %s5222_s18 }
 0x5a8   :  { %v5111_v27 = vpop.eup %5110 }
 0x5a9   :  { %v5113_v28 = vpop.eup %5112  ;;  %v3704_v29 = vpack.c.bf16 %v5111_v27, %v5111_v27 }
 0x5aa   :  { %v5115_v11 = vpop.eup %5114  ;;  %v3702_v60 = vpack.c.bf16 %v5113_v28, %v5113_v28 }
 0x5ab   :  { %v5117_v34 = vpop.eup %5116  ;;  %3713 = vst.msk [vmem:[#allocation5 + $0x78] sm:$0xf] %vm3706_vm8, %v3704_v29  ;;  %v3705_v35 = vpack.c.bf16 %v5115_v11, %v5115_v11 }
 0x5ac   :  { %3711 = vst.msk [vmem:[#allocation5 + $0x58] sm:$0xf] %vm3706_vm8, %v3702_v60  ;;  %v3703_v40 = vpack.c.bf16 %v5117_v34, %v5117_v34  ;;  %v4055_v60 = vld [vmem:[#allocation6 + $0xf] sm:$0xff] }
 0x5ad   :  { %3714 = vst.msk [vmem:[#allocation5 + $0x88] sm:$0xf] %vm3706_vm8, %v3705_v35 }
 0x5ae   :  { %3712 = vst.msk [vmem:[#allocation5 + $0x68] sm:$0xf] %vm3706_vm8, %v3703_v40 }
 0x5b2   :  { %v3730_v38 = vld [vmem:[#allocation5 + $0x78] sm:$0xff] }
 0x5b3   :  { %v3726_v63 = vld [vmem:[#allocation5 + $0x58] sm:$0xff] }
 0x5b4   :  { %4834 = vmatmul.mubr.msk.bf16.gmra.mrb[128].mxu1 %vm3674_vm6, %v3726_v63  ;;  %v3732_v6 = vld [vmem:[#allocation5 + $0x88] sm:$0xff] }
 0x5b5   :  { %4837 = vmatprep.mubr.msk.bf16.mxu1 %vm3674_vm6, %v3727_v2  ;;  %v3728_v51 = vld [vmem:[#allocation5 + $0x68] sm:$0xff] }
 0x5bc   :  { %4838 = vmatmul.mubr.msk.bf16.gmra.mrb[132].mxu1 %vm3674_vm6, %v3728_v51 }
 0x5bd   :  { %4841 = vmatprep.mubr.msk.bf16.mxu1 %vm3674_vm6, %v3729_v61 }
 0x5c4   :  { %4842 = vmatmul.mubr.msk.bf16.gmra.mrb[136].mxu1 %vm3674_vm6, %v3730_v38 }
 0x5c5   :  { %4845 = vmatprep.mubr.msk.bf16.mxu1 %vm3674_vm6, %v3731_v20 }
 0x5cc   :  { %4846 = vmatmul.mubr.msk.bf16.gmra.mrb[140].mxu1 %vm3674_vm6, %v3732_v6 }
 0x5cd   :  { %4849 = vmatprep.mubr.msk.bf16.mxu1 %vm3674_vm6, %v3733_v42 }
 0x5d4   :  { %4850 = vmatmul.mubr.msk.bf16.gmra.mrb[144].mxu1 %vm3674_vm6, %v3734_v15 }
 0x60f   :  { %v4080_v17 = vpop.permute.xlu0 %4079 }
 0x610   :  { %v4103_v2 = vadd.f32 %v4080_v17, %v4055_v60 }
 0x613   :  { %v4128_v27 = vpop.permute.xlu0 %4127 }
 0x62a   :  { %v4819_v62 = vpop.f32.mrb[112].mxu1 }
 0x62b   :  { %4021 = vst.msk [vmem:[#allocation6 + $0x30] sm:$0xff] %vm4014_vm9, %v4819_v62  ;;  %v3871_v48 = vpop.f32.mrb[113].mxu1  ;;  %v4151_v62 = vadd.f32 %v4128_v27, %v4103_v2 }
 0x62c   :  { %v4820_v21 = vpop.f32.mrb[114].mxu1 }
 0x62d   :  { %4022 = vst.msk [vmem:[#allocation6 + $0x38] sm:$0xff] %vm4014_vm9, %v4820_v21  ;;  %v3874_v33 = vpop.f32.mrb[115].mxu1 }
 0x62e   :  { %4020 = vst.msk [vmem:[#allocation6 + $0x28] sm:$0xff] %vm4014_vm9, %v3874_v33 }
 0x632   :  { %v4823_v19 = vpop.f32.mrb[116].mxu1  ;;  %v4208_v45 = vld [vmem:[#allocation6 + $0x30] sm:$0xff] }
 0x633   :  { %4025 = vst.msk [vmem:[#allocation6 + $0x50] sm:$0xff] %vm4014_vm9, %v4823_v19  ;;  %4224 = vrot.lane.b32.xlu0 %v4208_v45, %s5223_s19  ;;  %4081 = vrot.lane.b32.xlu1 %v4208_v45, %s5221_s6  ;;  %v3887_v59 = vpop.f32.mrb[117].mxu1 }
 0x634   :  { %v4824_v3 = vpop.f32.mrb[118].mxu1  ;;  %v4256_v10 = vld [vmem:[#allocation6 + $0x31] sm:$0xff] }
 0x635   :  { %4026 = vst.msk [vmem:[#allocation6 + $0x58] sm:$0xff] %vm4014_vm9, %v4824_v3  ;;  %v3890_v14 = vpop.f32.mrb[119].mxu1  ;;  %v6865_v22 = vld [vmem:[#allocation6 + $0x2f] sm:$0xff] }
 0x636   :  { %4024 = vst.msk [vmem:[#allocation6 + $0x48] sm:$0xff] %vm4014_vm9, %v3890_v14 }
 0x637   :  { %4272 = vrot.lane.b32.xlu0 %v4256_v10, %s5224_s20  ;;  %4129 = vrot.lane.b32.xlu1 %v4256_v10, %s5222_s18 }
 0x63a   :  { %v4827_v57 = vpop.f32.mrb[120].mxu1  ;;  %v4209_v37 = vld [vmem:[#allocation6 + $0x50] sm:$0xff] }
 0x63b   :  { %4029 = vst.msk [vmem:[#allocation6 + $0x70] sm:$0xff] %vm4014_vm9, %v4827_v57  ;;  %4176 = vrot.lane.b32.xlu0 %v6865_v22, %s5225_s21  ;;  %4226 = vrot.lane.b32.xlu1 %v4209_v37, %s5223_s19  ;;  %v3903_v43 = vpop.f32.mrb[121].mxu1 }
 0x63c   :  { %v4828_v7 = vpop.f32.mrb[122].mxu1  ;;  %v4257_v1 = vld [vmem:[#allocation6 + $0x51] sm:$0xff] }
 0x63d   :  { %4030 = vst.msk [vmem:[#allocation6 + $0x78] sm:$0xff] %vm4014_vm9, %v4828_v7  ;;  %v3906_v47 = vpop.f32.mrb[123].mxu1  ;;  %v6875_v58 = vld [vmem:[#allocation6 + $0x4f] sm:$0xff] }
 0x63e   :  { %4028 = vst.msk [vmem:[#allocation6 + $0x68] sm:$0xff] %vm4014_vm9, %v3906_v47 }
 0x63f   :  { %4083 = vrot.lane.b32.xlu0 %v4209_v37, %s5221_s6  ;;  %4274 = vrot.lane.b32.xlu1 %v4257_v1, %s5224_s20 }
 0x642   :  { %v4831_v44 = vpop.f32.mrb[124].mxu1  ;;  %v4066_v5 = vld [vmem:[#allocation6 + $0x70] sm:$0xff] }
 0x643   :  { %4033 = vst.msk [vmem:[#allocation6 + $0x90] sm:$0xff] %vm4014_vm9, %v4831_v44  ;;  %4369 = vrot.lane.b32.xlu0 %v4209_v37, %s5226_s22  ;;  %4178 = vrot.lane.b32.xlu1 %v6875_v58, %s5225_s21  ;;  %v3919_v56 = vpop.f32.mrb[125].mxu1 }
 0x644   :  { %v4832_v52 = vpop.f32.mrb[126].mxu1  ;;  %v4114_v16 = vld [vmem:[#allocation6 + $0x71] sm:$0xff] }
 0x645   :  { %4034 = vst.msk [vmem:[#allocation6 + $0x98] sm:$0xff] %vm4014_vm9, %v4832_v52  ;;  %v3922_v9 = vpop.f32.mrb[127].mxu1  ;;  %v6892_v8 = vld [vmem:[#allocation6 + $0x6f] sm:$0xff] }
 0x646   :  { %4032 = vst.msk [vmem:[#allocation6 + $0x88] sm:$0xff] %vm4014_vm9, %v3922_v9 }
 0x647   :  { %4131 = vrot.lane.b32.xlu0 %v4257_v1, %s5222_s18  ;;  %4085 = vrot.lane.b32.xlu1 %v4066_v5, %s5221_s6 }
 0x64a   :  { %v4211_v24 = vld [vmem:[#allocation6 + $0x90] sm:$0xff] }
 0x64b   :  { %4417 = vrot.lane.b32.xlu0 %v4257_v1, %s5227_s23  ;;  %4371 = vrot.lane.b32.xlu1 %v4066_v5, %s5226_s22 }
 0x64c   :  { %v4259_v46 = vld [vmem:[#allocation6 + $0x91] sm:$0xff] }
 0x64d   :  { %v6902_v18 = vld [vmem:[#allocation6 + $0x8f] sm:$0xff] }
 0x64f   :  { %4321 = vrot.lane.b32.xlu0 %v6875_v58, %s5228_s3  ;;  %4133 = vrot.lane.b32.xlu1 %v4114_v16, %s5222_s18 }
 0x653   :  { %4228 = vrot.lane.b32.xlu0 %v4066_v5, %s5223_s19  ;;  %4419 = vrot.lane.b32.xlu1 %v4114_v16, %s5227_s23 }
 0x657   :  { %4276 = vrot.lane.b32.xlu0 %v4114_v16, %s5224_s20  ;;  %4323 = vrot.lane.b32.xlu1 %v6892_v8, %s5228_s3 }
 0x65b   :  { %4180 = vrot.lane.b32.xlu0 %v6892_v8, %s5225_s21  ;;  %4230 = vrot.lane.b32.xlu1 %v4211_v24, %s5223_s19 }
 0x65f   :  { %4087 = vrot.lane.b32.xlu0 %v4211_v24, %s5221_s6  ;;  %4278 = vrot.lane.b32.xlu1 %v4259_v46, %s5224_s20 }
 0x663   :  { %4373 = vrot.lane.b32.xlu0 %v4211_v24, %s5226_s22  ;;  %4182 = vrot.lane.b32.xlu1 %v6902_v18, %s5225_s21 }
 0x667   :  { %4135 = vrot.lane.b32.xlu0 %v4259_v46, %s5222_s18 }
 0x66b   :  { %4421 = vrot.lane.b32.xlu0 %v4259_v46, %s5227_s23 }
 0x66f   :  { %4325 = vrot.lane.b32.xlu0 %v6902_v18, %s5228_s3 }
 0x687   :  { %v4835_v53 = vpop.f32.mrb[128].mxu1 }
 0x688   :  { %4037 = vst.msk [vmem:[#allocation6 + $0xb0] sm:$0xff] %vm4014_vm9, %v4835_v53  ;;  %v3935_v41 = vpop.f32.mrb[129].mxu1 }
 0x689   :  { %v4836_v26 = vpop.f32.mrb[130].mxu1 }
 0x68a   :  { %4038 = vst.msk [vmem:[#allocation6 + $0xb8] sm:$0xff] %vm4014_vm9, %v4836_v26  ;;  %v3938_v0 = vpop.f32.mrb[131].mxu1 }
 0x68b   :  { %4036 = vst.msk [vmem:[#allocation6 + $0xa8] sm:$0xff] %vm4014_vm9, %v3938_v0 }
 0x68f   :  { %v4839_v49 = vpop.f32.mrb[132].mxu1  ;;  %v4212_v39 = vld [vmem:[#allocation6 + $0xb0] sm:$0xff] }
 0x690   :  { %4041 = vst.msk [vmem:[#allocation6 + $0xd0] sm:$0xff] %vm4014_vm9, %v4839_v49  ;;  %4232 = vrot.lane.b32.xlu0 %v4212_v39, %s5223_s19  ;;  %4089 = vrot.lane.b32.xlu1 %v4212_v39, %s5221_s6  ;;  %v3951_v25 = vpop.f32.mrb[133].mxu1 }
 0x691   :  { %v4840_v12 = vpop.f32.mrb[134].mxu1  ;;  %v4260_v55 = vld [vmem:[#allocation6 + $0xb1] sm:$0xff] }
 0x692   :  { %4042 = vst.msk [vmem:[#allocation6 + $0xd8] sm:$0xff] %vm4014_vm9, %v4840_v12  ;;  %v3954_v32 = vpop.f32.mrb[135].mxu1  ;;  %v6921_v36 = vld [vmem:[#allocation6 + $0xaf] sm:$0xff] }
 0x693   :  { %4040 = vst.msk [vmem:[#allocation6 + $0xc8] sm:$0xff] %vm4014_vm9, %v3954_v32 }
 0x694   :  { %4375 = vrot.lane.b32.xlu1 %v4212_v39, %s5226_s22  ;;  %4280 = vrot.lane.b32.xlu0 %v4260_v55, %s5224_s20 }
 0x697   :  { %v4843_v13 = vpop.f32.mrb[136].mxu1  ;;  %v4069_v31 = vld [vmem:[#allocation6 + $0xd0] sm:$0xff] }
 0x698   :  { %4045 = vst.msk [vmem:[#allocation6 + $0xf0] sm:$0xff] %vm4014_vm9, %v4843_v13  ;;  %4137 = vrot.lane.b32.xlu1 %v4260_v55, %s5222_s18  ;;  %4184 = vrot.lane.b32.xlu0 %v6921_v36, %s5225_s21  ;;  %v3967_v50 = vpop.f32.mrb[137].mxu1 }
 0x699   :  { %v4844_v54 = vpop.f32.mrb[138].mxu1  ;;  %v4117_v11 = vld [vmem:[#allocation6 + $0xd1] sm:$0xff] }
 0x69a   :  { %4046 = vst.msk [vmem:[#allocation6 + $0xf8] sm:$0xff] %vm4014_vm9, %v4844_v54  ;;  %v3970_v4 = vpop.f32.mrb[139].mxu1  ;;  %v6943_v6 = vld [vmem:[#allocation6 + $0xcf] sm:$0xff] }
 0x69b   :  { %4044 = vst.msk [vmem:[#allocation6 + $0xe8] sm:$0xff] %vm4014_vm9, %v3970_v4 }
 0x69c   :  { %4423 = vrot.lane.b32.xlu1 %v4260_v55, %s5227_s23  ;;  %4091 = vrot.lane.b32.xlu0 %v4069_v31, %s5221_s6 }
 0x69f   :  { %v4847_v23 = vpop.f32.mrb[140].mxu1  ;;  %v4214_v19 = vld [vmem:[#allocation6 + $0xf0] sm:$0xff] }
 0x6a0   :  { %4049 = vst.msk [vmem:[#allocation6 + $0x110] sm:$0xff] %vm4014_vm9, %v4847_v23  ;;  %4327 = vrot.lane.b32.xlu1 %v6921_v36, %s5228_s3  ;;  %4377 = vrot.lane.b32.xlu0 %v4069_v31, %s5226_s22  ;;  %v3983_v30 = vpop.f32.mrb[141].mxu1 }
 0x6a1   :  { %v4848_v28 = vpop.f32.mrb[142].mxu1  ;;  %v4262_v10 = vld [vmem:[#allocation6 + $0xf1] sm:$0xff] }
 0x6a2   :  { %4050 = vst.msk [vmem:[#allocation6 + $0x118] sm:$0xff] %vm4014_vm9, %v4848_v28  ;;  %v3986_v29 = vpop.f32.mrb[143].mxu1  ;;  %v6955_v43 = vld [vmem:[#allocation6 + $0xef] sm:$0xff] }
 0x6a3   :  { %4048 = vst.msk [vmem:[#allocation6 + $0x108] sm:$0xff] %vm4014_vm9, %v3986_v29 }
 0x6a4   :  { %4234 = vrot.lane.b32.xlu1 %v4069_v31, %s5223_s19  ;;  %4139 = vrot.lane.b32.xlu0 %v4117_v11, %s5222_s18 }
 0x6a5   :  { %v4225_v34 = vpop.permute.xlu0 %4224  ;;  %v4082_v35 = vpop.permute.xlu1 %4081 }
 0x6a6   :  { %v4104_v63 = vadd.f32 %v6865_v22, %v4082_v35 }
 0x6a7   :  { %v4851_v40 = vpop.f32.mrb[144].mxu1  ;;  %v4359_v9 = vld [vmem:[#allocation6 + $0x110] sm:$0xff] }
 0x6a8   :  { %4282 = vrot.lane.b32.xlu1 %v4117_v11, %s5224_s20  ;;  %4425 = vrot.lane.b32.xlu0 %v4117_v11, %s5227_s23  ;;  %4053 = vst.msk [vmem:[#allocation6 + $0x130] sm:$0xff] %vm4014_vm9, %v4851_v40  ;;  %v3999_v61 = vpop.f32.mrb[145].mxu1 }
 0x6a9   :  { %v4273_v51 = vpop.permute.xlu0 %4272  ;;  %v4130_v20 = vpop.permute.xlu1 %4129  ;;  %v4407_v0 = vld [vmem:[#allocation6 + $0x111] sm:$0xff] }
 0x6aa   :  { %v4152_v38 = vadd.f32 %v4130_v20, %v4104_v63  ;;  %v4852_v42 = vpop.f32.mrb[146].mxu1  ;;  %v4311_v24 = vld [vmem:[#allocation6 + $0x10f] sm:$0xff] }
 0x6ab   :  { %4054 = vst.msk [vmem:[#allocation6 + $0x138] sm:$0xff] %vm4014_vm9, %v4852_v42  ;;  %v4002_v15 = vpop.f32.mrb[147].mxu1 }
 0x6ac   :  { %4329 = vrot.lane.b32.xlu0 %v6943_v6, %s5228_s3  ;;  %4186 = vrot.lane.b32.xlu1 %v6943_v6, %s5225_s21  ;;  %4052 = vst.msk [vmem:[#allocation6 + $0x128] sm:$0xff] %vm4014_vm9, %v4002_v15 }
 0x6ad   :  { %v4177_v48 = vpop.permute.xlu0 %4176  ;;  %v4227_v21 = vpop.permute.xlu1 %4226 }
 0x6ae   :  { %v4200_v33 = vadd.f32 %v4177_v48, %v4151_v62 }
 0x6af   :  { %v4360_v4 = vld [vmem:[#allocation6 + $0x130] sm:$0xff] }
 0x6b0   :  { %v4248_v45 = vadd.f32 %v4225_v34, %v4200_v33  ;;  %4236 = vrot.lane.b32.xlu0 %v4214_v19, %s5223_s19  ;;  %4093 = vrot.lane.b32.xlu1 %v4214_v19, %s5221_s6 }
 0x6b1   :  { %v4084_v59 = vpop.permute.xlu0 %4083  ;;  %v4275_v3 = vpop.permute.xlu1 %4274 }
 0x6b2   :  { %v4296_v14 = vadd.f32 %v4273_v51, %v4248_v45  ;;  %v4105_v7 = vadd.f32 %v6875_v58, %v4084_v59  ;;  %v4408_v35 = vld [vmem:[#allocation6 + $0x131] sm:$0xff] }
 0x6b3   :  { %v4312_v29 = vld [vmem:[#allocation6 + $0x12f] sm:$0xff] }
 0x6b4   :  { %4379 = vrot.lane.b32.xlu1 %v4214_v19, %s5226_s22  ;;  %4284 = vrot.lane.b32.xlu0 %v4262_v10, %s5224_s20 }
 0x6b5   :  { %v4370_v57 = vpop.permute.xlu0 %4369  ;;  %v4179_v22 = vpop.permute.xlu1 %4178 }
 0x6b6   :  { %v4201_v37 = vadd.f32 %v4179_v22, %v4152_v38 }
 0x6b8   :  { %v4249_v47 = vadd.f32 %v4227_v21, %v4201_v37  ;;  %4141 = vrot.lane.b32.xlu1 %v4262_v10, %s5222_s18  ;;  %4188 = vrot.lane.b32.xlu0 %v6955_v43, %s5225_s21 }
 0x6b9   :  { %v4132_v1 = vpop.permute.xlu0 %4131  ;;  %v4086_v44 = vpop.permute.xlu1 %4085 }
 0x6ba   :  { %v4153_v56 = vadd.f32 %v4132_v1, %v4105_v7  ;;  %v4297_v52 = vadd.f32 %v4275_v3, %v4249_v47  ;;  %v4106_v58 = vadd.f32 %v6892_v8, %v4086_v44 }
 0x6bc   :  { %4427 = vrot.lane.b32.xlu1 %v4262_v10, %s5227_s23  ;;  %4381 = vrot.lane.b32.xlu0 %v4359_v9, %s5226_s22 }
 0x6bd   :  { %v4418_v5 = vpop.permute.xlu0 %4417  ;;  %v4372_v16 = vpop.permute.xlu1 %4371 }
 0x6c0   :  { %4331 = vrot.lane.b32.xlu1 %v6955_v43, %s5228_s3  ;;  %4333 = vrot.lane.b32.xlu0 %v4311_v24, %s5228_s3 }
 0x6c1   :  { %v4322_v46 = vpop.permute.xlu0 %4321  ;;  %v4134_v53 = vpop.permute.xlu1 %4133 }
 0x6c2   :  { %v4345_v41 = vadd.f32 %v4322_v46, %v4296_v14  ;;  %v4154_v26 = vadd.f32 %v4134_v53, %v4106_v58 }
 0x6c4   :  { %v4393_v49 = vadd.f32 %v4370_v57, %v4345_v41  ;;  %4238 = vrot.lane.b32.xlu1 %v4359_v9, %s5223_s19  ;;  %4429 = vrot.lane.b32.xlu0 %v4407_v0, %s5227_s23 }
 0x6c5   :  { %v4229_v39 = vpop.permute.xlu0 %4228  ;;  %v4420_v25 = vpop.permute.xlu1 %4419 }
 0x6c6   :  { %v6969_v12 = vadd.f32 %v4418_v5, %v4393_v49 }
 0x6c8   :  { %4286 = vrot.lane.b32.xlu1 %v4407_v0, %s5224_s20 }
 0x6c9   :  { %v4277_v8 = vpop.permute.xlu0 %4276  ;;  %v4324_v32 = vpop.permute.xlu1 %4323 }
 0x6ca   :  { %v4346_v55 = vadd.f32 %v4324_v32, %v4297_v52 }
 0x6cc   :  { %v4394_v13 = vadd.f32 %v4372_v16, %v4346_v55  ;;  %4190 = vrot.lane.b32.xlu1 %v4311_v24, %s5225_s21 }
 0x6cd   :  { %v4181_v50 = vpop.permute.xlu0 %4180  ;;  %v4231_v54 = vpop.permute.xlu1 %4230 }
 0x6ce   :  { %v6973_v17 = vadd.f32 %v4420_v25, %v4394_v13  ;;  %v4202_v31 = vadd.f32 %v4181_v50, %v4153_v56 }
 0x6d0   :  { %v4250_v23 = vadd.f32 %v4229_v39, %v4202_v31  ;;  %4383 = vrot.lane.b32.xlu1 %v4360_v4, %s5226_s22 }
 0x6d1   :  { %v4088_v30 = vpop.permute.xlu0 %4087  ;;  %v4279_v27 = vpop.permute.xlu1 %4278 }
 0x6d2   :  { %v4298_v28 = vadd.f32 %v4277_v8, %v4250_v23  ;;  %v4107_v47 = vadd.f32 %v6902_v18, %v4088_v30 }
 0x6d4   :  { %4335 = vrot.lane.b32.xlu1 %v4312_v29, %s5228_s3 }
 0x6d5   :  { %v4374_v11 = vpop.permute.xlu0 %4373  ;;  %v4183_v60 = vpop.permute.xlu1 %4182 }
 0x6d6   :  { %v4203_v34 = vadd.f32 %v4183_v60, %v4154_v26 }
 0x6d8   :  { %v4251_v40 = vadd.f32 %v4231_v54, %v4203_v34  ;;  %4431 = vrot.lane.b32.xlu1 %v4408_v35, %s5227_s23 }
 0x6d9   :  { %v4136_v2 = vpop.permute.xlu0 %4135 }
 0x6da   :  { %v4299_v63 = vadd.f32 %v4279_v27, %v4251_v40  ;;  %v4155_v1 = vadd.f32 %v4136_v2, %v4107_v47 }
 0x6dd   :  { %v6978_v61 = vpop.permute.xlu0 %4421 }
 0x6e1   :  { %v4326_v51 = vpop.permute.xlu0 %4325 }
 0x6e2   :  { %v4347_v20 = vadd.f32 %v4326_v51, %v4298_v28 }
 0x6e4   :  { %v6980_v38 = vadd.f32 %v4374_v11, %v4347_v20 }
 0x702   :  { %v4233_v42 = vpop.permute.xlu0 %4232  ;;  %v4090_v15 = vpop.permute.xlu1 %4089 }
 0x703   :  { %v4108_v24 = vadd.f32 %v6921_v36, %v4090_v15  ;;  %v4707_v36 = vld [vmem:[%s7028_s8] ss:$0 sm:$0xff] }
 0x704   :  { %v4456_v28 = vadd.f32 %v4707_v36, %v6969_v12  ;;  %v4457_v11 = vadd.f32 %v4707_v36, %v6973_v17 }
 0x706   :  { %v4376_v62 = vpop.permute.xlu1 %4375  ;;  %v4281_v48 = vpop.permute.xlu0 %4280  ;;  %v4465_v40 = vsel %vm4464_vm10, %v4456_v28, -inf  ;;  %v4466_v51 = vsel %vm4464_vm10, %v4457_v11, -inf }
 0x70a   :  { %v4138_v21 = vpop.permute.xlu1 %4137  ;;  %v4185_v33 = vpop.permute.xlu0 %4184 }
 0x70b   :  { %v4204_v52 = vadd.f32 %v4185_v33, %v4155_v1  ;;  %v4156_v46 = vadd.f32 %v4138_v21, %v4108_v24 }
 0x70d   :  { %v4252_v16 = vadd.f32 %v4233_v42, %v4204_v52 }
 0x70e   :  { %v6982_v19 = vpop.permute.xlu1 %4423  ;;  %v4092_v45 = vpop.permute.xlu0 %4091 }
 0x70f   :  { %v4300_v53 = vadd.f32 %v4281_v48, %v4252_v16  ;;  %v4109_v32 = vadd.f32 %v6943_v6, %v4092_v45 }
 0x712   :  { %v4328_v59 = vpop.permute.xlu1 %4327  ;;  %v4378_v3 = vpop.permute.xlu0 %4377 }
 0x713   :  { %v4348_v14 = vadd.f32 %v4328_v59, %v4299_v63 }
 0x715   :  { %v6984_v10 = vadd.f32 %v4376_v62, %v4348_v14 }
 0x716   :  { %v4235_v57 = vpop.permute.xlu1 %4234  ;;  %v4140_v22 = vpop.permute.xlu0 %4139 }
 0x717   :  { %v4157_v55 = vadd.f32 %v4140_v22, %v4109_v32  ;;  %v4444_v47 = vadd.f32 %v6982_v19, %v6984_v10 }
 0x71a   :  { %v4283_v37 = vpop.permute.xlu1 %4282  ;;  %v4426_v7 = vpop.permute.xlu0 %4425 }
 0x71e   :  { %v4330_v44 = vpop.permute.xlu0 %4329  ;;  %v4187_v56 = vpop.permute.xlu1 %4186 }
 0x71f   :  { %v4349_v26 = vadd.f32 %v4330_v44, %v4300_v53  ;;  %v4205_v0 = vadd.f32 %v4187_v56, %v4156_v46 }
 0x721   :  { %v4397_v39 = vadd.f32 %v4378_v3, %v4349_v26  ;;  %v4253_v25 = vadd.f32 %v4235_v57, %v4205_v0 }
 0x722   :  { %v4237_v9 = vpop.permute.xlu0 %4236  ;;  %v4094_v5 = vpop.permute.xlu1 %4093 }
 0x723   :  { %v4445_v13 = vadd.f32 %v4426_v7, %v4397_v39  ;;  %v4301_v50 = vadd.f32 %v4283_v37, %v4253_v25  ;;  %v4110_v20 = vadd.f32 %v6955_v43, %v4094_v5  ;;  %v4443_v43 = vadd.f32 %v6978_v61, %v6980_v38 }
 0x724   :  { %v4459_v5 = vadd.f32 %v4707_v36, %v4444_v47 }
 0x725   :  { %v4460_v30 = vadd.f32 %v4707_v36, %v4445_v13 }
 0x726   :  { %v4380_v58 = vpop.permute.xlu1 %4379  ;;  %v4285_v41 = vpop.permute.xlu0 %4284  ;;  %v4468_v53 = vsel %vm4464_vm10, %v4459_v5, -inf }
 0x727   :  { %v4469_v34 = vsel %vm4464_vm10, %v4460_v30, -inf }
 0x728   :  { %v4470_v15 = vmax.f32 %v4465_v40, %v4469_v34 }
 0x72a   :  { %v4142_v49 = vpop.permute.xlu1 %4141  ;;  %v4189_v8 = vpop.permute.xlu0 %4188 }
 0x72b   :  { %v4206_v4 = vadd.f32 %v4189_v8, %v4157_v55  ;;  %v4158_v48 = vadd.f32 %v4142_v49, %v4110_v20 }
 0x72d   :  { %v4254_v6 = vadd.f32 %v4237_v9, %v4206_v4  ;;  %v4458_v9 = vadd.f32 %v4707_v36, %v4443_v43 }
 0x72e   :  { %v4428_v18 = vpop.permute.xlu1 %4427  ;;  %v4382_v23 = vpop.permute.xlu0 %4381 }
 0x72f   :  { %v4302_v12 = vadd.f32 %v4285_v41, %v4254_v6  ;;  %v4467_v46 = vsel %vm4464_vm10, %v4458_v9, -inf }
 0x732   :  { %v4332_v54 = vpop.permute.xlu1 %4331  ;;  %v4334_v2 = vpop.permute.xlu0 %4333 }
 0x733   :  { %v4350_v31 = vadd.f32 %v4332_v54, %v4301_v50  ;;  %v4351_v17 = vadd.f32 %v4334_v2, %v4302_v12 }
 0x735   :  { %v4398_v27 = vadd.f32 %v4380_v58, %v4350_v31  ;;  %v4399_v59 = vadd.f32 %v4382_v23, %v4351_v17 }
 0x736   :  { %v4239_v29 = vpop.permute.xlu1 %4238  ;;  %v4430_v14 = vpop.permute.xlu0 %4429 }
 0x737   :  { %v4446_v60 = vadd.f32 %v4428_v18, %v4398_v27  ;;  %v4447_v22 = vadd.f32 %v4430_v14, %v4399_v59 }
 0x739   :  { %v4461_v35 = vadd.f32 %v4707_v36, %v4446_v60  ;;  %v4462_v44 = vadd.f32 %v4707_v36, %v4447_v22 }
 0x73a   :  { %v4287_v63 = vpop.permute.xlu1 %4286 }
 0x73b   :  { %v4471_v42 = vsel %vm4464_vm10, %v4461_v35, -inf  ;;  %v4473_v24 = vsel %vm4464_vm10, %v4462_v44, -inf }
 0x73c   :  { %v4472_v62 = vmax.f32 %v4466_v51, %v4471_v42  ;;  %v4474_v61 = vmax.f32 %v4467_v46, %v4473_v24 }
 0x73e   :  { %v4191_v21 = vpop.permute.xlu1 %4190  ;;  %v4477_v33 = vmax.f32 %v4470_v15, %v4472_v62 }
 0x73f   :  { %v4207_v45 = vadd.f32 %v4191_v21, %v4158_v48 }
 0x741   :  { %v4255_v3 = vadd.f32 %v4239_v29, %v4207_v45 }
 0x742   :  { %v4384_v57 = vpop.permute.xlu1 %4383 }
 0x743   :  { %v4303_v37 = vadd.f32 %v4287_v63, %v4255_v3 }
 0x746   :  { %v4336_v7 = vpop.permute.xlu1 %4335 }
 0x747   :  { %v4352_v1 = vadd.f32 %v4336_v7, %v4303_v37 }
 0x749   :  { %v4400_v56 = vadd.f32 %v4384_v57, %v4352_v1 }
 0x74a   :  { %v4432_v52 = vpop.permute.xlu1 %4431 }
 0x74b   :  { %v4448_v16 = vadd.f32 %v4432_v52, %v4400_v56 }
 0x74d   :  { %v4463_v58 = vadd.f32 %v4707_v36, %v4448_v16 }
 0x74f   :  { %v4475_v41 = vsel %vm4464_vm10, %v4463_v58, -inf }
 0x750   :  { %v4476_v38 = vmax.f32 %v4468_v53, %v4475_v41 }
 0x752   :  { %v4478_v26 = vmax.f32 %v4474_v61, %v4476_v38 }
 0x754   :  { %v4479_v19 = vmax.f32 %v4477_v33, %v4478_v26 }
 0x756   :  { %v4480_v10 = vsel %vm4464_vm10, %v4479_v19, -inf }
 0x757   :  { %4481 = vmax.xlane.f32.xlu0 %v4480_v10 }
 0x7e4   :  { %v4482_v0 = vpop.xlane.xlu0 %4481 }
 0x7e5   :  { %v4483_v49 = vrot.slane %v4482_v0, 4 }
 0x7e7   :  { %v4484_v39 = vmax.f32 %v4482_v0, %v4483_v49 }
 0x7e9   :  { %v4485_v25 = vrot.slane %v4484_v39, 2 }
 0x7eb   :  { %v4486_v8 = vmax.f32 %v4484_v39, %v4485_v25 }
 0x7ed   :  { %v4487_v18 = vrot.slane %v4486_v8, 1 }
 0x7ef   :  { %v4488_v32 = vmax.f32 %v4486_v8, %v4487_v18 }
 0x7f1   :  { %4880 = vpush %v4488_v32 }
 0x822   :  { %s4881_s8 = spop %4880 }
 0x823   :  { %v4490_v55 = vstv %s4881_s8 }
 0x824   :  { %v4708_v13 = vmul.f32 -1.442695, %v4490_v55 }
 0x826   :  { %5118 = vpow2.f32 %v4708_v13 }
 0x830   :  { %v5119_v50 = vpop.eup %5118 }
 0x831   :  { %v4494_v54 = vadd.f32 1.0, %v5119_v50 }
 0x833   :  { %5120 = vrcp.f32 %v4494_v54 }
 0x83d   :  { %v5121_v36 = vpop.eup %5120 }
 0x83e   :  { %v4497_v4 = vadd.f32 1.0, %v5121_v36 }
 0x840   :  { %v4498_v31 = vmax.f32 %v4497_v4, 0.0 }
 0x842   :  { %5122 = vtanh.f32 %v4498_v31 }
 0x84c   :  { %v5123_v23 = vpop.eup %5122 }
 0x84d   :  { %4501 = vst.msk [vmem:[#allocation12] sm:$0x1] %vm4500_vm11, %v5123_v23 }
 0x84e   :  { %5189 = shalt.err (!%p5186_p6)
}
 0x84f   :  { %s5190_s30 = scalar_lea.hbm %s7029_s9, 16 }
 0x850   :  { %p5191_p7 = scmp.ne.s32.totalorder %s7029_s9, %s5190_s30  ;;  %p5194_p8 = scmp.lt.u32.totalorder %s5190_s30, %s7029_s9 }
 0x852   :  { %p5196_p9 = pnand %p5194_p8, %p5191_p7 }
 0x854   :  { %5199 = shalt.err (!%p5196_p9)
}
 0x855   :  { %4511 = dma.vmem_to_hbm [thread:$0]  %s4509_s2, 16, %s7029_s9, [#allocation9]  }
 0x856   :  { %5204 = dma.done.wait [#allocation9], 16  }
 0x857   :  { %5205 = vsyncadd [#allocation9], 4294967280 }
 0x858   :  { %4515 = vsyncpa [#allocation8], 1 }
 0x859   :  { %4516 = vsyncpa [#allocation11], 1 }
 0x85a   :  { %4517 = vsyncpa [#allocation9], 1 }

</bundles_post_ra>
